<compile_context>
chip_gen: v6e
topology: v6e:2x2x1
jax: 0.10.0
libtpu: 0.0.40
codegen_flags: <defaults>
</compile_context>

<pallas_src>
import functools

import jax
import jax.numpy as jnp
import numpy as np
from jax import lax
from jax.experimental import pallas as pl
from jax.experimental.pallas import tpu as pltpu


# ----------------------------- helpers --------------------------------------
def align_multiple(value, multiple_size=8):
    if value % multiple_size != 0:
        value += multiple_size - value % multiple_size
    return value


def _softplus(x):
    # matches torch.nn.functional.softplus (threshold=20)
    return jnp.where(x > 20.0, x, jnp.log1p(jnp.exp(jnp.minimum(x, 20.0))))


def _silu(x):
    return x * jax.nn.sigmoid(x)


# ----------------------------- Pallas kernel --------------------------------
def rodimus_kernel(
    x_ref,          # (1, C, H)     bf16   current sequence block
    w_up_ref,       # (H, D)        bf16
    w_gate_ref,     # (H, D)        bf16
    conv_w_ref,     # (K, D)        f32    depthwise taps (tap K-1 = current token)
    conv_b_ref,     # (1, D)        f32
    w_qkgt_ref,     # (D, 4*Mp)     bf16   fused q | k | g | tau (128-lane padded)
    b_qkgt_ref,     # (1, 4*Mp)     f32
    w_i1_ref,       # (D, R)        bf16
    w_i2_ref,       # (R, D)        bf16
    b_i2_ref,       # (1, D)        f32
    res_w_ref,      # (1, D)        f32
    norm_w_ref,     # (1, D)        f32
    w_down_ref,     # (D, H)        bf16
    o_ref,          # (1, C, H)     bf16
    h_state_ref,    # (D, Mp)       f32  scratch: GLA state (transposed), carried
    conv_buf_ref,   # (8 + C, D)    f32  scratch: conv buffer with 8-row halo head
    *,
    conv_size,
    sub_chunk,
    mem_size,
    norm_eps,
    k_norm_eps,
):
    f32, bf16 = jnp.float32, jnp.bfloat16
    C = x_ref.shape[1]
    D = w_down_ref.shape[0]
    Mp = w_qkgt_ref.shape[1] // 4
    K = conv_size
    Ci = sub_chunk
    NS = C // Ci
    scale = float(mem_size) ** -0.5

    c_idx = pl.program_id(1)

    @pl.when(c_idx == 0)
    def _init():
        h_state_ref[...] = jnp.zeros_like(h_state_ref)
        conv_buf_ref[0:8, :] = jnp.zeros((8, D), f32)   # causal zero pad

    # ---- big projections, once per outer block (bf16 MXU, f32 accumulate) ---
    x = x_ref[0]                                                        # (C, H)
    up = jnp.dot(x, w_up_ref[...], preferred_element_type=f32)          # (C, D)
    gate = jnp.dot(x, w_gate_ref[...], preferred_element_type=f32)      # (C, D)

    # ---- ShortConvolution: persistent, sublane-aligned halo buffer ----------
    conv_buf_ref[8:8 + C, :] = up                                       # aligned store
    padded = conv_buf_ref[...]                                          # (8 + C, D)
    conv_w = conv_w_ref[...]
    acc = padded[8 - (K - 1):8 - (K - 1) + C, :] * conv_w[0:1, :]
    for j in range(1, K):
        acc = acc + padded[8 - (K - 1) + j:8 - (K - 1) + j + C, :] * conv_w[j:j + 1, :]
    shift_h = _silu(acc + conv_b_ref[...])                              # (C, D) f32
    conv_buf_ref[0:8, :] = padded[C:C + 8, :]                           # aligned halo carry

    # ---- fused q / k / g / tau projection (128-lane padded sections) --------
    sh_bf = shift_h.astype(bf16)
    qkgt = jnp.dot(sh_bf, w_qkgt_ref[...],
                   preferred_element_type=f32) + b_qkgt_ref[...]
    q = qkgt[:, 0 * Mp:1 * Mp]
    k = qkgt[:, 1 * Mp:2 * Mp]
    g = qkgt[:, 2 * Mp:3 * Mp]
    tau = qkgt[:, 3 * Mp:4 * Mp]

    # ---- input gate (low-rank MLP + sigmoid) on the pre-conv up projection --
    up_bf = up.astype(bf16)
    i_low = jnp.dot(up_bf, w_i1_ref[...], preferred_element_type=f32)
    i_logit = jnp.dot(i_low.astype(bf16), w_i2_ref[...],
                      preferred_element_type=f32) + b_i2_ref[...]
    v = jax.nn.sigmoid(i_logit) * up                                    # (C, D) f32

    # ---- gates (f32 elementwise / EUP) --------------------------------------
    g = _softplus(g)
    tau = jax.nn.sigmoid(tau)
    it_gate = jnp.exp(tau * jnp.log(jnp.maximum(g, 1e-24)))             # g ** tau
    gk = -g * tau                                                       # (C, Mp), <= 0

    # ---- L2-normalize k, scale by it_gate ------------------------------------
    k_nrm = jnp.sqrt(jnp.sum(k * k, axis=-1, keepdims=True))
    k = k / jnp.maximum(k_nrm, k_norm_eps) * it_gate

    # ---- chunked gated linear attention over Ci-row numeric sub-chunks ------
    row = lax.broadcasted_iota(jnp.int32, (Ci, Ci), 0)
    col = lax.broadcasted_iota(jnp.int32, (Ci, Ci), 1)
    causal = row >= col
    tri = causal.astype(f32)

    s = h_state_ref[...]                                                # (D, Mp)
    outs = []
    for i in range(NS):                                                 # static unroll
        sl = slice(i * Ci, (i + 1) * Ci)
        qc, kc, vc, gkc = q[sl], k[sl], v[sl], gk[sl]

        # inclusive per-sub-chunk cumsum of log decays (tiny masked matmul)
        G = jnp.dot(tri, gkc, preferred_element_type=f32)               # (Ci, Mp)
        exp_G = jnp.exp(G)
        qg = qc * (exp_G * scale)                                       # (Ci, Mp)
        kg = kc * jnp.exp(-G)                                           # (Ci, Mp)

        # inter-chunk: decayed q against the carried state
        o_inter = lax.dot_general(qg, s, (((1,), (1,)), ((), ())),
                                  preferred_element_type=f32)           # (Ci, D)
        # intra-chunk (jnp.where so inf in the masked region never becomes NaN)
        A = lax.dot_general(qg, kg, (((1,), (1,)), ((), ())),
                            preferred_element_type=f32)                 # (Ci, Ci)
        A = jnp.where(causal, A, 0.0)
        outs.append(o_inter + jnp.dot(A, vc, preferred_element_type=f32))

        # state update with the exact exp(G_last - G) <= 1 (no approx recip,
        # no exp-underflow blow-up feeding the carried state)
        g_last = G[Ci - 1:Ci, :]                                        # (1, Mp)
        exp_g_last = exp_G[Ci - 1:Ci, :]
        kd = kc * jnp.exp(g_last - G)                                   # (Ci, Mp)
        s = s * exp_g_last + lax.dot_general(
            vc, kd, (((0,), (0,)), ((), ())), preferred_element_type=f32)

    h_state_ref[...] = s
    o_attn = outs[0] if NS == 1 else jnp.concatenate(outs, axis=0)      # (C, D)

    # ---- residual + gated RMSNorm (norm_before_gate=False) + down proj -----
    o = o_attn + shift_h * res_w_ref[...]
    og = o * _silu(gate)
    rstd = lax.rsqrt(jnp.mean(og * og, axis=-1, keepdims=True) + norm_eps)
    y = og * rstd * norm_w_ref[...]
    o_ref[0] = jnp.dot(y.astype(bf16), w_down_ref[...],
                       preferred_element_type=f32).astype(o_ref.dtype)


# ----------------------------- one-time parameter prep -----------------------
def prepare_rodimus_params(params):
    """Hoisted weight fusion / casting (do once, reuse across forward calls)."""
    bf16, f32 = jnp.bfloat16, jnp.float32
    M = params["w_q"].shape[1]
    Mp = ((M + 127) // 128) * 128          # 128-lane aligned section width

    def pad_cols(w, width):
        return jnp.pad(w, ((0, 0), (0, width - w.shape[1])))

    w_qkgt = jnp.concatenate(
        [pad_cols(params["w_q"], Mp), pad_cols(params["w_k"], Mp),
         pad_cols(params["w_g"], Mp), pad_cols(params["w_tau"], Mp)],
        axis=1).astype(bf16)
    zeros = jnp.zeros((1, Mp), f32)
    b_qkgt = jnp.concatenate(
        [zeros, zeros,
         pad_cols(params["b_g"].astype(f32), Mp),
         pad_cols(params["b_tau"].astype(f32), Mp)], axis=1)

    weights = (
        params["w_up"].astype(bf16),
        params["w_gate"].astype(bf16),
        params["conv_w"].astype(f32),
        params["conv_b"].astype(f32),
        w_qkgt,
        b_qkgt,
        params["w_i1"].astype(bf16),
        params["w_i2"].astype(bf16),
        params["b_i2"].astype(f32),
        params["res_w"].astype(f32),
        params["norm_w"].astype(f32),
        params["w_down"].astype(bf16),
    )
    return {"weights": jax.tree.map(jnp.asarray, weights), "mem_size": M}


# ----------------------------- wrapper ---------------------------------------
def rodimus_forward(x, prepared, *, conv_size, block_size=256, sub_chunk=64,
                    norm_eps=1e-5, k_norm_eps=1e-12):
    B, T, H = x.shape
    weights = prepared["weights"]
    M = prepared["mem_size"]
    D = weights[-1].shape[0]            # w_down: (D, H)
    Mp = weights[4].shape[1] // 4
    R = weights[6].shape[1]
    K = conv_size
    assert 2 <= K and K - 1 <= 8

    # numeric sub-chunk (exp(+/-G) range) and outer DMA/projection block
    Ci = min(sub_chunk, T)
    C = min(block_size, T)
    C = max(C - C % Ci, Ci)
    assert T % C == 0, "sequence length must be divisible by the block size"
    assert C % Ci == 0 and C % 8 == 0 and C >= 8
    NC = T // C

    bf16, f32 = jnp.bfloat16, jnp.float32
    x_bf = x if x.dtype == bf16 else x.astype(bf16)

    kernel = functools.partial(
        rodimus_kernel, conv_size=K, sub_chunk=Ci, mem_size=M,
        norm_eps=norm_eps, k_norm_eps=k_norm_eps)

    def nbytes(a):
        return a.size * a.dtype.itemsize

    weight_bytes = sum(nbytes(w) for w in weights)
    io_bytes = 2 * (C * H * 2) * 2                    # x + o blocks, double buffered
    scratch_bytes = D * Mp * 4 + (8 + C) * D * 4
    work_bytes = C * (8 * D + 10 * Mp) * 4            # live block intermediates (rough)

    try:
        vmem_cap = int(pltpu.get_tpu_info().vmem_capacity_bytes)
    except Exception:
        vmem_cap = 64 * 1024 * 1024
    vmem_budget = int(vmem_cap * 0.85)                # leave compiler headroom

    flops = int(2 * B * T * (2 * H * D + 4 * D * Mp + 2 * D * R + D * H
                             + 2 * D * Mp + Ci * (Mp + D)))
    transcendentals = int(B * T * (8 * Mp + 4 * D))
    bytes_accessed = int(nbytes(x_bf) + B * T * H * 2 + weight_bytes)
    cost = pl.CostEstimate(flops=flops, transcendentals=transcendentals,
                           bytes_accessed=bytes_accessed)

    def build(single_buffer_weights):
        def wspec(arr):
            nd = arr.ndim
            index_map = lambda b, c, _nd=nd: (0,) * _nd
            if single_buffer_weights:
                # constant block index across the grid -> single buffer is enough
                return pl.BlockSpec(arr.shape, index_map,
                                    pipeline_mode=pl.Buffered(1))
            return pl.BlockSpec(arr.shape, index_map)

        in_specs = [pl.BlockSpec((1, C, H), lambda b, c: (b, c, 0))]
        in_specs += [wspec(w) for w in weights]
        out_spec = pl.BlockSpec((1, C, H), lambda b, c: (b, c, 0))

        wfactor = 1 if single_buffer_weights else 2
        vmem_need = weight_bytes * wfactor + io_bytes + scratch_bytes + work_bytes
        vmem_limit = int(min(vmem_budget, max(32 * 1024 * 1024,
                                              int(vmem_need * 1.5))))

        return pl.pallas_call(
            kernel,
            out_shape=jax.ShapeDtypeStruct((B, T, H), bf16),
            grid_spec=pltpu.PrefetchScalarGridSpec(
                num_scalar_prefetch=0,
                grid=(B, NC),
                in_specs=in_specs,
                out_specs=out_spec,
                scratch_shapes=[
                    pltpu.VMEM((D, Mp), f32),        # carried GLA state (transposed)
                    pltpu.VMEM((8 + C, D), f32),     # conv buffer w/ 8-row halo head
                ],
            ),
            compiler_params=pltpu.CompilerParams(
                dimension_semantics=("parallel", "arbitrary"),
                vmem_limit_bytes=vmem_limit,
            ),
            cost_estimate=cost,
        )

    # TODO(synk): on v7x with B<=2, add a second "parallel" axis (tile the H
    # output columns) and/or stream w_up/w_down via manual DMA slabs so both
    # TensorCores stay busy within the 64 MiB VMEM budget.
    try:
        return build(True)(x_bf, *weights)
    except Exception:
        # fallback if this JAX build rejects pipeline_mode=pl.Buffered(1)
        return build(False)(x_bf, *weights)


# ----------------------------- pure-JAX reference ----------------------------
# Mirrors the kernel's mixed precision (bf16 matmul operands, f32 accumulation)
# but evaluates the GLA with the exact token-by-token recurrence
# (fused_recurrent_gla semantics), independently checking the chunked
# state-carry / conv-halo logic of the kernel.
def rodimus_reference(x, params, *, conv_size, norm_eps=1e-5, k_norm_eps=1e-12):
    bf16 = jnp.bfloat16

    def mm(a, b):
        return jnp.dot(a.astype(bf16), b.astype(bf16),
                       preferred_element_type=jnp.float32)

    B, T, _ = x.shape
    M = params["w_q"].shape[1]

    up = mm(x, params["w_up"])
    gate = mm(x, params["w_gate"])

    pad = jnp.pad(up, ((0, 0), (conv_size - 1, 0), (0, 0)))
    acc = jnp.zeros_like(up)
    for j in range(conv_size):
        acc = acc + pad[:, j:j + T, :] * params["conv_w"][j][None, None, :]
    shift_h = _silu(acc + params["conv_b"])

    q = mm(shift_h, params["w_q"])
    k = mm(shift_h, params["w_k"])
    g = _softplus(mm(shift_h, params["w_g"]) + params["b_g"])
    tau = jax.nn.sigmoid(mm(shift_h, params["w_tau"]) + params["b_tau"])
    it_gate = g ** tau
    rt = -g * tau

    i_gate = jax.nn.sigmoid(mm(mm(up, params["w_i1"]), params["w_i2"]) + params["b_i2"])
    v = i_gate * up

    kn = jnp.sqrt(jnp.sum(k * k, axis=-1, keepdims=True))
    k = k / jnp.maximum(kn, k_norm_eps) * it_gate

    scale = M ** -0.5

    def step(h, inp):
        qt, kt, vt, gt = inp
        h = h * jnp.exp(gt)[:, None] + kt[:, None] * vt[None, :]
        return h, (qt * scale) @ h

    def per_batch(qb, kb, vb, gb):
        h0 = jnp.zeros((M, up.shape[-1]), jnp.float32)
        _, ob = lax.scan(step, h0, (qb, kb, vb, gb))
        return ob

    o = jax.vmap(per_batch)(q, k, v, rt)
    o = o + shift_h * params["res_w"]
    og = o * _silu(gate)
    rstd = lax.rsqrt(jnp.mean(og * og, axis=-1, keepdims=True) + norm_eps)
    y = og * rstd * params["norm_w"]
    return mm(y, params["w_down"])


# ----------------------------- main -------------------------------------------
if __name__ == "__main__":
    # Small, module-consistent shapes.  T=32 with block=16 / sub_chunk=8
    # exercises the carried GLA state + conv halo across blocks AND the
    # per-block sub-chunk loop.
    B, T = 2, 32
    H = 32                                   # hidden_size
    D = align_multiple(H * 2, 8)             # d_inner = 64
    M = 16                                   # expand_ratio / mem_size
    R = max(H // 64, 16)                     # input_gate_low_rank ('auto') = 16
    K = 4                                    # conv_size
    BLOCK = 16                               # outer DMA/projection block
    SUB = 8                                  # numeric GLA sub-chunk

    key = jax.random.PRNGKey(0)
    ks = jax.random.split(key, 16)

    def w(k_, shape, fan_in):
        return (jax.random.normal(k_, shape, jnp.float32) / np.sqrt(fan_in)).astype(
            jnp.float32
        )

    params = {
        "w_up":   w(ks[0], (H, D), H),
        "w_gate": w(ks[1], (H, D), H),
        "conv_w": w(ks[2], (K, D), K),                       # depthwise taps
        "conv_b": 0.1 * jax.random.normal(ks[3], (1, D), jnp.float32),
        "w_q":    w(ks[4], (D, M), D),
        "w_k":    w(ks[5], (D, M), D),
        "w_g":    w(ks[6], (D, M), D),
        "b_g":    0.1 * jax.random.normal(ks[7], (1, M), jnp.float32),
        "w_tau":  w(ks[8], (D, M), D),
        "b_tau":  0.1 * jax.random.normal(ks[9], (1, M), jnp.float32),
        "w_i1":   w(ks[10], (D, R), D),
        "w_i2":   w(ks[11], (R, D), R),
        "b_i2":   0.1 * jax.random.normal(ks[12], (1, D), jnp.float32),
        "res_w":  jnp.ones((1, D), jnp.float32),             # residual_weight init
        "norm_w": jnp.ones((1, D), jnp.float32),             # RMSNormGated weight init
        "w_down": w(ks[13], (D, H), D),
    }

    x = jax.random.normal(ks[14], (B, T, H), jnp.float32)

    prepared = prepare_rodimus_params(params)                # one-time weight prep
    out = jax.block_until_ready(
        rodimus_forward(x, prepared, conv_size=K, block_size=BLOCK, sub_chunk=SUB)
    )
    ref = jax.block_until_ready(rodimus_reference(x, params, conv_size=K))
    np.testing.assert_allclose(
        np.asarray(out, dtype=np.float32), np.asarray(ref), rtol=3e-2, atol=3e-2
    )

    # TODO(synk): attention_mask un-padding, cu_seqlens varlen packing and
    # past_key_values conv/recurrent cache read-write are inference plumbing
    # and are not implemented in the kernel.
    print("KERNEL_OK")
</pallas_src>

<mosaic_0001>
module attributes {stable_mosaic.version = 11 : i64} {
  func.func @rodimus_kernel(%arg0: i32, %arg1: i32, %arg2: memref<1x16x32xbf16, #tpu.memory_space<vmem>>, %arg3: memref<32x64xbf16, #tpu.memory_space<vmem>>, %arg4: memref<32x64xbf16, #tpu.memory_space<vmem>>, %arg5: memref<4x64xf32, #tpu.memory_space<vmem>>, %arg6: memref<1x64xf32, #tpu.memory_space<vmem>>, %arg7: memref<64x512xbf16, #tpu.memory_space<vmem>>, %arg8: memref<1x512xf32, #tpu.memory_space<vmem>>, %arg9: memref<64x16xbf16, #tpu.memory_space<vmem>>, %arg10: memref<16x64xbf16, #tpu.memory_space<vmem>>, %arg11: memref<1x64xf32, #tpu.memory_space<vmem>>, %arg12: memref<1x64xf32, #tpu.memory_space<vmem>>, %arg13: memref<1x64xf32, #tpu.memory_space<vmem>>, %arg14: memref<64x32xbf16, #tpu.memory_space<vmem>>, %arg15: memref<1x16x32xbf16, #tpu.memory_space<vmem>>, %arg16: memref<64x128xf32, #tpu.memory_space<vmem>>, %arg17: memref<24x64xf32, #tpu.memory_space<vmem>>) attributes {dimension_semantics = [#tpu.dimension_semantics<parallel>, #tpu.dimension_semantics<arbitrary>], iteration_bounds = array<i64: 2, 2>, scalar_prefetch = 0 : i64, scratch_operands = 2 : i64, tpu.core_type = #tpu.core_type<tc>, window_params = [{transform_indices = @transform_0, window_bounds = array<i64: 1, 16, 32>}, {pipeline_mode = #tpu.pipeline_mode<synchronous>, transform_indices = @transform_1, window_bounds = array<i64: 32, 64>}, {pipeline_mode = #tpu.pipeline_mode<synchronous>, transform_indices = @transform_2, window_bounds = array<i64: 32, 64>}, {pipeline_mode = #tpu.pipeline_mode<synchronous>, transform_indices = @transform_3, window_bounds = array<i64: 4, 64>}, {pipeline_mode = #tpu.pipeline_mode<synchronous>, transform_indices = @transform_4, window_bounds = array<i64: 1, 64>}, {pipeline_mode = #tpu.pipeline_mode<synchronous>, transform_indices = @transform_5, window_bounds = array<i64: 64, 512>}, {pipeline_mode = #tpu.pipeline_mode<synchronous>, transform_indices = @transform_6, window_bounds = array<i64: 1, 512>}, {pipeline_mode = #tpu.pipeline_mode<synchronous>, transform_indices = @transform_7, window_bounds = array<i64: 64, 16>}, {pipeline_mode = #tpu.pipeline_mode<synchronous>, transform_indices = @transform_8, window_bounds = array<i64: 16, 64>}, {pipeline_mode = #tpu.pipeline_mode<synchronous>, transform_indices = @transform_9, window_bounds = array<i64: 1, 64>}, {pipeline_mode = #tpu.pipeline_mode<synchronous>, transform_indices = @transform_10, window_bounds = array<i64: 1, 64>}, {pipeline_mode = #tpu.pipeline_mode<synchronous>, transform_indices = @transform_11, window_bounds = array<i64: 1, 64>}, {pipeline_mode = #tpu.pipeline_mode<synchronous>, transform_indices = @transform_12, window_bounds = array<i64: 64, 32>}, {transform_indices = @transform_13, window_bounds = array<i64: 1, 16, 32>}]} {
    %c0_i32 = arith.constant 0 : i32
    %0 = arith.cmpi eq, %arg1, %c0_i32 : i32
    %1 = arith.extui %0 : i1 to i32
    %c0_i32_0 = arith.constant 0 : i32
    %2 = arith.cmpi ne, %1, %c0_i32_0 : i32
    scf.if %2 {
      %cst_73 = arith.constant 0.000000e+00 : f32
      %193 = vector.broadcast %cst_73 : f32 to vector<64x128xf32>
      %c0_74 = arith.constant 0 : index
      %c0_75 = arith.constant 0 : index
      %194 = vector.load %arg16[%c0_74, %c0_75] : memref<64x128xf32, #tpu.memory_space<vmem>>, vector<64x128xf32>
      tpu.vector_store %arg16[%c0_74, %c0_75], %193 {strides = array<i32>} : memref<64x128xf32, #tpu.memory_space<vmem>>, vector<64x128xf32>,
      %cst_76 = arith.constant 0.000000e+00 : f32
      %195 = vector.broadcast %cst_76 : f32 to vector<8x64xf32>
      %c0_77 = arith.constant 0 : index
      %c0_78 = arith.constant 0 : index
      %196 = vector.load %arg17[%c0_77, %c0_78] : memref<24x64xf32, #tpu.memory_space<vmem>>, vector<8x64xf32>
      tpu.vector_store %arg17[%c0_77, %c0_78], %195 {strides = array<i32>} : memref<24x64xf32, #tpu.memory_space<vmem>>, vector<8x64xf32>,
    } else {
    }
    %c0 = arith.constant 0 : index
    %c0_1 = arith.constant 0 : index
    %c0_2 = arith.constant 0 : index
    %3 = vector.load %arg2[%c0, %c0_1, %c0_2] : memref<1x16x32xbf16, #tpu.memory_space<vmem>>, vector<1x16x32xbf16>
    %4 = vector.shape_cast %3 : vector<1x16x32xbf16> to vector<16x32xbf16>
    %c0_3 = arith.constant 0 : index
    %c0_4 = arith.constant 0 : index
    %5 = vector.load %arg3[%c0_3, %c0_4] : memref<32x64xbf16, #tpu.memory_space<vmem>>, vector<32x64xbf16>
    %cst = arith.constant dense<0.000000e+00> : vector<16x64xf32>
    %6 = tpu.matmul %4, %5, %cst {dimension_numbers = #tpu.dot_dimension_numbers<[1], [0], [0], [1], [0, 0, 1, 1], [], []>} : vector<16x32xbf16>, vector<32x64xbf16>, vector<16x64xf32> -> vector<16x64xf32>
    %c0_5 = arith.constant 0 : index
    %c0_6 = arith.constant 0 : index
    %7 = vector.load %arg4[%c0_5, %c0_6] : memref<32x64xbf16, #tpu.memory_space<vmem>>, vector<32x64xbf16>
    %cst_7 = arith.constant dense<0.000000e+00> : vector<16x64xf32>
    %8 = tpu.matmul %4, %7, %cst_7 {dimension_numbers = #tpu.dot_dimension_numbers<[1], [0], [0], [1], [0, 0, 1, 1], [], []>} : vector<16x32xbf16>, vector<32x64xbf16>, vector<16x64xf32> -> vector<16x64xf32>
    %c8 = arith.constant 8 : index
    %c0_8 = arith.constant 0 : index
    %9 = vector.load %arg17[%c8, %c0_8] : memref<24x64xf32, #tpu.memory_space<vmem>>, vector<16x64xf32>
    tpu.vector_store %arg17[%c8, %c0_8], %6 {strides = array<i32>} : memref<24x64xf32, #tpu.memory_space<vmem>>, vector<16x64xf32>,
    %c0_9 = arith.constant 0 : index
    %c0_10 = arith.constant 0 : index
    %10 = vector.load %arg17[%c0_9, %c0_10] : memref<24x64xf32, #tpu.memory_space<vmem>>, vector<24x64xf32>
    %c0_11 = arith.constant 0 : index
    %c0_12 = arith.constant 0 : index
    %11 = vector.load %arg5[%c0_11, %c0_12] : memref<4x64xf32, #tpu.memory_space<vmem>>, vector<4x64xf32>
    %12 = vector.extract_strided_slice %10 {offsets = [5, 0], sizes = [16, 64], strides = [1, 1]} : vector<24x64xf32> to vector<16x64xf32>
    %13 = vector.extract_strided_slice %11 {offsets = [0, 0], sizes = [1, 64], strides = [1, 1]} : vector<4x64xf32> to vector<1x64xf32>
    %14 = vector.broadcast %13 : vector<1x64xf32> to vector<16x64xf32>
    %15 = arith.mulf %12, %14 : vector<16x64xf32>
    %16 = vector.extract_strided_slice %10 {offsets = [6, 0], sizes = [16, 64], strides = [1, 1]} : vector<24x64xf32> to vector<16x64xf32>
    %17 = vector.extract_strided_slice %11 {offsets = [1, 0], sizes = [1, 64], strides = [1, 1]} : vector<4x64xf32> to vector<1x64xf32>
    %18 = vector.broadcast %17 : vector<1x64xf32> to vector<16x64xf32>
    %19 = arith.mulf %16, %18 : vector<16x64xf32>
    %20 = arith.addf %15, %19 : vector<16x64xf32>
    %21 = vector.extract_strided_slice %10 {offsets = [7, 0], sizes = [16, 64], strides = [1, 1]} : vector<24x64xf32> to vector<16x64xf32>
    %22 = vector.extract_strided_slice %11 {offsets = [2, 0], sizes = [1, 64], strides = [1, 1]} : vector<4x64xf32> to vector<1x64xf32>
    %23 = vector.broadcast %22 : vector<1x64xf32> to vector<16x64xf32>
    %24 = arith.mulf %21, %23 : vector<16x64xf32>
    %25 = arith.addf %20, %24 : vector<16x64xf32>
    %26 = vector.extract_strided_slice %10 {offsets = [8, 0], sizes = [16, 64], strides = [1, 1]} : vector<24x64xf32> to vector<16x64xf32>
    %27 = vector.extract_strided_slice %11 {offsets = [3, 0], sizes = [1, 64], strides = [1, 1]} : vector<4x64xf32> to vector<1x64xf32>
    %28 = vector.broadcast %27 : vector<1x64xf32> to vector<16x64xf32>
    %29 = arith.mulf %26, %28 : vector<16x64xf32>
    %30 = arith.addf %25, %29 : vector<16x64xf32>
    %c0_13 = arith.constant 0 : index
    %c0_14 = arith.constant 0 : index
    %31 = vector.load %arg6[%c0_13, %c0_14] : memref<1x64xf32, #tpu.memory_space<vmem>>, vector<1x64xf32>
    %32 = vector.broadcast %31 : vector<1x64xf32> to vector<16x64xf32>
    %33 = arith.addf %30, %32 : vector<16x64xf32>
    %34 = arith.negf %33 : vector<16x64xf32>
    %35 = math.exp %34 : vector<16x64xf32>
    %cst_15 = arith.constant 1.000000e+00 : f32
    %36 = vector.broadcast %cst_15 : f32 to vector<16x64xf32>
    %37 = arith.addf %36, %35 : vector<16x64xf32>
    %38 = arith.divf %36, %37 : vector<16x64xf32>
    %39 = arith.mulf %33, %38 : vector<16x64xf32>
    %40 = vector.extract_strided_slice %10 {offsets = [16, 0], sizes = [8, 64], strides = [1, 1]} : vector<24x64xf32> to vector<8x64xf32>
    %c0_16 = arith.constant 0 : index
    %c0_17 = arith.constant 0 : index
    %41 = vector.load %arg17[%c0_16, %c0_17] : memref<24x64xf32, #tpu.memory_space<vmem>>, vector<8x64xf32>
    tpu.vector_store %arg17[%c0_16, %c0_17], %40 {strides = array<i32>} : memref<24x64xf32, #tpu.memory_space<vmem>>, vector<8x64xf32>,
    %42 = arith.truncf %39 : vector<16x64xf32> to vector<16x64xbf16>
    %c0_18 = arith.constant 0 : index
    %c0_19 = arith.constant 0 : index
    %43 = vector.load %arg7[%c0_18, %c0_19] : memref<64x512xbf16, #tpu.memory_space<vmem>>, vector<64x512xbf16>
    %cst_20 = arith.constant dense<0.000000e+00> : vector<16x512xf32>
    %44 = tpu.matmul %42, %43, %cst_20 {dimension_numbers = #tpu.dot_dimension_numbers<[1], [0], [0], [1], [0, 0, 1, 1], [], []>} : vector<16x64xbf16>, vector<64x512xbf16>, vector<16x512xf32> -> vector<16x512xf32>
    %c0_21 = arith.constant 0 : index
    %c0_22 = arith.constant 0 : index
    %45 = vector.load %arg8[%c0_21, %c0_22] : memref<1x512xf32, #tpu.memory_space<vmem>>, vector<1x512xf32>
    %46 = vector.broadcast %45 : vector<1x512xf32> to vector<16x512xf32>
    %47 = arith.addf %44, %46 : vector<16x512xf32>
    %48 = vector.extract_strided_slice %47 {offsets = [0, 0], sizes = [16, 128], strides = [1, 1]} : vector<16x512xf32> to vector<16x128xf32>
    %49 = vector.extract_strided_slice %47 {offsets = [0, 128], sizes = [16, 128], strides = [1, 1]} : vector<16x512xf32> to vector<16x128xf32>
    %50 = vector.extract_strided_slice %47 {offsets = [0, 256], sizes = [16, 128], strides = [1, 1]} : vector<16x512xf32> to vector<16x128xf32>
    %51 = vector.extract_strided_slice %47 {offsets = [0, 384], sizes = [16, 128], strides = [1, 1]} : vector<16x512xf32> to vector<16x128xf32>
    %52 = arith.truncf %6 : vector<16x64xf32> to vector<16x64xbf16>
    %c0_23 = arith.constant 0 : index
    %c0_24 = arith.constant 0 : index
    %53 = vector.load %arg9[%c0_23, %c0_24] : memref<64x16xbf16, #tpu.memory_space<vmem>>, vector<64x16xbf16>
    %cst_25 = arith.constant dense<0.000000e+00> : vector<16x16xf32>
    %54 = tpu.matmul %52, %53, %cst_25 {dimension_numbers = #tpu.dot_dimension_numbers<[1], [0], [0], [1], [0, 0, 1, 1], [], []>} : vector<16x64xbf16>, vector<64x16xbf16>, vector<16x16xf32> -> vector<16x16xf32>
    %55 = arith.truncf %54 : vector<16x16xf32> to vector<16x16xbf16>
    %c0_26 = arith.constant 0 : index
    %c0_27 = arith.constant 0 : index
    %56 = vector.load %arg10[%c0_26, %c0_27] : memref<16x64xbf16, #tpu.memory_space<vmem>>, vector<16x64xbf16>
    %cst_28 = arith.constant dense<0.000000e+00> : vector<16x64xf32>
    %57 = tpu.matmul %55, %56, %cst_28 {dimension_numbers = #tpu.dot_dimension_numbers<[1], [0], [0], [1], [0, 0, 1, 1], [], []>} : vector<16x16xbf16>, vector<16x64xbf16>, vector<16x64xf32> -> vector<16x64xf32>
    %c0_29 = arith.constant 0 : index
    %c0_30 = arith.constant 0 : index
    %58 = vector.load %arg11[%c0_29, %c0_30] : memref<1x64xf32, #tpu.memory_space<vmem>>, vector<1x64xf32>
    %59 = vector.broadcast %58 : vector<1x64xf32> to vector<16x64xf32>
    %60 = arith.addf %57, %59 : vector<16x64xf32>
    %61 = arith.negf %60 : vector<16x64xf32>
    %62 = math.exp %61 : vector<16x64xf32>
    %cst_31 = arith.constant 1.000000e+00 : f32
    %63 = vector.broadcast %cst_31 : f32 to vector<16x64xf32>
    %64 = arith.addf %63, %62 : vector<16x64xf32>
    %65 = arith.divf %63, %64 : vector<16x64xf32>
    %66 = arith.mulf %65, %6 : vector<16x64xf32>
    %cst_32 = arith.constant 2.000000e+01 : f32
    %67 = vector.broadcast %cst_32 : f32 to vector<16x128xf32>
    %68 = arith.cmpf ogt, %50, %67 : vector<16x128xf32>
    %cst_33 = arith.constant 2.000000e+01 : f32
    %69 = vector.broadcast %cst_33 : f32 to vector<16x128xf32>
    %70 = arith.minimumf %50, %69 : vector<16x128xf32>
    %71 = math.exp %70 : vector<16x128xf32>
    %72 = math.log1p %71 : vector<16x128xf32>
    %73 = arith.select %68, %50, %72 : vector<16x128xi1>, vector<16x128xf32>
    %74 = arith.negf %51 : vector<16x128xf32>
    %75 = math.exp %74 : vector<16x128xf32>
    %cst_34 = arith.constant 1.000000e+00 : f32
    %76 = vector.broadcast %cst_34 : f32 to vector<16x128xf32>
    %77 = arith.addf %76, %75 : vector<16x128xf32>
    %78 = arith.divf %76, %77 : vector<16x128xf32>
    %cst_35 = arith.constant 1.000000e-24 : f32
    %79 = vector.broadcast %cst_35 : f32 to vector<16x128xf32>
    %80 = arith.maximumf %73, %79 : vector<16x128xf32>
    %81 = math.log %80 : vector<16x128xf32>
    %82 = arith.mulf %78, %81 : vector<16x128xf32>
    %83 = math.exp %82 : vector<16x128xf32>
    %cst_36 = arith.constant 0.000000e+00 : f32
    %84 = vector.broadcast %cst_36 : f32 to vector<16x128xf32>
    %85 = arith.subf %84, %73 : vector<16x128xf32>
    %86 = arith.mulf %85, %78 : vector<16x128xf32>
    %87 = arith.mulf %49, %49 : vector<16x128xf32>
    %cst_37 = arith.constant dense<0.000000e+00> : vector<16xf32>
    %88 = vector.multi_reduction <add>, %87, %cst_37 [1] : vector<16x128xf32> to vector<16xf32>
    %89 = vector.shape_cast %88 : vector<16xf32> to vector<16x1xf32>
    %90 = math.sqrt %89 : vector<16x1xf32>
    %cst_38 = arith.constant 9.99999996E-13 : f32
    %91 = vector.broadcast %cst_38 : f32 to vector<16x1xf32>
    %92 = arith.maximumf %90, %91 : vector<16x1xf32>
    %93 = vector.broadcast %92 : vector<16x1xf32> to vector<16x128xf32>
    %94 = arith.divf %49, %93 : vector<16x128xf32>
    %95 = arith.mulf %94, %83 : vector<16x128xf32>
    %96 = tpu.iota {dimensions = array<i32: 0>} : vector<8x8xi32>
    %97 = tpu.iota {dimensions = array<i32: 1>} : vector<8x8xi32>
    %98 = arith.cmpi sge, %96, %97 : vector<8x8xi32>
    %99 = arith.extui %98 : vector<8x8xi1> to vector<8x8xi32>
    %100 = arith.sitofp %99 : vector<8x8xi32> to vector<8x8xf32>
    %c0_39 = arith.constant 0 : index
    %c0_40 = arith.constant 0 : index
    %101 = vector.load %arg16[%c0_39, %c0_40] : memref<64x128xf32, #tpu.memory_space<vmem>>, vector<64x128xf32>
    %102 = vector.extract_strided_slice %48 {offsets = [0, 0], sizes = [8, 128], strides = [1, 1]} : vector<16x128xf32> to vector<8x128xf32>
    %103 = vector.extract_strided_slice %95 {offsets = [0, 0], sizes = [8, 128], strides = [1, 1]} : vector<16x128xf32> to vector<8x128xf32>
    %104 = vector.extract_strided_slice %66 {offsets = [0, 0], sizes = [8, 64], strides = [1, 1]} : vector<16x64xf32> to vector<8x64xf32>
    %105 = vector.extract_strided_slice %86 {offsets = [0, 0], sizes = [8, 128], strides = [1, 1]} : vector<16x128xf32> to vector<8x128xf32>
    %cst_41 = arith.constant dense<0.000000e+00> : vector<8x128xf32>
    %106 = tpu.matmul %100, %105, %cst_41 {dimension_numbers = #tpu.dot_dimension_numbers<[1], [0], [0], [1], [0, 0, 1, 1], [], []>} : vector<8x8xf32>, vector<8x128xf32>, vector<8x128xf32> -> vector<8x128xf32>
    %107 = math.exp %106 : vector<8x128xf32>
    %cst_42 = arith.constant 2.500000e-01 : f32
    %108 = vector.broadcast %cst_42 : f32 to vector<8x128xf32>
    %109 = arith.mulf %107, %108 : vector<8x128xf32>
    %110 = arith.mulf %102, %109 : vector<8x128xf32>
    %cst_43 = arith.constant 0.000000e+00 : f32
    %111 = vector.broadcast %cst_43 : f32 to vector<8x128xf32>
    %112 = arith.subf %111, %106 : vector<8x128xf32>
    %113 = math.exp %112 : vector<8x128xf32>
    %114 = arith.mulf %103, %113 : vector<8x128xf32>
    %cst_44 = arith.constant dense<0.000000e+00> : vector<8x64xf32>
    %115 = tpu.matmul %110, %101, %cst_44 {dimension_numbers = #tpu.dot_dimension_numbers<[1], [1], [0], [0], [0, 0, 1, 0], [], []>} : vector<8x128xf32>, vector<64x128xf32>, vector<8x64xf32> -> vector<8x64xf32>
    %cst_45 = arith.constant dense<0.000000e+00> : vector<8x8xf32>
    %116 = tpu.matmul %110, %114, %cst_45 {dimension_numbers = #tpu.dot_dimension_numbers<[1], [1], [0], [0], [0, 0, 1, 0], [], []>} : vector<8x128xf32>, vector<8x128xf32>, vector<8x8xf32> -> vector<8x8xf32>
    %cst_46 = arith.constant 0.000000e+00 : f32
    %117 = vector.broadcast %cst_46 : f32 to vector<8x8xf32>
    %118 = arith.select %98, %116, %117 : vector<8x8xi1>, vector<8x8xf32>
    %cst_47 = arith.constant dense<0.000000e+00> : vector<8x64xf32>
    %119 = tpu.matmul %118, %104, %cst_47 {dimension_numbers = #tpu.dot_dimension_numbers<[1], [0], [0], [1], [0, 0, 1, 1], [], []>} : vector<8x8xf32>, vector<8x64xf32>, vector<8x64xf32> -> vector<8x64xf32>
    %120 = arith.addf %115, %119 : vector<8x64xf32>
    %121 = vector.extract_strided_slice %106 {offsets = [7, 0], sizes = [1, 128], strides = [1, 1]} : vector<8x128xf32> to vector<1x128xf32>
    %122 = vector.extract_strided_slice %107 {offsets = [7, 0], sizes = [1, 128], strides = [1, 1]} : vector<8x128xf32> to vector<1x128xf32>
    %123 = vector.broadcast %121 : vector<1x128xf32> to vector<8x128xf32>
    %124 = arith.subf %123, %106 : vector<8x128xf32>
    %125 = math.exp %124 : vector<8x128xf32>
    %126 = arith.mulf %103, %125 : vector<8x128xf32>
    %127 = vector.broadcast %122 : vector<1x128xf32> to vector<64x128xf32>
    %128 = arith.mulf %101, %127 : vector<64x128xf32>
    %cst_48 = arith.constant dense<0.000000e+00> : vector<64x128xf32>
    %129 = tpu.matmul %104, %126, %cst_48 {dimension_numbers = #tpu.dot_dimension_numbers<[0], [0], [1], [1], [0, 1, 1, 1], [], []>} : vector<8x64xf32>, vector<8x128xf32>, vector<64x128xf32> -> vector<64x128xf32>
    %130 = arith.addf %128, %129 : vector<64x128xf32>
    %131 = vector.extract_strided_slice %48 {offsets = [8, 0], sizes = [8, 128], strides = [1, 1]} : vector<16x128xf32> to vector<8x128xf32>
    %132 = vector.extract_strided_slice %95 {offsets = [8, 0], sizes = [8, 128], strides = [1, 1]} : vector<16x128xf32> to vector<8x128xf32>
    %133 = vector.extract_strided_slice %66 {offsets = [8, 0], sizes = [8, 64], strides = [1, 1]} : vector<16x64xf32> to vector<8x64xf32>
    %134 = vector.extract_strided_slice %86 {offsets = [8, 0], sizes = [8, 128], strides = [1, 1]} : vector<16x128xf32> to vector<8x128xf32>
    %cst_49 = arith.constant dense<0.000000e+00> : vector<8x128xf32>
    %135 = tpu.matmul %100, %134, %cst_49 {dimension_numbers = #tpu.dot_dimension_numbers<[1], [0], [0], [1], [0, 0, 1, 1], [], []>} : vector<8x8xf32>, vector<8x128xf32>, vector<8x128xf32> -> vector<8x128xf32>
    %136 = math.exp %135 : vector<8x128xf32>
    %cst_50 = arith.constant 2.500000e-01 : f32
    %137 = vector.broadcast %cst_50 : f32 to vector<8x128xf32>
    %138 = arith.mulf %136, %137 : vector<8x128xf32>
    %139 = arith.mulf %131, %138 : vector<8x128xf32>
    %cst_51 = arith.constant 0.000000e+00 : f32
    %140 = vector.broadcast %cst_51 : f32 to vector<8x128xf32>
    %141 = arith.subf %140, %135 : vector<8x128xf32>
    %142 = math.exp %141 : vector<8x128xf32>
    %143 = arith.mulf %132, %142 : vector<8x128xf32>
    %cst_52 = arith.constant dense<0.000000e+00> : vector<8x64xf32>
    %144 = tpu.matmul %139, %130, %cst_52 {dimension_numbers = #tpu.dot_dimension_numbers<[1], [1], [0], [0], [0, 0, 1, 0], [], []>} : vector<8x128xf32>, vector<64x128xf32>, vector<8x64xf32> -> vector<8x64xf32>
    %cst_53 = arith.constant dense<0.000000e+00> : vector<8x8xf32>
    %145 = tpu.matmul %139, %143, %cst_53 {dimension_numbers = #tpu.dot_dimension_numbers<[1], [1], [0], [0], [0, 0, 1, 0], [], []>} : vector<8x128xf32>, vector<8x128xf32>, vector<8x8xf32> -> vector<8x8xf32>
    %cst_54 = arith.constant 0.000000e+00 : f32
    %146 = vector.broadcast %cst_54 : f32 to vector<8x8xf32>
    %147 = arith.select %98, %145, %146 : vector<8x8xi1>, vector<8x8xf32>
    %cst_55 = arith.constant dense<0.000000e+00> : vector<8x64xf32>
    %148 = tpu.matmul %147, %133, %cst_55 {dimension_numbers = #tpu.dot_dimension_numbers<[1], [0], [0], [1], [0, 0, 1, 1], [], []>} : vector<8x8xf32>, vector<8x64xf32>, vector<8x64xf32> -> vector<8x64xf32>
    %149 = arith.addf %144, %148 : vector<8x64xf32>
    %150 = vector.extract_strided_slice %135 {offsets = [7, 0], sizes = [1, 128], strides = [1, 1]} : vector<8x128xf32> to vector<1x128xf32>
    %151 = vector.extract_strided_slice %136 {offsets = [7, 0], sizes = [1, 128], strides = [1, 1]} : vector<8x128xf32> to vector<1x128xf32>
    %152 = vector.broadcast %150 : vector<1x128xf32> to vector<8x128xf32>
    %153 = arith.subf %152, %135 : vector<8x128xf32>
    %154 = math.exp %153 : vector<8x128xf32>
    %155 = arith.mulf %132, %154 : vector<8x128xf32>
    %156 = vector.broadcast %151 : vector<1x128xf32> to vector<64x128xf32>
    %157 = arith.mulf %130, %156 : vector<64x128xf32>
    %cst_56 = arith.constant dense<0.000000e+00> : vector<64x128xf32>
    %158 = tpu.matmul %133, %155, %cst_56 {dimension_numbers = #tpu.dot_dimension_numbers<[0], [0], [1], [1], [0, 1, 1, 1], [], []>} : vector<8x64xf32>, vector<8x128xf32>, vector<64x128xf32> -> vector<64x128xf32>
    %159 = arith.addf %157, %158 : vector<64x128xf32>
    %c0_57 = arith.constant 0 : index
    %c0_58 = arith.constant 0 : index
    %160 = vector.load %arg16[%c0_57, %c0_58] : memref<64x128xf32, #tpu.memory_space<vmem>>, vector<64x128xf32>
    tpu.vector_store %arg16[%c0_57, %c0_58], %159 {strides = array<i32>} : memref<64x128xf32, #tpu.memory_space<vmem>>, vector<64x128xf32>,
    %161 = tpu.concatenate %120, %149 in 0 : vector<8x64xf32>, vector<8x64xf32> -> vector<16x64xf32>
    %c0_59 = arith.constant 0 : index
    %c0_60 = arith.constant 0 : index
    %162 = vector.load %arg12[%c0_59, %c0_60] : memref<1x64xf32, #tpu.memory_space<vmem>>, vector<1x64xf32>
    %163 = vector.broadcast %162 : vector<1x64xf32> to vector<16x64xf32>
    %164 = arith.mulf %39, %163 : vector<16x64xf32>
    %165 = arith.addf %161, %164 : vector<16x64xf32>
    %166 = arith.negf %8 : vector<16x64xf32>
    %167 = math.exp %166 : vector<16x64xf32>
    %cst_61 = arith.constant 1.000000e+00 : f32
    %168 = vector.broadcast %cst_61 : f32 to vector<16x64xf32>
    %169 = arith.addf %168, %167 : vector<16x64xf32>
    %170 = arith.divf %168, %169 : vector<16x64xf32>
    %171 = arith.mulf %8, %170 : vector<16x64xf32>
    %172 = arith.mulf %165, %171 : vector<16x64xf32>
    %173 = arith.mulf %172, %172 : vector<16x64xf32>
    %cst_62 = arith.constant dense<0.000000e+00> : vector<16xf32>
    %174 = vector.multi_reduction <add>, %173, %cst_62 [1] : vector<16x64xf32> to vector<16xf32>
    %175 = vector.shape_cast %174 : vector<16xf32> to vector<16x1xf32>
    %cst_63 = arith.constant 6.400000e+01 : f32
    %176 = vector.broadcast %cst_63 : f32 to vector<16x1xf32>
    %177 = arith.divf %175, %176 : vector<16x1xf32>
    %cst_64 = arith.constant 9.99999974E-6 : f32
    %178 = vector.broadcast %cst_64 : f32 to vector<16x1xf32>
    %179 = arith.addf %177, %178 : vector<16x1xf32>
    %180 = math.rsqrt %179 : vector<16x1xf32>
    %181 = vector.broadcast %180 : vector<16x1xf32> to vector<16x64xf32>
    %182 = arith.mulf %172, %181 : vector<16x64xf32>
    %c0_65 = arith.constant 0 : index
    %c0_66 = arith.constant 0 : index
    %183 = vector.load %arg13[%c0_65, %c0_66] : memref<1x64xf32, #tpu.memory_space<vmem>>, vector<1x64xf32>
    %184 = vector.broadcast %183 : vector<1x64xf32> to vector<16x64xf32>
    %185 = arith.mulf %182, %184 : vector<16x64xf32>
    %186 = arith.truncf %185 : vector<16x64xf32> to vector<16x64xbf16>
    %c0_67 = arith.constant 0 : index
    %c0_68 = arith.constant 0 : index
    %187 = vector.load %arg14[%c0_67, %c0_68] : memref<64x32xbf16, #tpu.memory_space<vmem>>, vector<64x32xbf16>
    %cst_69 = arith.constant dense<0.000000e+00> : vector<16x32xf32>
    %188 = tpu.matmul %186, %187, %cst_69 {dimension_numbers = #tpu.dot_dimension_numbers<[1], [0], [0], [1], [0, 0, 1, 1], [], []>} : vector<16x64xbf16>, vector<64x32xbf16>, vector<16x32xf32> -> vector<16x32xf32>
    %189 = arith.truncf %188 : vector<16x32xf32> to vector<16x32xbf16>
    %c0_70 = arith.constant 0 : index
    %c0_71 = arith.constant 0 : index
    %c0_72 = arith.constant 0 : index
    %190 = vector.load %arg15[%c0_70, %c0_71, %c0_72] : memref<1x16x32xbf16, #tpu.memory_space<vmem>>, vector<1x16x32xbf16>
    %191 = vector.shape_cast %190 : vector<1x16x32xbf16> to vector<16x32xbf16>
    %192 = vector.shape_cast %189 : vector<16x32xbf16> to vector<1x16x32xbf16>
    tpu.vector_store %arg15[%c0_70, %c0_71, %c0_72], %192 {strides = array<i32>} : memref<1x16x32xbf16, #tpu.memory_space<vmem>>, vector<1x16x32xbf16>,
    return
  }
  func.func @transform_0(%arg0: i32, %arg1: i32) -> (i32, i32, i32) {
    %c0_i32 = arith.constant 0 : i32
    %c0_i32_0 = arith.constant 0 : i32
    return %arg0, %arg1, %c0_i32 : i32, i32, i32
  }
  func.func @transform_1(%arg0: i32, %arg1: i32) -> (i32, i32) {
    %c0_i32 = arith.constant 0 : i32
    %c0_i32_0 = arith.constant 0 : i32
    %c0_i32_1 = arith.constant 0 : i32
    return %c0_i32, %c0_i32_0 : i32, i32
  }
  func.func @transform_2(%arg0: i32, %arg1: i32) -> (i32, i32) {
    %c0_i32 = arith.constant 0 : i32
    %c0_i32_0 = arith.constant 0 : i32
    %c0_i32_1 = arith.constant 0 : i32
    return %c0_i32, %c0_i32_0 : i32, i32
  }
  func.func @transform_3(%arg0: i32, %arg1: i32) -> (i32, i32) {
    %c0_i32 = arith.constant 0 : i32
    %c0_i32_0 = arith.constant 0 : i32
    %c0_i32_1 = arith.constant 0 : i32
    return %c0_i32, %c0_i32_0 : i32, i32
  }
  func.func @transform_4(%arg0: i32, %arg1: i32) -> (i32, i32) {
    %c0_i32 = arith.constant 0 : i32
    %c0_i32_0 = arith.constant 0 : i32
    %c0_i32_1 = arith.constant 0 : i32
    return %c0_i32, %c0_i32_0 : i32, i32
  }
  func.func @transform_5(%arg0: i32, %arg1: i32) -> (i32, i32) {
    %c0_i32 = arith.constant 0 : i32
    %c0_i32_0 = arith.constant 0 : i32
    %c0_i32_1 = arith.constant 0 : i32
    return %c0_i32, %c0_i32_0 : i32, i32
  }
  func.func @transform_6(%arg0: i32, %arg1: i32) -> (i32, i32) {
    %c0_i32 = arith.constant 0 : i32
    %c0_i32_0 = arith.constant 0 : i32
    %c0_i32_1 = arith.constant 0 : i32
    return %c0_i32, %c0_i32_0 : i32, i32
  }
  func.func @transform_7(%arg0: i32, %arg1: i32) -> (i32, i32) {
    %c0_i32 = arith.constant 0 : i32
    %c0_i32_0 = arith.constant 0 : i32
    %c0_i32_1 = arith.constant 0 : i32
    return %c0_i32, %c0_i32_0 : i32, i32
  }
  func.func @transform_8(%arg0: i32, %arg1: i32) -> (i32, i32) {
    %c0_i32 = arith.constant 0 : i32
    %c0_i32_0 = arith.constant 0 : i32
    %c0_i32_1 = arith.constant 0 : i32
    return %c0_i32, %c0_i32_0 : i32, i32
  }
  func.func @transform_9(%arg0: i32, %arg1: i32) -> (i32, i32) {
    %c0_i32 = arith.constant 0 : i32
    %c0_i32_0 = arith.constant 0 : i32
    %c0_i32_1 = arith.constant 0 : i32
    return %c0_i32, %c0_i32_0 : i32, i32
  }
  func.func @transform_10(%arg0: i32, %arg1: i32) -> (i32, i32) {
    %c0_i32 = arith.constant 0 : i32
    %c0_i32_0 = arith.constant 0 : i32
    %c0_i32_1 = arith.constant 0 : i32
    return %c0_i32, %c0_i32_0 : i32, i32
  }
  func.func @transform_11(%arg0: i32, %arg1: i32) -> (i32, i32) {
    %c0_i32 = arith.constant 0 : i32
    %c0_i32_0 = arith.constant 0 : i32
    %c0_i32_1 = arith.constant 0 : i32
    return %c0_i32, %c0_i32_0 : i32, i32
  }
  func.func @transform_12(%arg0: i32, %arg1: i32) -> (i32, i32) {
    %c0_i32 = arith.constant 0 : i32
    %c0_i32_0 = arith.constant 0 : i32
    %c0_i32_1 = arith.constant 0 : i32
    return %c0_i32, %c0_i32_0 : i32, i32
  }
  func.func @transform_13(%arg0: i32, %arg1: i32) -> (i32, i32, i32) {
    %c0_i32 = arith.constant 0 : i32
    %c0_i32_0 = arith.constant 0 : i32
    return %arg0, %arg1, %c0_i32 : i32, i32, i32
  }
}

module attributes {stable_mosaic.version = 11 : i64} {
  func.func @rodimus_kernel(%arg0: i32, %arg1: i32, %arg2: memref<1x16x32xbf16, #tpu.memory_space<vmem>>, %arg3: memref<32x64xbf16, #tpu.memory_space<vmem>>, %arg4: memref<32x64xbf16, #tpu.memory_space<vmem>>, %arg5: memref<4x64xf32, #tpu.memory_space<vmem>>, %arg6: memref<1x64xf32, #tpu.memory_space<vmem>>, %arg7: memref<64x512xbf16, #tpu.memory_space<vmem>>, %arg8: memref<1x512xf32, #tpu.memory_space<vmem>>, %arg9: memref<64x16xbf16, #tpu.memory_space<vmem>>, %arg10: memref<16x64xbf16, #tpu.memory_space<vmem>>, %arg11: memref<1x64xf32, #tpu.memory_space<vmem>>, %arg12: memref<1x64xf32, #tpu.memory_space<vmem>>, %arg13: memref<1x64xf32, #tpu.memory_space<vmem>>, %arg14: memref<64x32xbf16, #tpu.memory_space<vmem>>, %arg15: memref<1x16x32xbf16, #tpu.memory_space<vmem>>, %arg16: memref<64x128xf32, #tpu.memory_space<vmem>>, %arg17: memref<24x64xf32, #tpu.memory_space<vmem>>) attributes {dimension_semantics = [#tpu.dimension_semantics<parallel>, #tpu.dimension_semantics<arbitrary>], iteration_bounds = array<i64: 2, 2>, scalar_prefetch = 0 : i64, scratch_operands = 2 : i64, tpu.core_type = #tpu.core_type<tc>, window_params = [{transform_indices = @transform_0, window_bounds = array<i64: 1, 16, 32>}, {pipeline_mode = #tpu.pipeline_mode<synchronous>, transform_indices = @transform_1, window_bounds = array<i64: 32, 64>}, {pipeline_mode = #tpu.pipeline_mode<synchronous>, transform_indices = @transform_2, window_bounds = array<i64: 32, 64>}, {pipeline_mode = #tpu.pipeline_mode<synchronous>, transform_indices = @transform_3, window_bounds = array<i64: 4, 64>}, {pipeline_mode = #tpu.pipeline_mode<synchronous>, transform_indices = @transform_4, window_bounds = array<i64: 1, 64>}, {pipeline_mode = #tpu.pipeline_mode<synchronous>, transform_indices = @transform_5, window_bounds = array<i64: 64, 512>}, {pipeline_mode = #tpu.pipeline_mode<synchronous>, transform_indices = @transform_6, window_bounds = array<i64: 1, 512>}, {pipeline_mode = #tpu.pipeline_mode<synchronous>, transform_indices = @transform_7, window_bounds = array<i64: 64, 16>}, {pipeline_mode = #tpu.pipeline_mode<synchronous>, transform_indices = @transform_8, window_bounds = array<i64: 16, 64>}, {pipeline_mode = #tpu.pipeline_mode<synchronous>, transform_indices = @transform_9, window_bounds = array<i64: 1, 64>}, {pipeline_mode = #tpu.pipeline_mode<synchronous>, transform_indices = @transform_10, window_bounds = array<i64: 1, 64>}, {pipeline_mode = #tpu.pipeline_mode<synchronous>, transform_indices = @transform_11, window_bounds = array<i64: 1, 64>}, {pipeline_mode = #tpu.pipeline_mode<synchronous>, transform_indices = @transform_12, window_bounds = array<i64: 64, 32>}, {transform_indices = @transform_13, window_bounds = array<i64: 1, 16, 32>}]} {
    %c0_i32 = arith.constant 0 : i32
    %0 = arith.cmpi eq, %arg1, %c0_i32 : i32
    %1 = arith.extui %0 : i1 to i32
    %c0_i32_0 = arith.constant 0 : i32
    %2 = arith.cmpi ne, %1, %c0_i32_0 : i32
    scf.if %2 {
      %cst_73 = arith.constant 0.000000e+00 : f32
      %193 = vector.broadcast %cst_73 : f32 to vector<64x128xf32>
      %c0_74 = arith.constant 0 : index
      %c0_75 = arith.constant 0 : index
      %194 = vector.load %arg16[%c0_74, %c0_75] : memref<64x128xf32, #tpu.memory_space<vmem>>, vector<64x128xf32>
      tpu.vector_store %arg16[%c0_74, %c0_75], %193 {strides = array<i32>} : memref<64x128xf32, #tpu.memory_space<vmem>>, vector<64x128xf32>,
      %cst_76 = arith.constant 0.000000e+00 : f32
      %195 = vector.broadcast %cst_76 : f32 to vector<8x64xf32>
      %c0_77 = arith.constant 0 : index
      %c0_78 = arith.constant 0 : index
      %196 = vector.load %arg17[%c0_77, %c0_78] : memref<24x64xf32, #tpu.memory_space<vmem>>, vector<8x64xf32>
      tpu.vector_store %arg17[%c0_77, %c0_78], %195 {strides = array<i32>} : memref<24x64xf32, #tpu.memory_space<vmem>>, vector<8x64xf32>,
    } else {
    }
    %c0 = arith.constant 0 : index
    %c0_1 = arith.constant 0 : index
    %c0_2 = arith.constant 0 : index
    %3 = vector.load %arg2[%c0, %c0_1, %c0_2] : memref<1x16x32xbf16, #tpu.memory_space<vmem>>, vector<1x16x32xbf16>
    %4 = vector.shape_cast %3 : vector<1x16x32xbf16> to vector<16x32xbf16>
    %c0_3 = arith.constant 0 : index
    %c0_4 = arith.constant 0 : index
    %5 = vector.load %arg3[%c0_3, %c0_4] : memref<32x64xbf16, #tpu.memory_space<vmem>>, vector<32x64xbf16>
    %cst = arith.constant dense<0.000000e+00> : vector<16x64xf32>
    %6 = tpu.matmul %4, %5, %cst {dimension_numbers = #tpu.dot_dimension_numbers<[1], [0], [0], [1], [0, 0, 1, 1], [], []>} : vector<16x32xbf16>, vector<32x64xbf16>, vector<16x64xf32> -> vector<16x64xf32>
    %c0_5 = arith.constant 0 : index
    %c0_6 = arith.constant 0 : index
    %7 = vector.load %arg4[%c0_5, %c0_6] : memref<32x64xbf16, #tpu.memory_space<vmem>>, vector<32x64xbf16>
    %cst_7 = arith.constant dense<0.000000e+00> : vector<16x64xf32>
    %8 = tpu.matmul %4, %7, %cst_7 {dimension_numbers = #tpu.dot_dimension_numbers<[1], [0], [0], [1], [0, 0, 1, 1], [], []>} : vector<16x32xbf16>, vector<32x64xbf16>, vector<16x64xf32> -> vector<16x64xf32>
    %c8 = arith.constant 8 : index
    %c0_8 = arith.constant 0 : index
    %9 = vector.load %arg17[%c8, %c0_8] : memref<24x64xf32, #tpu.memory_space<vmem>>, vector<16x64xf32>
    tpu.vector_store %arg17[%c8, %c0_8], %6 {strides = array<i32>} : memref<24x64xf32, #tpu.memory_space<vmem>>, vector<16x64xf32>,
    %c0_9 = arith.constant 0 : index
    %c0_10 = arith.constant 0 : index
    %10 = vector.load %arg17[%c0_9, %c0_10] : memref<24x64xf32, #tpu.memory_space<vmem>>, vector<24x64xf32>
    %c0_11 = arith.constant 0 : index
    %c0_12 = arith.constant 0 : index
    %11 = vector.load %arg5[%c0_11, %c0_12] : memref<4x64xf32, #tpu.memory_space<vmem>>, vector<4x64xf32>
    %12 = vector.extract_strided_slice %10 {offsets = [5, 0], sizes = [16, 64], strides = [1, 1]} : vector<24x64xf32> to vector<16x64xf32>
    %13 = vector.extract_strided_slice %11 {offsets = [0, 0], sizes = [1, 64], strides = [1, 1]} : vector<4x64xf32> to vector<1x64xf32>
    %14 = vector.broadcast %13 : vector<1x64xf32> to vector<16x64xf32>
    %15 = arith.mulf %12, %14 : vector<16x64xf32>
    %16 = vector.extract_strided_slice %10 {offsets = [6, 0], sizes = [16, 64], strides = [1, 1]} : vector<24x64xf32> to vector<16x64xf32>
    %17 = vector.extract_strided_slice %11 {offsets = [1, 0], sizes = [1, 64], strides = [1, 1]} : vector<4x64xf32> to vector<1x64xf32>
    %18 = vector.broadcast %17 : vector<1x64xf32> to vector<16x64xf32>
    %19 = arith.mulf %16, %18 : vector<16x64xf32>
    %20 = arith.addf %15, %19 : vector<16x64xf32>
    %21 = vector.extract_strided_slice %10 {offsets = [7, 0], sizes = [16, 64], strides = [1, 1]} : vector<24x64xf32> to vector<16x64xf32>
    %22 = vector.extract_strided_slice %11 {offsets = [2, 0], sizes = [1, 64], strides = [1, 1]} : vector<4x64xf32> to vector<1x64xf32>
    %23 = vector.broadcast %22 : vector<1x64xf32> to vector<16x64xf32>
    %24 = arith.mulf %21, %23 : vector<16x64xf32>
    %25 = arith.addf %20, %24 : vector<16x64xf32>
    %26 = vector.extract_strided_slice %10 {offsets = [8, 0], sizes = [16, 64], strides = [1, 1]} : vector<24x64xf32> to vector<16x64xf32>
    %27 = vector.extract_strided_slice %11 {offsets = [3, 0], sizes = [1, 64], strides = [1, 1]} : vector<4x64xf32> to vector<1x64xf32>
    %28 = vector.broadcast %27 : vector<1x64xf32> to vector<16x64xf32>
    %29 = arith.mulf %26, %28 : vector<16x64xf32>
    %30 = arith.addf %25, %29 : vector<16x64xf32>
    %c0_13 = arith.constant 0 : index
    %c0_14 = arith.constant 0 : index
    %31 = vector.load %arg6[%c0_13, %c0_14] : memref<1x64xf32, #tpu.memory_space<vmem>>, vector<1x64xf32>
    %32 = vector.broadcast %31 : vector<1x64xf32> to vector<16x64xf32>
    %33 = arith.addf %30, %32 : vector<16x64xf32>
    %34 = arith.negf %33 : vector<16x64xf32>
    %35 = math.exp %34 : vector<16x64xf32>
    %cst_15 = arith.constant 1.000000e+00 : f32
    %36 = vector.broadcast %cst_15 : f32 to vector<16x64xf32>
    %37 = arith.addf %36, %35 : vector<16x64xf32>
    %38 = arith.divf %36, %37 : vector<16x64xf32>
    %39 = arith.mulf %33, %38 : vector<16x64xf32>
    %40 = vector.extract_strided_slice %10 {offsets = [16, 0], sizes = [8, 64], strides = [1, 1]} : vector<24x64xf32> to vector<8x64xf32>
    %c0_16 = arith.constant 0 : index
    %c0_17 = arith.constant 0 : index
    %41 = vector.load %arg17[%c0_16, %c0_17] : memref<24x64xf32, #tpu.memory_space<vmem>>, vector<8x64xf32>
    tpu.vector_store %arg17[%c0_16, %c0_17], %40 {strides = array<i32>} : memref<24x64xf32, #tpu.memory_space<vmem>>, vector<8x64xf32>,
    %42 = arith.truncf %39 : vector<16x64xf32> to vector<16x64xbf16>
    %c0_18 = arith.constant 0 : index
    %c0_19 = arith.constant 0 : index
    %43 = vector.load %arg7[%c0_18, %c0_19] : memref<64x512xbf16, #tpu.memory_space<vmem>>, vector<64x512xbf16>
    %cst_20 = arith.constant dense<0.000000e+00> : vector<16x512xf32>
    %44 = tpu.matmul %42, %43, %cst_20 {dimension_numbers = #tpu.dot_dimension_numbers<[1], [0], [0], [1], [0, 0, 1, 1], [], []>} : vector<16x64xbf16>, vector<64x512xbf16>, vector<16x512xf32> -> vector<16x512xf32>
    %c0_21 = arith.constant 0 : index
    %c0_22 = arith.constant 0 : index
    %45 = vector.load %arg8[%c0_21, %c0_22] : memref<1x512xf32, #tpu.memory_space<vmem>>, vector<1x512xf32>
    %46 = vector.broadcast %45 : vector<1x512xf32> to vector<16x512xf32>
    %47 = arith.addf %44, %46 : vector<16x512xf32>
    %48 = vector.extract_strided_slice %47 {offsets = [0, 0], sizes = [16, 128], strides = [1, 1]} : vector<16x512xf32> to vector<16x128xf32>
    %49 = vector.extract_strided_slice %47 {offsets = [0, 128], sizes = [16, 128], strides = [1, 1]} : vector<16x512xf32> to vector<16x128xf32>
    %50 = vector.extract_strided_slice %47 {offsets = [0, 256], sizes = [16, 128], strides = [1, 1]} : vector<16x512xf32> to vector<16x128xf32>
    %51 = vector.extract_strided_slice %47 {offsets = [0, 384], sizes = [16, 128], strides = [1, 1]} : vector<16x512xf32> to vector<16x128xf32>
    %52 = arith.truncf %6 : vector<16x64xf32> to vector<16x64xbf16>
    %c0_23 = arith.constant 0 : index
    %c0_24 = arith.constant 0 : index
    %53 = vector.load %arg9[%c0_23, %c0_24] : memref<64x16xbf16, #tpu.memory_space<vmem>>, vector<64x16xbf16>
    %cst_25 = arith.constant dense<0.000000e+00> : vector<16x16xf32>
    %54 = tpu.matmul %52, %53, %cst_25 {dimension_numbers = #tpu.dot_dimension_numbers<[1], [0], [0], [1], [0, 0, 1, 1], [], []>} : vector<16x64xbf16>, vector<64x16xbf16>, vector<16x16xf32> -> vector<16x16xf32>
    %55 = arith.truncf %54 : vector<16x16xf32> to vector<16x16xbf16>
    %c0_26 = arith.constant 0 : index
    %c0_27 = arith.constant 0 : index
    %56 = vector.load %arg10[%c0_26, %c0_27] : memref<16x64xbf16, #tpu.memory_space<vmem>>, vector<16x64xbf16>
    %cst_28 = arith.constant dense<0.000000e+00> : vector<16x64xf32>
    %57 = tpu.matmul %55, %56, %cst_28 {dimension_numbers = #tpu.dot_dimension_numbers<[1], [0], [0], [1], [0, 0, 1, 1], [], []>} : vector<16x16xbf16>, vector<16x64xbf16>, vector<16x64xf32> -> vector<16x64xf32>
    %c0_29 = arith.constant 0 : index
    %c0_30 = arith.constant 0 : index
    %58 = vector.load %arg11[%c0_29, %c0_30] : memref<1x64xf32, #tpu.memory_space<vmem>>, vector<1x64xf32>
    %59 = vector.broadcast %58 : vector<1x64xf32> to vector<16x64xf32>
    %60 = arith.addf %57, %59 : vector<16x64xf32>
    %61 = arith.negf %60 : vector<16x64xf32>
    %62 = math.exp %61 : vector<16x64xf32>
    %cst_31 = arith.constant 1.000000e+00 : f32
    %63 = vector.broadcast %cst_31 : f32 to vector<16x64xf32>
    %64 = arith.addf %63, %62 : vector<16x64xf32>
    %65 = arith.divf %63, %64 : vector<16x64xf32>
    %66 = arith.mulf %65, %6 : vector<16x64xf32>
    %cst_32 = arith.constant 2.000000e+01 : f32
    %67 = vector.broadcast %cst_32 : f32 to vector<16x128xf32>
    %68 = arith.cmpf ogt, %50, %67 : vector<16x128xf32>
    %cst_33 = arith.constant 2.000000e+01 : f32
    %69 = vector.broadcast %cst_33 : f32 to vector<16x128xf32>
    %70 = arith.minimumf %50, %69 : vector<16x128xf32>
    %71 = math.exp %70 : vector<16x128xf32>
    %72 = math.log1p %71 : vector<16x128xf32>
    %73 = arith.select %68, %50, %72 : vector<16x128xi1>, vector<16x128xf32>
    %74 = arith.negf %51 : vector<16x128xf32>
    %75 = math.exp %74 : vector<16x128xf32>
    %cst_34 = arith.constant 1.000000e+00 : f32
    %76 = vector.broadcast %cst_34 : f32 to vector<16x128xf32>
    %77 = arith.addf %76, %75 : vector<16x128xf32>
    %78 = arith.divf %76, %77 : vector<16x128xf32>
    %cst_35 = arith.constant 1.000000e-24 : f32
    %79 = vector.broadcast %cst_35 : f32 to vector<16x128xf32>
    %80 = arith.maximumf %73, %79 : vector<16x128xf32>
    %81 = math.log %80 : vector<16x128xf32>
    %82 = arith.mulf %78, %81 : vector<16x128xf32>
    %83 = math.exp %82 : vector<16x128xf32>
    %cst_36 = arith.constant 0.000000e+00 : f32
    %84 = vector.broadcast %cst_36 : f32 to vector<16x128xf32>
    %85 = arith.subf %84, %73 : vector<16x128xf32>
    %86 = arith.mulf %85, %78 : vector<16x128xf32>
    %87 = arith.mulf %49, %49 : vector<16x128xf32>
    %cst_37 = arith.constant dense<0.000000e+00> : vector<16xf32>
    %88 = vector.multi_reduction <add>, %87, %cst_37 [1] : vector<16x128xf32> to vector<16xf32>
    %89 = vector.shape_cast %88 : vector<16xf32> to vector<16x1xf32>
    %90 = math.sqrt %89 : vector<16x1xf32>
    %cst_38 = arith.constant 9.99999996E-13 : f32
    %91 = vector.broadcast %cst_38 : f32 to vector<16x1xf32>
    %92 = arith.maximumf %90, %91 : vector<16x1xf32>
    %93 = vector.broadcast %92 : vector<16x1xf32> to vector<16x128xf32>
    %94 = arith.divf %49, %93 : vector<16x128xf32>
    %95 = arith.mulf %94, %83 : vector<16x128xf32>
    %96 = tpu.iota {dimensions = array<i32: 0>} : vector<8x8xi32>
    %97 = tpu.iota {dimensions = array<i32: 1>} : vector<8x8xi32>
    %98 = arith.cmpi sge, %96, %97 : vector<8x8xi32>
    %99 = arith.extui %98 : vector<8x8xi1> to vector<8x8xi32>
    %100 = arith.sitofp %99 : vector<8x8xi32> to vector<8x8xf32>
    %c0_39 = arith.constant 0 : index
    %c0_40 = arith.constant 0 : index
    %101 = vector.load %arg16[%c0_39, %c0_40] : memref<64x128xf32, #tpu.memory_space<vmem>>, vector<64x128xf32>
    %102 = vector.extract_strided_slice %48 {offsets = [0, 0], sizes = [8, 128], strides = [1, 1]} : vector<16x128xf32> to vector<8x128xf32>
    %103 = vector.extract_strided_slice %95 {offsets = [0, 0], sizes = [8, 128], strides = [1, 1]} : vector<16x128xf32> to vector<8x128xf32>
    %104 = vector.extract_strided_slice %66 {offsets = [0, 0], sizes = [8, 64], strides = [1, 1]} : vector<16x64xf32> to vector<8x64xf32>
    %105 = vector.extract_strided_slice %86 {offsets = [0, 0], sizes = [8, 128], strides = [1, 1]} : vector<16x128xf32> to vector<8x128xf32>
    %cst_41 = arith.constant dense<0.000000e+00> : vector<8x128xf32>
    %106 = tpu.matmul %100, %105, %cst_41 {dimension_numbers = #tpu.dot_dimension_numbers<[1], [0], [0], [1], [0, 0, 1, 1], [], []>} : vector<8x8xf32>, vector<8x128xf32>, vector<8x128xf32> -> vector<8x128xf32>
    %107 = math.exp %106 : vector<8x128xf32>
    %cst_42 = arith.constant 2.500000e-01 : f32
    %108 = vector.broadcast %cst_42 : f32 to vector<8x128xf32>
    %109 = arith.mulf %107, %108 : vector<8x128xf32>
    %110 = arith.mulf %102, %109 : vector<8x128xf32>
    %cst_43 = arith.constant 0.000000e+00 : f32
    %111 = vector.broadcast %cst_43 : f32 to vector<8x128xf32>
    %112 = arith.subf %111, %106 : vector<8x128xf32>
    %113 = math.exp %112 : vector<8x128xf32>
    %114 = arith.mulf %103, %113 : vector<8x128xf32>
    %cst_44 = arith.constant dense<0.000000e+00> : vector<8x64xf32>
    %115 = tpu.matmul %110, %101, %cst_44 {dimension_numbers = #tpu.dot_dimension_numbers<[1], [1], [0], [0], [0, 0, 1, 0], [], []>} : vector<8x128xf32>, vector<64x128xf32>, vector<8x64xf32> -> vector<8x64xf32>
    %cst_45 = arith.constant dense<0.000000e+00> : vector<8x8xf32>
    %116 = tpu.matmul %110, %114, %cst_45 {dimension_numbers = #tpu.dot_dimension_numbers<[1], [1], [0], [0], [0, 0, 1, 0], [], []>} : vector<8x128xf32>, vector<8x128xf32>, vector<8x8xf32> -> vector<8x8xf32>
    %cst_46 = arith.constant 0.000000e+00 : f32
    %117 = vector.broadcast %cst_46 : f32 to vector<8x8xf32>
    %118 = arith.select %98, %116, %117 : vector<8x8xi1>, vector<8x8xf32>
    %cst_47 = arith.constant dense<0.000000e+00> : vector<8x64xf32>
    %119 = tpu.matmul %118, %104, %cst_47 {dimension_numbers = #tpu.dot_dimension_numbers<[1], [0], [0], [1], [0, 0, 1, 1], [], []>} : vector<8x8xf32>, vector<8x64xf32>, vector<8x64xf32> -> vector<8x64xf32>
    %120 = arith.addf %115, %119 : vector<8x64xf32>
    %121 = vector.extract_strided_slice %106 {offsets = [7, 0], sizes = [1, 128], strides = [1, 1]} : vector<8x128xf32> to vector<1x128xf32>
    %122 = vector.extract_strided_slice %107 {offsets = [7, 0], sizes = [1, 128], strides = [1, 1]} : vector<8x128xf32> to vector<1x128xf32>
    %123 = vector.broadcast %121 : vector<1x128xf32> to vector<8x128xf32>
    %124 = arith.subf %123, %106 : vector<8x128xf32>
    %125 = math.exp %124 : vector<8x128xf32>
    %126 = arith.mulf %103, %125 : vector<8x128xf32>
    %127 = vector.broadcast %122 : vector<1x128xf32> to vector<64x128xf32>
    %128 = arith.mulf %101, %127 : vector<64x128xf32>
    %cst_48 = arith.constant dense<0.000000e+00> : vector<64x128xf32>
    %129 = tpu.matmul %104, %126, %cst_48 {dimension_numbers = #tpu.dot_dimension_numbers<[0], [0], [1], [1], [0, 1, 1, 1], [], []>} : vector<8x64xf32>, vector<8x128xf32>, vector<64x128xf32> -> vector<64x128xf32>
    %130 = arith.addf %128, %129 : vector<64x128xf32>
    %131 = vector.extract_strided_slice %48 {offsets = [8, 0], sizes = [8, 128], strides = [1, 1]} : vector<16x128xf32> to vector<8x128xf32>
    %132 = vector.extract_strided_slice %95 {offsets = [8, 0], sizes = [8, 128], strides = [1, 1]} : vector<16x128xf32> to vector<8x128xf32>
    %133 = vector.extract_strided_slice %66 {offsets = [8, 0], sizes = [8, 64], strides = [1, 1]} : vector<16x64xf32> to vector<8x64xf32>
    %134 = vector.extract_strided_slice %86 {offsets = [8, 0], sizes = [8, 128], strides = [1, 1]} : vector<16x128xf32> to vector<8x128xf32>
    %cst_49 = arith.constant dense<0.000000e+00> : vector<8x128xf32>
    %135 = tpu.matmul %100, %134, %cst_49 {dimension_numbers = #tpu.dot_dimension_numbers<[1], [0], [0], [1], [0, 0, 1, 1], [], []>} : vector<8x8xf32>, vector<8x128xf32>, vector<8x128xf32> -> vector<8x128xf32>
    %136 = math.exp %135 : vector<8x128xf32>
    %cst_50 = arith.constant 2.500000e-01 : f32
    %137 = vector.broadcast %cst_50 : f32 to vector<8x128xf32>
    %138 = arith.mulf %136, %137 : vector<8x128xf32>
    %139 = arith.mulf %131, %138 : vector<8x128xf32>
    %cst_51 = arith.constant 0.000000e+00 : f32
    %140 = vector.broadcast %cst_51 : f32 to vector<8x128xf32>
    %141 = arith.subf %140, %135 : vector<8x128xf32>
    %142 = math.exp %141 : vector<8x128xf32>
    %143 = arith.mulf %132, %142 : vector<8x128xf32>
    %cst_52 = arith.constant dense<0.000000e+00> : vector<8x64xf32>
    %144 = tpu.matmul %139, %130, %cst_52 {dimension_numbers = #tpu.dot_dimension_numbers<[1], [1], [0], [0], [0, 0, 1, 0], [], []>} : vector<8x128xf32>, vector<64x128xf32>, vector<8x64xf32> -> vector<8x64xf32>
    %cst_53 = arith.constant dense<0.000000e+00> : vector<8x8xf32>
    %145 = tpu.matmul %139, %143, %cst_53 {dimension_numbers = #tpu.dot_dimension_numbers<[1], [1], [0], [0], [0, 0, 1, 0], [], []>} : vector<8x128xf32>, vector<8x128xf32>, vector<8x8xf32> -> vector<8x8xf32>
    %cst_54 = arith.constant 0.000000e+00 : f32
    %146 = vector.broadcast %cst_54 : f32 to vector<8x8xf32>
    %147 = arith.select %98, %145, %146 : vector<8x8xi1>, vector<8x8xf32>
    %cst_55 = arith.constant dense<0.000000e+00> : vector<8x64xf32>
    %148 = tpu.matmul %147, %133, %cst_55 {dimension_numbers = #tpu.dot_dimension_numbers<[1], [0], [0], [1], [0, 0, 1, 1], [], []>} : vector<8x8xf32>, vector<8x64xf32>, vector<8x64xf32> -> vector<8x64xf32>
    %149 = arith.addf %144, %148 : vector<8x64xf32>
    %150 = vector.extract_strided_slice %135 {offsets = [7, 0], sizes = [1, 128], strides = [1, 1]} : vector<8x128xf32> to vector<1x128xf32>
    %151 = vector.extract_strided_slice %136 {offsets = [7, 0], sizes = [1, 128], strides = [1, 1]} : vector<8x128xf32> to vector<1x128xf32>
    %152 = vector.broadcast %150 : vector<1x128xf32> to vector<8x128xf32>
    %153 = arith.subf %152, %135 : vector<8x128xf32>
    %154 = math.exp %153 : vector<8x128xf32>
    %155 = arith.mulf %132, %154 : vector<8x128xf32>
    %156 = vector.broadcast %151 : vector<1x128xf32> to vector<64x128xf32>
    %157 = arith.mulf %130, %156 : vector<64x128xf32>
    %cst_56 = arith.constant dense<0.000000e+00> : vector<64x128xf32>
    %158 = tpu.matmul %133, %155, %cst_56 {dimension_numbers = #tpu.dot_dimension_numbers<[0], [0], [1], [1], [0, 1, 1, 1], [], []>} : vector<8x64xf32>, vector<8x128xf32>, vector<64x128xf32> -> vector<64x128xf32>
    %159 = arith.addf %157, %158 : vector<64x128xf32>
    %c0_57 = arith.constant 0 : index
    %c0_58 = arith.constant 0 : index
    %160 = vector.load %arg16[%c0_57, %c0_58] : memref<64x128xf32, #tpu.memory_space<vmem>>, vector<64x128xf32>
    tpu.vector_store %arg16[%c0_57, %c0_58], %159 {strides = array<i32>} : memref<64x128xf32, #tpu.memory_space<vmem>>, vector<64x128xf32>,
    %161 = tpu.concatenate %120, %149 in 0 : vector<8x64xf32>, vector<8x64xf32> -> vector<16x64xf32>
    %c0_59 = arith.constant 0 : index
    %c0_60 = arith.constant 0 : index
    %162 = vector.load %arg12[%c0_59, %c0_60] : memref<1x64xf32, #tpu.memory_space<vmem>>, vector<1x64xf32>
    %163 = vector.broadcast %162 : vector<1x64xf32> to vector<16x64xf32>
    %164 = arith.mulf %39, %163 : vector<16x64xf32>
    %165 = arith.addf %161, %164 : vector<16x64xf32>
    %166 = arith.negf %8 : vector<16x64xf32>
    %167 = math.exp %166 : vector<16x64xf32>
    %cst_61 = arith.constant 1.000000e+00 : f32
    %168 = vector.broadcast %cst_61 : f32 to vector<16x64xf32>
    %169 = arith.addf %168, %167 : vector<16x64xf32>
    %170 = arith.divf %168, %169 : vector<16x64xf32>
    %171 = arith.mulf %8, %170 : vector<16x64xf32>
    %172 = arith.mulf %165, %171 : vector<16x64xf32>
    %173 = arith.mulf %172, %172 : vector<16x64xf32>
    %cst_62 = arith.constant dense<0.000000e+00> : vector<16xf32>
    %174 = vector.multi_reduction <add>, %173, %cst_62 [1] : vector<16x64xf32> to vector<16xf32>
    %175 = vector.shape_cast %174 : vector<16xf32> to vector<16x1xf32>
    %cst_63 = arith.constant 6.400000e+01 : f32
    %176 = vector.broadcast %cst_63 : f32 to vector<16x1xf32>
    %177 = arith.divf %175, %176 : vector<16x1xf32>
    %cst_64 = arith.constant 9.99999974E-6 : f32
    %178 = vector.broadcast %cst_64 : f32 to vector<16x1xf32>
    %179 = arith.addf %177, %178 : vector<16x1xf32>
    %180 = math.rsqrt %179 : vector<16x1xf32>
    %181 = vector.broadcast %180 : vector<16x1xf32> to vector<16x64xf32>
    %182 = arith.mulf %172, %181 : vector<16x64xf32>
    %c0_65 = arith.constant 0 : index
    %c0_66 = arith.constant 0 : index
    %183 = vector.load %arg13[%c0_65, %c0_66] : memref<1x64xf32, #tpu.memory_space<vmem>>, vector<1x64xf32>
    %184 = vector.broadcast %183 : vector<1x64xf32> to vector<16x64xf32>
    %185 = arith.mulf %182, %184 : vector<16x64xf32>
    %186 = arith.truncf %185 : vector<16x64xf32> to vector<16x64xbf16>
    %c0_67 = arith.constant 0 : index
    %c0_68 = arith.constant 0 : index
    %187 = vector.load %arg14[%c0_67, %c0_68] : memref<64x32xbf16, #tpu.memory_space<vmem>>, vector<64x32xbf16>
    %cst_69 = arith.constant dense<0.000000e+00> : vector<16x32xf32>
    %188 = tpu.matmul %186, %187, %cst_69 {dimension_numbers = #tpu.dot_dimension_numbers<[1], [0], [0], [1], [0, 0, 1, 1], [], []>} : vector<16x64xbf16>, vector<64x32xbf16>, vector<16x32xf32> -> vector<16x32xf32>
    %189 = arith.truncf %188 : vector<16x32xf32> to vector<16x32xbf16>
    %c0_70 = arith.constant 0 : index
    %c0_71 = arith.constant 0 : index
    %c0_72 = arith.constant 0 : index
    %190 = vector.load %arg15[%c0_70, %c0_71, %c0_72] : memref<1x16x32xbf16, #tpu.memory_space<vmem>>, vector<1x16x32xbf16>
    %191 = vector.shape_cast %190 : vector<1x16x32xbf16> to vector<16x32xbf16>
    %192 = vector.shape_cast %189 : vector<16x32xbf16> to vector<1x16x32xbf16>
    tpu.vector_store %arg15[%c0_70, %c0_71, %c0_72], %192 {strides = array<i32>} : memref<1x16x32xbf16, #tpu.memory_space<vmem>>, vector<1x16x32xbf16>,
    return
  }
  func.func @transform_0(%arg0: i32, %arg1: i32) -> (i32, i32, i32) {
    %c0_i32 = arith.constant 0 : i32
    %c0_i32_0 = arith.constant 0 : i32
    return %arg0, %arg1, %c0_i32 : i32, i32, i32
  }
  func.func @transform_1(%arg0: i32, %arg1: i32) -> (i32, i32) {
    %c0_i32 = arith.constant 0 : i32
    %c0_i32_0 = arith.constant 0 : i32
    %c0_i32_1 = arith.constant 0 : i32
    return %c0_i32, %c0_i32_0 : i32, i32
  }
  func.func @transform_2(%arg0: i32, %arg1: i32) -> (i32, i32) {
    %c0_i32 = arith.constant 0 : i32
    %c0_i32_0 = arith.constant 0 : i32
    %c0_i32_1 = arith.constant 0 : i32
    return %c0_i32, %c0_i32_0 : i32, i32
  }
  func.func @transform_3(%arg0: i32, %arg1: i32) -> (i32, i32) {
    %c0_i32 = arith.constant 0 : i32
    %c0_i32_0 = arith.constant 0 : i32
    %c0_i32_1 = arith.constant 0 : i32
    return %c0_i32, %c0_i32_0 : i32, i32
  }
  func.func @transform_4(%arg0: i32, %arg1: i32) -> (i32, i32) {
    %c0_i32 = arith.constant 0 : i32
    %c0_i32_0 = arith.constant 0 : i32
    %c0_i32_1 = arith.constant 0 : i32
    return %c0_i32, %c0_i32_0 : i32, i32
  }
  func.func @transform_5(%arg0: i32, %arg1: i32) -> (i32, i32) {
    %c0_i32 = arith.constant 0 : i32
    %c0_i32_0 = arith.constant 0 : i32
    %c0_i32_1 = arith.constant 0 : i32
    return %c0_i32, %c0_i32_0 : i32, i32
  }
  func.func @transform_6(%arg0: i32, %arg1: i32) -> (i32, i32) {
    %c0_i32 = arith.constant 0 : i32
    %c0_i32_0 = arith.constant 0 : i32
    %c0_i32_1 = arith.constant 0 : i32
    return %c0_i32, %c0_i32_0 : i32, i32
  }
  func.func @transform_7(%arg0: i32, %arg1: i32) -> (i32, i32) {
    %c0_i32 = arith.constant 0 : i32
    %c0_i32_0 = arith.constant 0 : i32
    %c0_i32_1 = arith.constant 0 : i32
    return %c0_i32, %c0_i32_0 : i32, i32
  }
  func.func @transform_8(%arg0: i32, %arg1: i32) -> (i32, i32) {
    %c0_i32 = arith.constant 0 : i32
    %c0_i32_0 = arith.constant 0 : i32
    %c0_i32_1 = arith.constant 0 : i32
    return %c0_i32, %c0_i32_0 : i32, i32
  }
  func.func @transform_9(%arg0: i32, %arg1: i32) -> (i32, i32) {
    %c0_i32 = arith.constant 0 : i32
    %c0_i32_0 = arith.constant 0 : i32
    %c0_i32_1 = arith.constant 0 : i32
    return %c0_i32, %c0_i32_0 : i32, i32
  }
  func.func @transform_10(%arg0: i32, %arg1: i32) -> (i32, i32) {
    %c0_i32 = arith.constant 0 : i32
    %c0_i32_0 = arith.constant 0 : i32
    %c0_i32_1 = arith.constant 0 : i32
    return %c0_i32, %c0_i32_0 : i32, i32
  }
  func.func @transform_11(%arg0: i32, %arg1: i32) -> (i32, i32) {
    %c0_i32 = arith.constant 0 : i32
    %c0_i32_0 = arith.constant 0 : i32
    %c0_i32_1 = arith.constant 0 : i32
    return %c0_i32, %c0_i32_0 : i32, i32
  }
  func.func @transform_12(%arg0: i32, %arg1: i32) -> (i32, i32) {
    %c0_i32 = arith.constant 0 : i32
    %c0_i32_0 = arith.constant 0 : i32
    %c0_i32_1 = arith.constant 0 : i32
    return %c0_i32, %c0_i32_0 : i32, i32
  }
  func.func @transform_13(%arg0: i32, %arg1: i32) -> (i32, i32, i32) {
    %c0_i32 = arith.constant 0 : i32
    %c0_i32_0 = arith.constant 0 : i32
    return %arg0, %arg1, %c0_i32 : i32, i32, i32
  }
}

</mosaic_0001>

<bundles_post_ra>
// kernel: tpu_custom_call.1
= control target key start
LH: loop header
LB: loop body
LE: loop exit
PB: predicated region body
PF: predicated region fallthrough
CT: control target
= control target key end

     0   :  { %s3791_s0 = inlined_call_operand.vmem [shape: bf16[2,32,32], index: 0, kind: input, shape index: {}]   ;;  %s3792_s1 = inlined_call_operand.vmem [shape: bf16[32,64], index: 1, kind: input, shape index: {}]   ;;  %s3793_s2 = inlined_call_operand.vmem [shape: bf16[32,64], index: 2, kind: input, shape index: {}]   ;;  %s3794_s3 = inlined_call_operand.vmem [shape: f32[4,64], index: 3, kind: input, shape index: {}]   ;;  %s3795_s4 = inlined_call_operand.hbm [shape: f32[1,64], index: 4, kind: input, shape index: {}]   ;;  %s3796_s5 = inlined_call_operand.hbm [shape: bf16[64,512], index: 5, kind: input, shape index: {}]   ;;  %s3797_s6 = inlined_call_operand.hbm [shape: f32[1,512], index: 6, kind: input, shape index: {}]   ;;  %s3798_s7 = inlined_call_operand.vmem [shape: bf16[64,16], index: 7, kind: input, shape index: {}]   ;;  %s3799_s8 = inlined_call_operand.vmem [shape: bf16[16,64], index: 8, kind: input, shape index: {}]   ;;  %s3800_s9 = inlined_call_operand.vmem [shape: f32[1,64], index: 9, kind: input, shape index: {}]   ;;  %s3801_s10 = inlined_call_operand.vmem [shape: f32[1,64], index: 10, kind: input, shape index: {}]   ;;  %s3802_s11 = inlined_call_operand.vmem [shape: f32[1,64], index: 11, kind: input, shape index: {}]   ;;  %s3803_s12 = inlined_call_operand.vmem [shape: bf16[64,32], index: 12, kind: input, shape index: {}]   ;;  %s3804_s13 = inlined_call_operand.hbm [shape: bf16[2,32,32], index: 13, kind: output, shape index: {}]  }
   0x1   :  { %3819 = sst [smem:[#allocation23_spill]] %s3804_s13 }
   0x2   :  { %18 = vsyncpa [#allocation5], 0 }
   0x3   :  { %19 = vsyncpa [#allocation8], 0 }
   0x4   :  { %20 = vsyncpa [#allocation6], 0 }
   0x5   :  { %22 = vsyncpa [#allocation6 + $0x1], 0  ;;  %s3283_s25 = smov 0   ;;  %s3285_s26 = smov 0  }
   0x6   :  { %s3287_s27 = smov 0   ;;  %s3289_s28 = smov 0  }
   0x7   :  { %s3291_s29 = smov 0   ;;  %s3293_s30 = smov 0  }
   0x8   :  { %s3295_s14 = smov 0   ;;  %s3297_s15 = smov 0  }
   0x9 LB: > { %3820 = sst [smem:[#allocation14_spill]] %s3171_s25  ;;  %s2492_s16 = sadd.s32 4294967295, %s3199_s15   ;;  %s3199_s15 = sphi %s3297_s15, %s28_s15   ;;  %s3195_s14 = sphi %s3295_s14, %s3847_s14   ;;  %s3191_s30 = sphi %s3293_s30, %s3846_s30   ;;  %s3187_s29 = sphi %s3291_s29, %s3845_s29   ;;  %s3183_s28 = sphi %s3289_s28, %s3844_s28   ;;  %s3179_s27 = sphi %s3287_s27, %s3850_s27   ;;  %s3175_s26 = sphi %s3285_s26, %s3849_s26   ;;  %s3171_s25 = sphi %s3283_s25, %s3848_s25  }
   0xa   : > { %3821 = sst [smem:[#allocation15_spill]] %s3179_s27  ;;  %s2493_s17 = sadd.s32 4294967294, %s3199_s15  }
   0xb   : > { %3822 = sst [smem:[#allocation16_spill]] %s3191_s30  ;;  %s37_s18 = sadd.s32 1, %s3191_s30 }
   0xc   : > { %3823 = sst [smem:[#allocation17_spill]] %s3195_s14  ;;  %s40_s19 = sadd.s32 1, %s3195_s14 }
   0xd   : > { %3824 = sst [smem:[#allocation18_spill]] %s3199_s15  ;;  %p38_p0 = scmp.ge.s32.totalorder %s37_s18, 2 }
   0xe   : > { %s329_s20 = sadd.s32 1, %s3179_s27  ;;  %p339_p1 = scmp.ne.s32.totalorder %s3179_s27, %s3175_s26 }
   0xf   : > { %p340_p2 = scmp.eq.s32.totalorder %s2492_s16, 3  ;;  %s3852_s18 = smov (%p38_p0, %s37_s18), 0 }
  0x10   : > { %3825 = sst [smem:[#allocation19_spill]] %s3852_s18  ;;  %s3854_s19 = smov (!%p38_p0, %s40_s19), %s3195_s14 }
  0x11   : > { %s325_s21 = ssub.s32 %s3191_s30, %s3852_s18  ;;  %p3335_p3 = por %p340_p2, %p339_p1 }
  0x12   : > { %p42_p4 = scmp.ge.s32.totalorder %s3854_s19, 2  ;;  %p345_p5 = scmp.ne.s32.totalorder %s3175_s26, %s3171_s25 }
  0x13   : > { %s3826_s22 = scalar_select %p3335_p3, 1, 0 }
  0x14   : > { %p346_p6 = scmp.eq.s32.totalorder %s2493_s17, 3  ;;  %p2494_p7 = scmp.ge.s32.totalorder %s3199_s15, 1 }
  0x15   : > { %s3856_s19 = smov (%p42_p4, %s3854_s19), 0  ;;  %p353_p9 = scmp.lt.s32.totalorder %s3199_s15, 5 }
  0x16   : > { %3827 = sst [smem:[#allocation20_spill]] %s3856_s19  ;;  %p3344_p8 = por %p346_p6, %p345_p5 }
  0x17   : > { %s324_s24 = ssub.s32 %s3195_s14, %s3856_s19  ;;  %p3351_p10 = pnand %p2494_p7, %p353_p9 }
  0x18   : > { %s3828_s23 = scalar_select %p3344_p8, 1, 0 }
  0x19   : > { %s326_s13 = sor.u32 %s325_s21, %s324_s24  ;;  %p3355_p12 = scmp.eq.s32.totalorder %s2492_s16, 0 }
  0x1a   : > { %3829 = sst [smem:[#allocation21_spill]] %s3828_s23  ;;  %p327_p11 = scmp.eq.s32.totalorder %s326_s13, 0 }
  0x1b   : > { %s3830_s18 = scalar_select %p3351_p10, 1, 0 }
  0x1c   : > { %s3831_s30 = scalar_select %p3355_p12, 1, 0 }
  0x1d   : > { %p2811_p13 = pneg %p3351_p10  ;;  %s3201_s21 = smov [#allocation7]  }
  0x1e   : > { %s3362_s17 = scalar_select %p327_p11, %s3179_s27, %s329_s20  }
  0x1f   : > { %p3366_p0 = pnand %p3355_p12, %p2811_p13  ;;  %s385_s24 = sshll.u32 %s3201_s21, 4  ;;  %s386_s24 = int_to_ptr.vmem [resolvable:$true] %s385_s24 }
  0x20   : > { %3832 = sst [smem:[#allocation22_spill]] %s3362_s17  ;;  %s3032_s13 = scalar_lea.vmem %s386_s24, 2048 }
  0x21   : > { %p3023_p1 = pneg %p3366_p0  ;;  %p3033_p2 = scmp.ne.s32.totalorder %s386_s24, %s3032_s13 }
  0x22   : > { %p3040_p6 = scmp.lt.s32.totalorder %s386_s24, %s386_s24  ;;  %p3041_p7 = scmp.lt.s32.totalorder %s3032_s13, %s3032_s13 }
  0x23   : > { %p3035_p4 = pnand %p3033_p2, %p3023_p1 }
  0x24   : > { %p3042_p9 = por %p3041_p7, %p3040_p6 }
  0x25   : > { %p3036_p5 = pneg %p3035_p4 }
  0x27   : > { %p3043_p11 = pnand %p3042_p9, %p3036_p5 }
  0x29   : > { %3046 = shalt.err (!%p3043_p11)
}
  0x2a   : > { %s3202_s16 = smov 256   ;;  %s3203_s20 = smov 16  }
  0x2b   : > { %2817 = dma.hbm_to_vmem [thread:$0]  (!%p3366_p0), %s3796_s5, 2048, %s386_s24, [#allocation8], %s3202_s16, %s3202_s16, %s3203_s20  }
  0x2c   : > { %s3204_s14 = smov [#allocation4]   ;;  %s3205_s27 = smov [#allocation9]  }
  0x2d   : > { %s375_s17 = sshll.u32 %s3204_s14, 4  ;;  %s399_s25 = sshll.u32 %s3205_s27, 4  ;;  %s376_s17 = int_to_ptr.vmem [resolvable:$true] %s375_s17  ;;  %s400_s25 = int_to_ptr.vmem [resolvable:$true] %s399_s25 }
  0x2e   : > { %s3058_s15 = scalar_lea.vmem %s376_s17, 16  ;;  %s3065_s13 = scalar_lea.vmem %s376_s17, 32 }
  0x2f   : > { %p3059_p13 = scmp.ne.s32.totalorder %s376_s17, %s3058_s15  ;;  %p3066_p5 = scmp.lt.s32.totalorder %s376_s17, %s376_s17 }
  0x30   : > { %p3067_p6 = scmp.lt.s32.totalorder %s3065_s13, %s3058_s15 }
  0x31   : > { %p3061_p2 = pnand %p3059_p13, %p3023_p1 }
  0x32   : > { %p3068_p7 = por %p3067_p6, %p3066_p5 }
  0x33   : > { %p3062_p4 = pneg %p3061_p2 }
  0x35   : > { %p3069_p9 = pnand %p3068_p7, %p3062_p4 }
  0x37   : > { %3072 = shalt.err (!%p3069_p9)
}
  0x38   : > { %2814 = dma.hbm_to_vmem [thread:$0]  (!%p3366_p0), %s3795_s4, 16, %s376_s17, [#allocation5]  }
  0x39   : > { %s3084_s27 = scalar_lea.vmem %s400_s25, 64  ;;  %p3092_p2 = scmp.lt.s32.totalorder %s400_s25, %s400_s25 }
  0x3a   : > { %p3085_p11 = scmp.ne.s32.totalorder %s400_s25, %s3084_s27  ;;  %p3093_p3 = scmp.lt.s32.totalorder %s3084_s27, %s3084_s27 }
  0x3c   : > { %p3087_p8 = pnand %p3085_p11, %p3023_p1  ;;  %p3094_p12 = por %p3093_p3, %p3092_p2 }
  0x3e   : > { %p3088_p13 = pneg %p3087_p8 }
  0x40   : > { %p3095_p10 = pnand %p3094_p12, %p3088_p13 }
  0x42   : > { %3098 = shalt.err (!%p3095_p10)
}
  0x43   : > { %2820 = dma.hbm_to_vmem [thread:$0]  (!%p3366_p0), %s3797_s6, 64, %s400_s25, [#allocation8]  }
  0x44   : > { %p3834_p4 = scmp.ne.s32.totalorder %s3830_s18, 0 }
  0x45   : > { %p3835_p5 = scmp.ne.s32.totalorder (!%p3834_p4), %s3831_s30, 0 }
  0x46   : > { %443 = sbr.rel (%p3834_p4) target bundleno = 2032 (0x7f0), region = 72 }
  0x4b   : > { %3158 = dma.done.wait (%p3835_p5), [#allocation5], 16  }
  0x4c   : > { %3160 = vsyncadd (%p3835_p5), [#allocation5], 4294967280 }
  0x4d   : > { %3162 = dma.done.wait (%p3835_p5), [#allocation8], 2112  }
  0x4e   : > { %3164 = vsyncadd (%p3835_p5), [#allocation8], 4294965184  ;;  %s496_s25 = sand.u32 1, %s3175_s26   ;;  %s3408_s18 = sshll.u32 %s3183_s28, 1 }
  0x4f   : > { %s2503_s23 = sshll.u32 %s496_s25, 3  ;;  %p500_p3 = scmp.lt.s32.totalorder %s3187_s29, 1 }
  0x50   : > { %p502_p8 = scmp.lt.s32.totalorder %s3408_s18, 3  ;;  %s3419_s27 = scalar_lea.vmem [#allocation10], %s2503_s23 }
  0x51   : > { %s501_s17 = scalar_select %p500_p3, %s3187_s29, 1 }
  0x52   : > { %s503_s16 = scalar_select %p502_p8, %s3408_s18, 3 }
  0x53   : > { %s2505_s20 = sshll.u32 %s501_s17, 2  ;;  %p2507_p10 = scmp.ne.s32.totalorder %s3183_s28, 0 }
  0x54   : > { %s505_s21 = sadd.s32 %s2505_s20, %s503_s16 }
  0x55   : > { %s2506_s30 = sshll.u32 %s505_s21, 2  ;;  %514 = sbr.rel (%p2507_p10) target bundleno = 96 (0x60), region = 88 }
  0x56   : > { %s507_s14 = scalar_lea.vmem %s3791_s0, %s2506_s30 }
  0x5a   : > { %vm523_vm0 = vcmask 523264   ;;  %v3206_v0 = vmov 0.0  }
  0x5b   : > { %515 = vst [vmem:[#allocation2 + $0x30] sm:$0xff] %v3206_v0  ;;  %516 = vst [vmem:[#allocation2] sm:$0xff] %v3206_v0 }
  0x5c   : > { %517 = vst [vmem:[#allocation2 + $0x18] sm:$0xff] %v3206_v0  ;;  %518 = vst [vmem:[#allocation2 + $0x10] sm:$0xff] %v3206_v0 }
  0x5d   : > { %519 = vst [vmem:[#allocation2 + $0x8] sm:$0xff] %v3206_v0  ;;  %520 = vst [vmem:[#allocation2 + $0x20] sm:$0xff] %v3206_v0 }
  0x5e   : > { %521 = vst [vmem:[#allocation2 + $0x28] sm:$0xff] %v3206_v0  ;;  %522 = vst [vmem:[#allocation2 + $0x38] sm:$0xff] %v3206_v0 }
  0x5f   : > { %524 = vst.msk [vmem:[#allocation3] sm:$0xff] %vm523_vm0, %v3206_v0 }
  0x60 PF: > { %v2907_v1 = vld [vmem:[%s3792_s1 + $0x8] sm:$0xff]   ;;  %v3207_v2 = vmov 0.0   ;;  %v2908_v3 = vld [vmem:[%s3792_s1] sm:$0xff]   ;;  %vm3208_vm1 = vmmov 0   ;;  %vm548_vm2 = vcmask 261120   ;;  %v3209_v8 = vmov 0  }
  0x61   : > { %2655 = vmatprep.subr.bf16.mxu0 %v3207_v2  ;;  %2663 = vmatprep.subr.bf16.mxu1 %v3207_v2  ;;  %v2909_v4 = vld [vmem:[%s507_s14] sm:$0xff]   ;;  %v2910_v5 = vld [vmem:[%s3793_s2 + $0x8] sm:$0xff]   ;;  %v657_v24 = vlaneseq  ;;  %vm650_vm3 = vcmask 523264   ;;  %vm674_vm4 = vcmask 1046528   ;;  %vm696_vm5 = vcmask 1045504   ;;  %s2583_s19 = sshll.u32 %s3187_s29, 2 }
  0x62   : > { %2656 = vmatpush3.bf16.msra.mxu0 %v2907_v1  ;;  %2659 = vmatprep.mubr.msk.bf16.mxu0 %vm3208_vm1, %v3207_v2  ;;  %v2912_v6 = vld [vmem:[#allocation7 + $0x60] ss:$16 sps:$4 sm:$0xff]   ;;  %v2914_v7 = vld [vmem:[#allocation7 + $0x64] ss:$16 sps:$4 sm:$0xff]   ;;  %v2917_v11 = vld [vmem:[#allocation7 + $0x6c] ss:$16 sps:$4 sm:$0xff]   ;;  %s2376_s14 = sadd.s32 %s2583_s19, %s3408_s18 }
  0x63   : > { %2657 = vmatprep.subr.bf16.mxu0 %v3207_v2  ;;  %2667 = vmatprep.mubr.msk.bf16.mxu1 %vm3208_vm1, %v3207_v2  ;;  %v2911_v9 = vld [vmem:[%s3793_s2] sm:$0xff]   ;;  %v2918_v12 = vld [vmem:[#allocation7 + $0x40] ss:$16 sps:$4 sm:$0xff]   ;;  %v3447_v25 = vshrl.u32 %v657_v24, 7  ;;  %vm716_vm6 = vcmask 1044480   ;;  %vm2223_vm7 = vcmask 1042432  }
  0x64   : > { %2664 = vmatpush3.bf16.msra.mxu1 %v2910_v5  ;;  %v2920_v10 = vld [vmem:[#allocation7 + $0x44] ss:$16 sps:$4 sm:$0xff]   ;;  %v2915_v14 = vld [vmem:[#allocation7 + $0x68] ss:$16 sps:$4 sm:$0xff]   ;;  %v2923_v15 = vld [vmem:[#allocation7 + $0x4c] ss:$16 sps:$4 sm:$0xff]  }
  0x65   : > { %2665 = vmatprep.subr.bf16.mxu1 %v3207_v2  ;;  %v2926_v13 = vld [vmem:[#allocation7 + $0x24] ss:$16 sps:$4 sm:$0xff]   ;;  %v2924_v16 = vld [vmem:[#allocation7 + $0x20] ss:$16 sps:$4 sm:$0xff]   ;;  %v2921_v18 = vld [vmem:[#allocation7 + $0x48] ss:$16 sps:$4 sm:$0xff]  }
  0x66   : > { %2658 = vmatpush3.bf16.msra.mxu0 %v2908_v3  ;;  %v2932_v17 = vld [vmem:[#allocation7 + $0x4] ss:$16 sps:$4 sm:$0xff]   ;;  %v2929_v19 = vld [vmem:[#allocation7 + $0x2c] ss:$16 sps:$4 sm:$0xff]   ;;  %v2930_v20 = vld [vmem:[#allocation7] ss:$16 sps:$4 sm:$0xff]  }
  0x67   : > { %907 = vmatprep.subr.bf16.mxu0 %v2914_v7  ;;  %v2927_v21 = vld [vmem:[#allocation7 + $0x28] ss:$16 sps:$4 sm:$0xff]   ;;  %v2935_v22 = vld [vmem:[#allocation7 + $0xc] ss:$16 sps:$4 sm:$0xff]   ;;  %v666_v26 = vsub.s32 1, %v3447_v25  ;;  %v688_v28 = vsub.s32 2, %v3447_v25 }
  0x68   : > { %2666 = vmatpush3.bf16.msra.mxu1 %v2911_v9  ;;  %v2933_v23 = vld [vmem:[#allocation7 + $0x8] ss:$16 sps:$4 sm:$0xff]   ;;  %v659_v35 = vsub.s32 0, %v3447_v25  ;;  %v710_v36 = vsub.s32 3, %v3447_v25  ;;  %vm798_vm8 = vsmask.f32 5376 }
  0x69   : > { %2660 = vmatmul.mubr.msk.bf16.vlgmr.msra.gmra.mxu0 %vm548_vm2, %v2909_v4  ;;  %950 = vmatprep.subr.bf16.mxu1 %v2917_v11  ;;  %v656_v27 = vld [vmem:[%s3794_s3] sm:$0xf]  ;;  %vm1078_vm9 = vcmask 130048   ;;  %vm1236_vm14 = vcmask 64512   ;;  %s2584_s15 = sshll.u32 %s2376_s14, 6  ;;  %s2379_s24 = sshll.u32 %s3419_s27, 4  ;;  %s3735_s24 = int_to_ptr.vmem [resolvable:$true] %s2379_s24 }
  0x6a   : > { %931 = vmatprep.mubr.bf16.mxu0 %v3209_v8  ;;  %908 = vmatpush1.bf16.msra.mxu0 %v2912_v6  ;;  %v667_v30 = vrot.slane %v656_v27, %v666_v26  ;;  %v653_v32 = vld [vmem:[#allocation3] sm:$0xff]  ;;  %v689_v33 = vrot.slane %v656_v27, %v688_v28  ;;  %v660_v41 = vrot.slane %v656_v27, %v659_v35  ;;  %s3836_s23 = sld [smem:[#allocation23_spill]]  ;;  %s3740_s18 = scalar_lea.sflag [#allocation6], %s496_s25 }
  0x6b   : > { %909 = vmatprep.subr.bf16.mxu0 %v2920_v10  ;;  %2668 = vmatmul.mubr.msk.bf16.vlgmr.msra.gmra.mxu1 %vm548_vm2, %v2909_v4  ;;  %v711_v42 = vrot.slane %v656_v27, %v710_v36  ;;  %v2515_v4 = vld [vmem:[#allocation4] ss:$0 sm:$0xff]  ;;  %s3099_s16 = scalar_lea.vmem %s3735_s24, 128  ;;  %p3837_p0 = scmp.ne.s32.totalorder %s3826_s22, 0 }
  0x6c   : > { %951 = vmatpush1.bf16.msra.mxu1 %v2915_v14  ;;  %974 = vmatprep.mubr.bf16.mxu1 %v3209_v8  ;;  %v668_v37 = vmul.f32 %v667_v30, %v653_v32  ;;  %v690_v39 = vmul.f32 %v689_v33, %v653_v32  ;;  %v661_v46 = vmul.f32 %v660_v41, %v653_v32  ;;  %v2570_v32 = vld [vmem:[%s3801_s10] ss:$0 sm:$0xff]  ;;  %p3100_p12 = scmp.ne.s32.totalorder %s3735_s24, %s3099_s16  ;;  %s3210_s20 = smov [#allocation10]  }
  0x6d   : > { %952 = vmatprep.subr.bf16.mxu1 %v2923_v15  ;;  %s3103_s21 = sshll.u32 %s3210_s20, 4  ;;  %s3104_s21 = int_to_ptr.vmem [resolvable:$false] %s3103_s21 }
  0x6e   : > { %910 = vmatpush1.bf16.msra.mxu0 %v2918_v12  ;;  %v675_v44 = vrot.slane %v668_v37, 1  ;;  %v697_v48 = vrot.slane %v690_v39, 2  ;;  %p3101_p1 = pnand %p3100_p12, %p3837_p0  ;;  %s3105_s30 = scalar_lea.vmem %s3104_s21, 256 }
  0x6f   : > { %911 = vmatprep.subr.bf16.mxu0 %v2926_v13  ;;  %p3106_p7 = scmp.lt.s32.totalorder %s3735_s24, %s3104_s21  ;;  %p3107_p9 = scmp.lt.s32.totalorder %s3105_s30, %s3099_s16 }
  0x70   : > { %953 = vmatpush1.bf16.msra.mxu1 %v2921_v18  ;;  %s3733_s17 = scalar_lea.hbm %s3836_s23, %s2584_s15  ;;  %p3102_p6 = pneg %p3101_p1 }
  0x71   : > { %954 = vmatprep.subr.bf16.mxu1 %v2929_v19  ;;  %p3108_p11 = por %p3107_p9, %p3106_p7 }
  0x72   : > { %912 = vmatpush1.bf16.msra.mxu0 %v2924_v16 }
  0x73   : > { %913 = vmatprep.subr.bf16.mxu0 %v2932_v17  ;;  %p3109_p13 = pnand %p3108_p11, %p3102_p6 }
  0x74   : > { %955 = vmatpush1.bf16.msra.mxu1 %v2927_v21 }
  0x75   : > { %956 = vmatprep.subr.bf16.mxu1 %v2935_v22 }
  0x76   : > { %914 = vmatpush1.bf16.msra.mxu0 %v2930_v20 }
  0x77   : > { %2671 = vmatprep.subr.bf16.mxu0 %v3207_v2 }
  0x78   : > { %957 = vmatpush1.bf16.msra.mxu1 %v2933_v23 }
  0x79   : > { %2683 = vmatprep.subr.bf16.mxu1 %v3207_v2 }
 0x129   : > { %v3454_v29 = vpop.f32.mrf.mxu0 }
 0x12a   : > { %651 = vst.msk [vmem:[#allocation3 + $0x8] sm:$0xff] %vm650_vm3, %v3454_v29 }
 0x12b   : > { %v2661_v31 = vpop.f32.mrf.mxu0 }
 0x12d   : > { %v3462_v34 = vpop.f32.mrf.mxu0 }
 0x12e   : > { %652 = vst.msk [vmem:[#allocation3 + $0x10] sm:$0xff] %vm650_vm3, %v3462_v34 }
 0x12f   : > { %v2662_v38 = vpop.f32.mrf.mxu0 }
 0x131   : > { %v654_v40 = vld [vmem:[#allocation3 + $0x8] sm:$0xff] }
 0x132   : > { %v669_v43 = vmul.f32 %v667_v30, %v654_v40  ;;  %v691_v45 = vmul.f32 %v689_v33, %v654_v40  ;;  %v712_v51 = vmul.f32 %v711_v42, %v654_v40  ;;  %v662_v61 = vmul.f32 %v660_v41, %v654_v40 }
 0x134   : > { %v676_v47 = vrot.slane %v669_v43, 1  ;;  %v698_v49 = vrot.slane %v691_v45, 2  ;;  %v717_v63 = vrot.slane %v712_v51, 3 }
 0x135   : > { %v655_v50 = vld [vmem:[#allocation3 + $0x10] sm:$0xff] }
 0x136   : > { %v670_v52 = vmul.f32 %v667_v30, %v655_v50  ;;  %v677_v53 = vsel %vm674_vm4, %v675_v44, %v676_v47  ;;  %v692_v54 = vmul.f32 %v689_v33, %v655_v50  ;;  %757 = vst.msk [vmem:[#allocation3] sm:$0xff] %vm650_vm3, %v655_v50  ;;  %v713_v56 = vmul.f32 %v711_v42, %v655_v50 }
 0x137   : > { %v683_v55 = vadd.f32 %v677_v53, %v661_v46  ;;  %v663_v57 = vmul.f32 %v660_v41, %v655_v50  ;;  %v699_v59 = vsel %vm696_vm5, %v697_v48, %v698_v49 }
 0x138   : > { %v678_v58 = vrot.slane %v670_v52, 1  ;;  %v700_v60 = vrot.slane %v692_v54, 2  ;;  %v718_v3 = vrot.slane %v713_v56, 3 }
 0x139   : > { %v705_v62 = vadd.f32 %v699_v59, %v683_v55 }
 0x13a   : > { %v679_v0 = vsel %vm674_vm4, %v676_v47, %v678_v58  ;;  %v685_v1 = vadd.f32 %v678_v58, %v663_v57  ;;  %v701_v7 = vsel %vm696_vm5, %v698_v49, %v700_v60  ;;  %v719_v11 = vsel %vm716_vm6, %v717_v63, %v718_v3 }
 0x13b   : > { %v684_v5 = vadd.f32 %v679_v0, %v662_v61  ;;  %v723_v6 = vadd.f32 %v717_v63, %v705_v62  ;;  %v2937_v62 = vld [vmem:[%s3798_s7 + $0x10] sm:$0xff]   ;;  %v2938_v63 = vld [vmem:[%s3798_s7 + $0x8] sm:$0xff]   ;;  %v2939_v0 = vld [vmem:[%s3798_s7] sm:$0xff]  }
 0x13c   : > { %v707_v8 = vadd.f32 %v700_v60, %v685_v1  ;;  %v2936_v60 = vld [vmem:[%s3798_s7 + $0x18] sm:$0xff]   ;;  %v3505_v1 = vpop.f32.mrf.mxu1 }
 0x13d   : > { %v706_v9 = vadd.f32 %v701_v7, %v684_v5  ;;  %v733_v10 = vadd.f32 %v2515_v4, %v723_v6  ;;  %v2940_v7 = vld [vmem:[%s3799_s8] sm:$0xff]  }
 0x13e   : > { %v725_v12 = vadd.f32 %v718_v3, %v707_v8  ;;  %v2669_v3 = vpop.f32.mrf.mxu1  ;;  %v776_v8 = vld [vmem:[#allocation9] sm:$0xf] }
 0x13f   : > { %v724_v13 = vadd.f32 %v719_v11, %v706_v9  ;;  %v2516_v14 = vmul.f32 -1.442695, %v733_v10  ;;  %v789_v9 = vrot.slane %v776_v8, %v688_v28  ;;  %v793_v11 = vrot.slane %v776_v8, %v710_v36 }
 0x140   : > { %v735_v15 = vadd.f32 %v2515_v4, %v725_v12  ;;  %v3509_v5 = vpop.f32.mrf.mxu1 }
 0x141   : > { %v734_v16 = vadd.f32 %v2515_v4, %v724_v13  ;;  %2945 = vpow2.f32 %v2516_v14  ;;  %v985_v4 = vpack.c.bf16 %v3462_v34, %v3454_v29 }
 0x142   : > { %v2518_v17 = vmul.f32 -1.442695, %v735_v15  ;;  %v2670_v6 = vpop.f32.mrf.mxu1 }
 0x143   : > { %v2517_v18 = vmul.f32 -1.442695, %v734_v16 }
 0x144   : > { %2947 = vpow2.f32 %v2518_v17  ;;  %v3528_v17 = vrot.slane %v776_v8, %v659_v35 }
 0x145   : > { %2949 = vpow2.f32 %v2517_v18 }
 0x14e   : > { %v2946_v19 = vpop.eup %2945 }
 0x14f   : > { %v745_v20 = vadd.f32 1.0, %v2946_v19 }
 0x151   : > { %v2948_v21 = vpop.eup %2947  ;;  %2951 = vrcp.f32 %v745_v20 }
 0x152   : > { %v2950_v22 = vpop.eup %2949  ;;  %v747_v23 = vadd.f32 1.0, %v2948_v21 }
 0x153   : > { %v746_v27 = vadd.f32 1.0, %v2950_v22 }
 0x154   : > { %2953 = vrcp.f32 %v747_v23 }
 0x155   : > { %2955 = vrcp.f32 %v746_v27 }
 0x15e   : > { %v2952_v30 = vpop.eup %2951 }
 0x15f   : > { %v754_v31 = vmul.f32 %v2952_v30, %v733_v10  ;;  %v785_v10 = vrot.slane %v776_v8, %v666_v26 }
 0x161   : > { %v2954_v33 = vpop.eup %2953  ;;  %v2217_v40 = vmul.f32 %v2570_v32, %v754_v31 }
 0x162   : > { %v2956_v37 = vpop.eup %2955  ;;  %v756_v38 = vmul.f32 %v2954_v33, %v735_v15 }
 0x163   : > { %v755_v39 = vmul.f32 %v2956_v37, %v734_v16  ;;  %v2224_v50 = vrot.slane %v2217_v40, 5 }
 0x164   : > { %v759_v41 = vpack.c.bf16 %v756_v38, %v756_v38  ;;  %v2219_v42 = vmul.f32 %v2570_v32, %v756_v38 }
 0x165   : > { %v758_v43 = vpack.c.bf16 %v755_v39, %v754_v31  ;;  %v2218_v44 = vmul.f32 %v2570_v32, %v755_v39 }
 0x166   : > { %v808_v45 = vshrl.u32 %v759_v41, 16  ;;  %v811_v46 = vshll.u32 %v759_v41, 16  ;;  %v2227_v47 = vrot.slane %v2219_v42, 5 }
 0x167   : > { %v800_v48 = vshrl.u32 %v758_v43, 16  ;;  %v803_v49 = vshll.u32 %v758_v43, 16  ;;  %v2225_v51 = vrot.slane %v2218_v44, 5 }
 0x168   : > { %v810_v52 = vrot.slane %v808_v45, 2  ;;  %v813_v53 = vrot.slane %v811_v46, 3 }
 0x169   : > { %v802_v54 = vrot.slane %v800_v48, 2  ;;  %v805_v55 = vrot.slane %v803_v49, 3  ;;  %v3480_v56 = vsel %vm2223_vm7, %v2224_v50, %v2225_v51  ;;  %v3482_v57 = vsel %vm2223_vm7, %v2225_v51, %v2227_v47 }
 0x16a   : > { %v814_v58 = vor.u32 %v813_v53, %v810_v52 }
 0x16b   : > { %v806_v59 = vor.u32 %v805_v55, %v802_v54 }
 0x16d   : > { %v815_v61 = vsel %vm798_vm8, %v806_v59, %v814_v58  ;;  %v3548_v59 = vand.u32 127, %v657_v24 }
 0x16e   : > { %2535 = vmatmul.mubr.msk.bf16.vlgmr.msra.gmra.mxu0 %vm650_vm3, %v815_v61  ;;  %2536 = vmatmul.mubr.msk.bf16.vlgmr.msra.gmra.mxu1 %vm650_vm3, %v815_v61 }
 0x16f   : > { %2672 = vmatpush3.bf16.msra.mxu0 %v2936_v60  ;;  %2679 = vmatprep.mubr.msk.bf16.mxu0 %vm3208_vm1, %v3207_v2  ;;  %vm1225_vm12 = vcmp.ge.s32.totalorder %v3447_v25, %v3548_v59 }
 0x170   : > { %2673 = vmatprep.subr.bf16.mxu0 %v3207_v2  ;;  %2685 = vmatprep.mubr.msk.bf16.mxu1 %vm3208_vm1, %v3207_v2 }
 0x171   : > { %2684 = vmatpush3.bf16.msra.mxu1 %v2940_v7 }
 0x172   : > { %2689 = vmatprep.subr.mxu1 %v3207_v2 }
 0x173   : > { %2674 = vmatpush3.bf16.msra.mxu0 %v2937_v62 }
 0x174   : > { %2675 = vmatprep.subr.bf16.mxu0 %v3207_v2 }
 0x177   : > { %2676 = vmatpush3.bf16.msra.mxu0 %v2938_v63 }
 0x178   : > { %2677 = vmatprep.subr.bf16.mxu0 %v3207_v2 }
 0x17b   : > { %2678 = vmatpush3.bf16.msra.mxu0 %v2939_v0 }
 0x17e   : > { %2680 = vmatmul.mubr.msk.bf16.vlgmr.msra.gmra.mxu0 %vm650_vm3, %v985_v4 }
 0x22e   : > { %v3522_v12 = vpop.f32.mrf.mxu0  ;;  %v976_v13 = vpop.f32.mrf.mxu1 }
 0x22f   : > { %v3524_v14 = vadd.f32 %v976_v13, %v789_v9 }
 0x230   : > { %v935_v15 = vpop.f32.mrf.mxu0  ;;  %v978_v16 = vpop.f32.mrf.mxu1 }
 0x231   : > { %v1139_v18 = vmin.f32 %v3524_v14, 20.0  ;;  %v3531_v28 = vadd.f32 %v935_v15, %v785_v10  ;;  %v979_v19 = vadd.f32 %v978_v16, %v793_v11  ;;  %vm1137_vm11 = vcmp.gt.f32.partialorder %v3524_v14, 20.0 }
 0x232   : > { %v937_v26 = vpop.f32.mrf.mxu0  ;;  %v980_v20 = vpop.f32.mrf.mxu1 }
 0x233   : > { %v1141_v21 = vmul.f32 1.442695, %v1139_v18  ;;  %v2547_v36 = vmul.f32 -1.442695, %v979_v19  ;;  %v3534_v22 = vadd.f32 %v937_v26, %v3528_v17  ;;  %v3536_v23 = vadd.f32 %v980_v20, %v789_v9 }
 0x234   : > { %v939_v27 = vpop.f32.mrf.mxu0  ;;  %v982_v30 = vpop.f32.mrf.mxu1  ;;  %v1193_v35 = vmul.f32 %v3531_v28, %v3531_v28 }
 0x235   : > { %2957 = vpow2.f32 %v1141_v21  ;;  %v1140_v31 = vmin.f32 %v3536_v23, 20.0  ;;  %v3541_v32 = vadd.f32 %v939_v27, %v785_v10  ;;  %v983_v33 = vadd.f32 %v982_v30, %v793_v11 }
 0x236   : > { %1195 = vadd.xlane.f32.xlu0 %v1193_v35  ;;  %2959 = vpow2.f32 %v2547_v36  ;;  %v3558_v11 = vsel %vm1225_vm12, 1.0, %v3207_v2  ;;  %vm1138_vm15 = vcmp.gt.f32.partialorder %v3536_v23, 20.0 }
 0x237   : > { %v1143_v37 = vmul.f32 1.442695, %v1140_v31  ;;  %v1194_v38 = vmul.f32 %v3541_v32, %v3541_v32  ;;  %v2548_v39 = vmul.f32 -1.442695, %v983_v33  ;;  %v2542_v31 = vld [vmem:[%s3800_s9] ss:$0 sm:$0xff] }
 0x239   : > { %2961 = vpow2.f32 %v1143_v37  ;;  %1197 = vadd.xlane.f32.xlu1 %v1194_v38 }
 0x23a   : > { %2963 = vpow2.f32 %v2548_v39 }
 0x23e   : > { %v1055_v40 = vpop.f32.mrf.mxu0 }
 0x240   : > { %v2681_v41 = vpop.f32.mrf.mxu0 }
 0x242   : > { %v2958_v42 = vpop.eup %2957  ;;  %v1058_v43 = vpop.f32.mrf.mxu0 }
 0x243   : > { %v1145_v44 = vadd.f32 1.0, %v2958_v42  ;;  %v1062_v45 = vpack.c.bf16 %v1058_v43, %v1055_v40  ;;  %v2960_v46 = vpop.eup %2959  ;;  %v1148_v52 = vmul.f32 -0.5, %v2958_v42  ;;  %v1151_v58 = vand.u32 2147483647, %v2958_v42 }
 0x244   : > { %v2682_v47 = vpop.f32.mrf.mxu0  ;;  %v1171_v49 = vadd.f32 1.0, %v2960_v46 }
 0x245   : > { %2965 = vlog2.f32 %v1145_v44  ;;  %2686 = vmatmul.mubr.msk.bf16.vlgmr.msra.gmra.mxu1 %vm1078_vm9, %v1062_v45  ;;  %v1149_v54 = vadd.f32 1.0, %v1148_v52  ;;  %vm1152_vm10 = vcmp.lt.f32.partialorder %v1151_v58, 0.0004427343 }
 0x246   : > { %v2962_v48 = vpop.eup %2961  ;;  %2691 = vmatprep.mubr.msk.f32.mxu1 %vm3208_vm1, %v3207_v2 }
 0x247   : > { %v1154_v50 = vadd.f32 1.0, %v2962_v48  ;;  %v2964_v51 = vpop.eup %2963  ;;  %v1157_v55 = vmul.f32 -0.5, %v2962_v48  ;;  %v1150_v62 = vmul.f32 %v2958_v42, %v1149_v54  ;;  %v1160_v0 = vand.u32 2147483647, %v2962_v48 }
 0x248   : > { %v1172_v53 = vadd.f32 1.0, %v2964_v51  ;;  %v3577_v51 = vsub.s32 7, %v3447_v25  ;;  %v2572_v25 = vmul.f32 -1.442695, %v3509_v5 }
 0x249   : > { %2967 = vlog2.f32 %v1154_v50  ;;  %v1158_v63 = vadd.f32 1.0, %v1157_v55  ;;  %vm1161_vm13 = vcmp.lt.f32.partialorder %v1160_v0, 0.0004427343 }
 0x24a   : > { %2969 = vrcp.f32 %v1171_v49 }
 0x24b   : > { %2971 = vrcp.f32 %v1172_v53  ;;  %v1159_v24 = vmul.f32 %v2962_v48, %v1158_v63 }
 0x252   : > { %v2966_v60 = vpop.eup %2965 }
 0x253   : > { %v1147_v61 = vmul.f32 0.6931472, %v2966_v60 }
 0x255   : > { %v1153_v3 = vsel %vm1152_vm10, %v1150_v62, %v1147_v61 }
 0x256   : > { %v2968_v4 = vpop.eup %2967  ;;  %v1163_v6 = vsel %vm1137_vm11, %v3524_v14, %v1153_v3 }
 0x257   : > { %v1177_v7 = vmax.f32 %v1163_v6, 1e-24  ;;  %v1189_v8 = vsub.f32 0.0, %v1163_v6  ;;  %v1156_v9 = vmul.f32 0.6931472, %v2968_v4  ;;  %v2970_v10 = vpop.eup %2969 }
 0x258   : > { %v2972_v19 = vpop.eup %2971 }
 0x259   : > { %2973 = vlog2.f32 %v1177_v7  ;;  %v1162_v13 = vsel %vm1161_vm13, %v1159_v24, %v1156_v9  ;;  %v1191_v15 = vmul.f32 %v2970_v10, %v1189_v8 }
 0x25a   : > { %v1164_v14 = vsel %vm1138_vm15, %v3536_v23, %v1162_v13 }
 0x25b   : > { %v1178_v16 = vmax.f32 %v1164_v14, 1e-24  ;;  %v1190_v18 = vsub.f32 0.0, %v1164_v14  ;;  %2690 = vmatpush3.msra.mxu1 %v1191_v15  ;;  %v934_v14 = vadd.f32 %v3522_v12, %v3528_v17 }
 0x25c   : > { %2692 = vmatmul.mubr.msk.f32.vlgmr.msra.gmra.mxu1 %vm1236_vm14, %v3558_v11  ;;  %2694 = vmatprep.subr.mxu1 %v3207_v2 }
 0x25d   : > { %2975 = vlog2.f32 %v1178_v16  ;;  %2696 = vmatprep.mubr.msk.f32.mxu1 %vm3208_vm1, %v3207_v2  ;;  %v3567_v26 = vmul.f32 %v2972_v19, %v1190_v18 }
 0x266   : > { %v2974_v20 = vpop.eup %2973 }
 0x267   : > { %v1180_v21 = vmul.f32 0.6931472, %v2974_v20 }
 0x269   : > { %v1183_v36 = vmul.f32 %v2970_v10, %v1180_v21 }
 0x26a   : > { %v2976_v27 = vpop.eup %2975 }
 0x26b   : > { %v1182_v23 = vmul.f32 0.6931472, %v2976_v27  ;;  %v1185_v52 = vmul.f32 1.442695, %v1183_v36 }
 0x26d   : > { %v3569_v30 = vmul.f32 %v2972_v19, %v1182_v23 }
 0x2bf   : > { %v1196_v35 = vpop.xlane.xlu0 %1195 }
 0x2c0   : > { %2977 = vrsqrt.f32 %v1196_v35  ;;  %vm1201_vm0 = vcmp.eq.f32.partialorder %v1196_v35, inf  ;;  %v1204_v46 = vand.u32 2147483648, %v1196_v35  ;;  %vm1203_vm2 = vcmp.eq.f32.partialorder %v1196_v35, 0.0 }
 0x2cd   : > { %v2978_v39 = vpop.eup %2977 }
 0x2ce   : > { %v1200_v43 = vmul.f32 %v2978_v39, %v1196_v35  ;;  %v1229_v39 = vld [vmem:[#allocation2] sm:$0xff] }
 0x2d0   : > { %v1202_v45 = vsel %vm1201_vm0, %v1196_v35, %v1200_v43  ;;  %v1235_v35 = vld [vmem:[#allocation2 + $0x38] sm:$0xff] }
 0x2d1   : > { %v1205_v47 = vsel %vm1203_vm2, %v1204_v46, %v1202_v45 }
 0x2d2   : > { %v1213_v48 = vmax.f32 %v1205_v47, 1e-12 }
 0x305   : > { %v1116_v33 = vpop.f32.mrf.mxu1 }
 0x306   : > { %v1117_v37 = vadd.f32 %v2542_v31, %v1116_v33  ;;  %v1232_v33 = vld [vmem:[#allocation2 + $0x8] sm:$0xff] }
 0x307   : > { %v2687_v38 = vpop.f32.mrf.mxu1 }
 0x308   : > { %v2545_v40 = vmul.f32 -1.442695, %v1117_v37  ;;  %v1231_v37 = vld [vmem:[#allocation2 + $0x10] sm:$0xff]  ;;  %v1230_v38 = vld [vmem:[#allocation2 + $0x18] sm:$0xff] }
 0x309   : > { %v1119_v41 = vpop.f32.mrf.mxu1 }
 0x30a   : > { %2979 = vpow2.f32 %v2545_v40  ;;  %v3574_v42 = vadd.f32 %v2542_v31, %v1119_v41  ;;  %v1234_v31 = vld [vmem:[#allocation2 + $0x28] sm:$0xff]  ;;  %v1228_v40 = vld [vmem:[#allocation2 + $0x30] sm:$0xff]  ;;  %v1198_v41 = vpop.xlane.xlu1 %1197 }
 0x30b   : > { %v2688_v44 = vpop.f32.mrf.mxu1  ;;  %2981 = vrcp.f32 %v1213_v48  ;;  %vm1208_vm4 = vcmp.eq.f32.partialorder %v1198_v41, inf  ;;  %vm1210_vm5 = vcmp.eq.f32.partialorder %v1198_v41, 0.0 }
 0x317   : > { %v2980_v49 = vpop.eup %2979 }
 0x318   : > { %v1129_v50 = vadd.f32 1.0, %v2980_v49  ;;  %v2982_v0 = vpop.eup %2981 }
 0x319   : > { %v1216_v6 = vmul.f32 %v2982_v0, %v3531_v28 }
 0x31a   : > { %2983 = vrcp.f32 %v1129_v50 }
 0x31b   : > { %2985 = vpow2.f32 %v1185_v52 }
 0x31c   : > { %v1306_v53 = vpop.f32.mrf.mxu1 }
 0x31d   : > { %v1310_v54 = vmul.f32 1.442695, %v1306_v53  ;;  %v1314_v55 = vsub.f32 0.0, %v1306_v53  ;;  %v1535_v58 = vrot.slane %v1306_v53, %v3577_v51 }
 0x31e   : > { %v2693_v60 = vpop.f32.mrf.mxu1 }
 0x31f   : > { %2987 = vpow2.f32 %v1310_v54  ;;  %v1315_v61 = vmul.f32 1.442695, %v1314_v55  ;;  %v1536_v62 = vsub.f32 %v1535_v58, %v1306_v53  ;;  %v2546_v58 = vmul.f32 -1.442695, %v3574_v42 }
 0x321   : > { %2989 = vpow2.f32 %v1315_v61  ;;  %v1537_v63 = vmul.f32 1.442695, %v1536_v62 }
 0x323   : > { %2991 = vpow2.f32 %v1537_v63 }
 0x324   : > { %2993 = vrsqrt.f32 %v1198_v41 }
 0x325   : > { %2995 = vpow2.f32 %v2546_v58 }
 0x327   : > { %v2984_v3 = vpop.eup %2983 }
 0x328   : > { %v1135_v4 = vmul.f32 %v2984_v3, %v3454_v29  ;;  %v2986_v7 = vpop.eup %2985  ;;  %v1211_v3 = vand.u32 2147483648, %v1198_v41 }
 0x329   : > { %v1219_v9 = vmul.f32 %v2986_v7, %v1216_v6 }
 0x32a   : > { %1552 = vxpose.xlu0.b32.start.end [1/1] (short) (narrow) %v1135_v4, 64 }
 0x32c   : > { %v3582_v8 = vpop.eup %2987 }
 0x32d   : > { %v1312_v10 = vmul.f32 0.25, %v3582_v8  ;;  %v1543_v43 = vrot.slane %v3582_v8, %v3577_v51 }
 0x32e   : > { %v2990_v24 = vpop.eup %2989 }
 0x32f   : > { %v1317_v13 = vmul.f32 %v2990_v24, %v1219_v9  ;;  %v1313_v18 = vmul.f32 %v1312_v10, %v934_v14  ;;  %v1545_v44 = vmul.f32 %v1543_v43, %v1229_v39  ;;  %v1544_v47 = vmul.f32 %v1543_v43, %v1228_v40 }
 0x330   : > { %v2992_v15 = vpop.eup %2991  ;;  %v1547_v50 = vmul.f32 %v1543_v43, %v1231_v37  ;;  %v1546_v55 = vmul.f32 %v1543_v43, %v1230_v38  ;;  %v1548_v7 = vmul.f32 %v1543_v43, %v1232_v33  ;;  %v1551_v42 = vmul.f32 %v1543_v43, %v1235_v35 }
 0x331   : > { %2695 = vmatpush3.xpose.msra.mxu1 %v1317_v13  ;;  %v1539_v16 = vmul.f32 %v2992_v15, %v1219_v9  ;;  %v2994_v52 = vpop.eup %2993  ;;  %v1550_v14 = vmul.f32 %v1543_v43, %v1234_v31 }
 0x332   : > { %2699 = vmatprep.subr.mxu1 %v3207_v2  ;;  %v1207_v61 = vmul.f32 %v2994_v52, %v1198_v41 }
 0x333   : > { %2723 = vmatprep.subr.mxu0 %v1539_v16 }
 0x334   : > { %2697 = vmatmul.mubr.f32.vlgmr.msra.gmra.mxu1 %v1313_v18  ;;  %2724 = vmatpush3.msra.mxu0 %v1539_v16  ;;  %v1209_v63 = vsel %vm1208_vm4, %v1198_v41, %v1207_v61  ;;  %v1187_v16 = vmul.f32 1.442695, %v3569_v30 }
 0x335   : > { %2700 = vmatpush3.msra.mxu1 %v1135_v4  ;;  %2737 = vmatprep.subr.mxu0 %v3207_v2  ;;  %v1212_v8 = vsel %vm1210_vm5, %v1211_v3, %v1209_v63 }
 0x336   : > { %2701 = vmatprep.mubr.msk.f32.mxu1 %vm3208_vm1, %v3207_v2  ;;  %2704 = vmatprep.subr.mxu1 %v3207_v2  ;;  %v1214_v10 = vmax.f32 %v1212_v8, 1e-12 }
 0x338   : > { %2997 = vrcp.f32 %v1214_v10 }
 0x339   : > { %2999 = vpow2.f32 %v1187_v16 }
 0x3a6   : > { %v1568_v29 = vpop.trf.xlu0 }
 0x3a7   : > { %2725 = vmatprep.mubr.msk.f32.mxu0 %vm1236_vm14, %v1568_v29  ;;  %v2996_v29 = vpop.eup %2995 }
 0x3a8   : > { %v2998_v30 = vpop.eup %2997 }
 0x3aa   : > { %v1569_v12 = vpop.trf.xlu0 }
 0x3ab   : > { %2726 = vmatmul.mubr.msk.f32.vlgmr.msra.gmra.mxu0 %vm1236_vm14, %v1569_v12 }
 0x3ac   : > { %2738 = vmatpush3.msra.mxu0 %v3567_v26 }
 0x3ad   : > { %2742 = vmatprep.subr.mxu0 %v3207_v2 }
 0x3ae   : > { %v1570_v17 = vpop.trf.xlu0 }
 0x3af   : > { %2728 = vmatprep.mubr.msk.f32.mxu0 %vm1236_vm14, %v1570_v17 }
 0x3b2   : > { %v1571_v28 = vpop.trf.xlu0 }
 0x3b3   : > { %2729 = vmatmul.mubr.msk.f32.gmra.mxu0 %vm1236_vm14, %v1571_v28 }
 0x3b6   : > { %v1572_v19 = vpop.trf.xlu0 }
 0x3b7   : > { %2731 = vmatprep.mubr.msk.f32.mxu0 %vm1236_vm14, %v1572_v19 }
 0x3ba   : > { %v1573_v20 = vpop.trf.xlu0 }
 0x3bb   : > { %2732 = vmatmul.mubr.msk.f32.gmra.mxu0 %vm1236_vm14, %v1573_v20 }
 0x3be   : > { %v1574_v21 = vpop.trf.xlu0 }
 0x3bf   : > { %2734 = vmatprep.mubr.msk.f32.mxu0 %vm1236_vm14, %v1574_v21  ;;  %v1130_v21 = vadd.f32 1.0, %v2996_v29 }
 0x3c2   : > { %v1575_v36 = vpop.trf.xlu0 }
 0x3c3   : > { %2735 = vmatmul.mubr.msk.f32.gmra.mxu0 %vm1236_vm14, %v1575_v36 }
 0x3c4   : > { %2739 = vmatprep.mubr.msk.f32.mxu0 %vm3208_vm1, %v3207_v2 }
 0x3c7   : > { %2740 = vmatmul.mubr.msk.f32.vlgmr.msra.gmra.mxu0 %vm1236_vm14, %v3558_v11  ;;  %v1233_v11 = vld [vmem:[#allocation2 + $0x20] sm:$0xff] }
 0x3c8   : > { %2744 = vmatprep.mubr.msk.f32.mxu0 %vm3208_vm1, %v3207_v2  ;;  %v1549_v0 = vmul.f32 %v1543_v43, %v1233_v11 }
 0x3f4   : > { %v1384_v26 = vpop.f32.mrf.mxu1 }
 0x3f5   : > { %v1388_v27 = vsel %vm1225_vm12, %v1384_v26, 0.0 }
 0x3f6   : > { %v2698_v23 = vpop.f32.mrf.mxu1  ;;  %2702 = vmatmul.mubr.msk.f32.vlgmr.msra.gmra.mxu1 %vm1236_vm14, %v1388_v27 }
 0x3f7   : > { %2705 = vmatpush3.xpose.msra.mxu1 %v1235_v35  ;;  %2720 = vmatprep.mubr.msk.f32.mxu1 %vm3208_vm1, %v3207_v2  ;;  %v1218_v35 = vmul.f32 %v2998_v30, %v3541_v32  ;;  %v2571_v32 = vmul.f32 -1.442695, %v3505_v1 }
 0x3f8   : > { %2706 = vmatprep.subr.mxu1 %v3207_v2 }
 0x3fb   : > { %2707 = vmatpush3.xpose.msra.mxu1 %v1234_v31  ;;  %v3000_v31 = vpop.eup %2999 }
 0x3fc   : > { %2708 = vmatprep.subr.mxu1 %v3207_v2 }
 0x3ff   : > { %2709 = vmatpush3.xpose.msra.mxu1 %v1233_v11 }
 0x400   : > { %2710 = vmatprep.subr.mxu1 %v3207_v2 }
 0x403   : > { %2711 = vmatpush3.xpose.msra.mxu1 %v1232_v33  ;;  %v1220_v33 = vmul.f32 %v3000_v31, %v1218_v35  ;;  %v2943_v35 = vld [vmem:[%s3803_s12 + $0x8] sm:$0xff]  }
 0x404   : > { %2712 = vmatprep.subr.mxu1 %v3207_v2 }
 0x407   : > { %2713 = vmatpush3.xpose.msra.mxu1 %v1231_v37 }
 0x408   : > { %2714 = vmatprep.subr.mxu1 %v3207_v2 }
 0x40b   : > { %2715 = vmatpush3.xpose.msra.mxu1 %v1230_v38 }
 0x40c   : > { %2716 = vmatprep.subr.mxu1 %v3207_v2 }
 0x40f   : > { %2717 = vmatpush3.xpose.msra.mxu1 %v1229_v39 }
 0x410   : > { %2718 = vmatprep.subr.mxu1 %v3207_v2 }
 0x413   : > { %2719 = vmatpush3.xpose.msra.mxu1 %v1228_v40 }
 0x416   : > { %2721 = vmatmul.mubr.f32.vlgmr.msra.gmra.mxu1 %v1313_v18 }
 0x46b   : > { %v2727_v45 = vpop.f32.mrf.mxu0 }
 0x46c   : > { %v3623_v46 = vadd.f32 %v2727_v45, %v1545_v44 }
 0x46d   : > { %v1674_v48 = vpop.f32.mrf.mxu0 }
 0x46e   : > { %v3625_v49 = vadd.f32 %v1674_v48, %v1544_v47 }
 0x473   : > { %v2730_v53 = vpop.f32.mrf.mxu0 }
 0x474   : > { %v3627_v54 = vadd.f32 %v2730_v53, %v1547_v50 }
 0x475   : > { %v1684_v60 = vpop.f32.mrf.mxu0 }
 0x476   : > { %v3630_v62 = vadd.f32 %v1684_v60, %v1546_v55 }
 0x47b   : > { %v2733_v4 = vpop.f32.mrf.mxu0 }
 0x47c   : > { %v3632_v6 = vadd.f32 %v2733_v4, %v1549_v0 }
 0x47d   : > { %v1694_v9 = vpop.f32.mrf.mxu0 }
 0x47e   : > { %v3634_v24 = vadd.f32 %v1694_v9, %v1548_v7 }
 0x483   : > { %v2736_v13 = vpop.f32.mrf.mxu0 }
 0x484   : > { %v3636_v15 = vadd.f32 %v2736_v13, %v1551_v42 }
 0x485   : > { %v1704_v18 = vpop.f32.mrf.mxu0 }
 0x486   : > { %v3639_v12 = vadd.f32 %v1704_v18, %v1550_v14 }
 0x487   : > { %v1787_v17 = vpop.f32.mrf.mxu0 }
 0x488   : > { %v1791_v28 = vmul.f32 1.442695, %v1787_v17  ;;  %v1795_v19 = vsub.f32 0.0, %v1787_v17  ;;  %v2016_v20 = vrot.slane %v1787_v17, %v3577_v51 }
 0x489   : > { %v2741_v36 = vpop.f32.mrf.mxu0 }
 0x48a   : > { %3001 = vpow2.f32 %v1791_v28  ;;  %v1796_v26 = vmul.f32 1.442695, %v1795_v19  ;;  %v2017_v27 = vsub.f32 %v2016_v20, %v1787_v17 }
 0x48c   : > { %3003 = vpow2.f32 %v1796_v26  ;;  %v2018_v23 = vmul.f32 1.442695, %v2017_v27  ;;  %v2941_v26 = vld [vmem:[%s3803_s12 + $0x18] sm:$0xff]  }
 0x48d   : > { %3005 = vrcp.f32 %v1130_v21 }
 0x48e   : > { %3007 = vpow2.f32 %v2018_v23  ;;  %v2942_v23 = vld [vmem:[%s3803_s12 + $0x10] sm:$0xff]  }
 0x48f   : > { %3009 = vpow2.f32 %v2571_v32 }
 0x497   : > { %v3643_v11 = vpop.eup %3001 }
 0x498   : > { %v1793_v38 = vmul.f32 0.25, %v3643_v11 }
 0x499   : > { %v3004_v37 = vpop.eup %3003 }
 0x49a   : > { %v3006_v39 = vpop.eup %3005  ;;  %v1798_v40 = vmul.f32 %v3004_v37, %v1220_v33  ;;  %v1794_v44 = vmul.f32 %v1793_v38, %v3534_v22 }
 0x49b   : > { %v3008_v41 = vpop.eup %3007  ;;  %v1136_v45 = vmul.f32 %v3006_v39, %v3462_v34 }
 0x49c   : > { %2743 = vmatpush3.xpose.msra.mxu0 %v1798_v40  ;;  %v2020_v43 = vmul.f32 %v3008_v41, %v1220_v33  ;;  %v3010_v48 = vpop.eup %3009  ;;  %v2944_v33 = vld [vmem:[%s3803_s12] sm:$0xff]  }
 0x49d   : > { %2747 = vmatprep.subr.mxu0 %v3207_v2  ;;  %v2239_v50 = vadd.f32 1.0, %v3010_v48 }
 0x49e   : > { %2771 = vmatprep.subr.mxu1 %v2020_v43 }
 0x49f   : > { %2745 = vmatmul.mubr.f32.vlgmr.msra.gmra.mxu0 %v1794_v44  ;;  %2772 = vmatpush3.msra.mxu1 %v2020_v43  ;;  %3011 = vrcp.f32 %v2239_v50  ;;  %v2024_v50 = vrot.slane %v3643_v11, %v3577_v51 }
 0x4a0   : > { %2748 = vmatpush3.msra.mxu0 %v1136_v45  ;;  %2749 = vmatprep.mubr.msk.f32.mxu0 %vm3208_vm1, %v3207_v2  ;;  %3013 = vpow2.f32 %v2572_v25 }
 0x4a1   : > { %2752 = vmatprep.subr.mxu0 %v3207_v2  ;;  %2785 = vmatprep.subr.bf16.mxu1 %v3207_v2 }
 0x4ac   : > { %v3012_v52 = vpop.eup %3011 }
 0x4ad   : > { %v2245_v58 = vmul.f32 %v3012_v52, %v3505_v1  ;;  %v3014_v59 = vpop.eup %3013  ;;  %v2026_v52 = vmul.f32 %v2024_v50, %v3623_v46 }
 0x4ae   : > { %v2240_v8 = vadd.f32 1.0, %v3014_v59 }
 0x4b0   : > { %3015 = vrcp.f32 %v2240_v8 }
 0x4b6   : > { %v1458_v47 = vpop.f32.mrf.mxu1 }
 0x4b8   : > { %v2703_v22 = vpop.f32.mrf.mxu1 }
 0x4bd   : > { %v3016_v9 = vpop.eup %3015 }
 0x4be   : > { %v2246_v14 = vmul.f32 %v3016_v9, %v3509_v5 }
 0x4d6   : > { %v1528_v34 = vpop.f32.mrf.mxu1 }
 0x4d7   : > { %v1529_v53 = vadd.f32 %v1528_v34, %v1458_v47 }
 0x4d8   : > { %v2722_v55 = vpop.f32.mrf.mxu1 }
 0x4d9   : > { %v2231_v60 = vadd.f32 %v3480_v56, %v1529_v53  ;;  %v2025_v55 = vmul.f32 %v2024_v50, %v3625_v49 }
 0x4db   : > { %v3656_v61 = vmul.f32 %v2245_v58, %v2231_v60 }
 0x4dd   : > { %v2249_v63 = vmul.f32 %v3656_v61, %v3656_v61 }
 0x4df   : > { %v2251_v0 = vsel %vm650_vm3, %v2249_v63, 0.0 }
 0x4e0   : > { %2252 = vadd.xlane.f32.xlu1 %v2251_v0  ;;  %v2027_v0 = vmul.f32 %v2024_v50, %v3630_v62 }
 0x55f   : > { %v1865_v3 = vpop.f32.mrf.mxu0 }
 0x560   : > { %v1869_v4 = vsel %vm1225_vm12, %v1865_v3, 0.0 }
 0x561   : > { %v2746_v7 = vpop.f32.mrf.mxu0  ;;  %2750 = vmatmul.mubr.msk.f32.vlgmr.msra.gmra.mxu0 %vm1236_vm14, %v1869_v4  ;;  %v2029_v4 = vmul.f32 %v2024_v50, %v3634_v24 }
 0x562   : > { %2753 = vmatpush3.xpose.msra.mxu0 %v3636_v15  ;;  %2768 = vmatprep.mubr.msk.f32.mxu0 %vm3208_vm1, %v3207_v2 }
 0x563   : > { %2754 = vmatprep.subr.mxu0 %v3207_v2 }
 0x566   : > { %2755 = vmatpush3.xpose.msra.mxu0 %v3639_v12 }
 0x567   : > { %2756 = vmatprep.subr.mxu0 %v3207_v2 }
 0x569   : > { %v2253_v28 = vpop.xlane.xlu1 %2252 }
 0x56a   : > { %2757 = vmatpush3.xpose.msra.mxu0 %v3632_v6  ;;  %v2258_v36 = vmul.f32 0.015625, %v2253_v28 }
 0x56b   : > { %2758 = vmatprep.subr.mxu0 %v3207_v2 }
 0x56e   : > { %2759 = vmatpush3.xpose.msra.mxu0 %v3634_v24 }
 0x56f   : > { %2760 = vmatprep.subr.mxu0 %v3207_v2 }
 0x572   : > { %2761 = vmatpush3.xpose.msra.mxu0 %v3627_v54 }
 0x573   : > { %2762 = vmatprep.subr.mxu0 %v3207_v2 }
 0x576   : > { %2763 = vmatpush3.xpose.msra.mxu0 %v3630_v62 }
 0x577   : > { %2764 = vmatprep.subr.mxu0 %v3207_v2 }
 0x57a   : > { %2765 = vmatpush3.xpose.msra.mxu0 %v3623_v46  ;;  %v2030_v46 = vmul.f32 %v2024_v50, %v3632_v6 }
 0x57b   : > { %2766 = vmatprep.subr.mxu0 %v3207_v2 }
 0x57e   : > { %2767 = vmatpush3.xpose.msra.mxu0 %v3625_v49 }
 0x581   : > { %2769 = vmatmul.mubr.f32.vlgmr.msra.gmra.mxu0 %v1794_v44 }
 0x621   : > { %v1939_v56 = vpop.f32.mrf.mxu0 }
 0x623   : > { %v2751_v1 = vpop.f32.mrf.mxu0 }
 0x624   : > { %v2031_v1 = vmul.f32 %v2024_v50, %v3639_v12 }
 0x641   : > { %v2009_v10 = vpop.f32.mrf.mxu0 }
 0x642   : > { %v2010_v42 = vadd.f32 %v2009_v10, %v1939_v56 }
 0x643   : > { %v2770_v13 = vpop.f32.mrf.mxu0 }
 0x644   : > { %v2232_v16 = vadd.f32 %v3482_v57, %v2010_v42  ;;  %v2260_v57 = vadd.f32 1e-05, %v2258_v36 }
 0x646   : > { %v2248_v18 = vmul.f32 %v2246_v14, %v2232_v16 }
 0x648   : > { %v2250_v29 = vmul.f32 %v2248_v18, %v2248_v18 }
 0x64a   : > { %v2254_v17 = vsel %vm650_vm3, %v2250_v29, 0.0 }
 0x64b   : > { %2255 = vadd.xlane.f32.xlu1 %v2254_v17 }
 0x67e   : > { %2033 = vxpose.xlu1.b32.start.end [1/1] (short) (narrow) %v1136_v45, 64  ;;  %v2573_v45 = vld [vmem:[%s3802_s11] ss:$0 sm:$0xff] }
 0x6d4   : > { %v2256_v19 = vpop.xlane.xlu1 %2255 }
 0x6d5   : > { %v2259_v20 = vmul.f32 0.015625, %v2256_v19 }
 0x6d7   : > { %v2261_v5 = vadd.f32 1e-05, %v2259_v20 }
 0x6d9   : > { %3017 = vrsqrt.f32 %v2261_v5 }
 0x6da   : > { %3019 = vrsqrt.f32 %v2260_v57 }
 0x6e6   : > { %v3018_v38 = vpop.eup %3017 }
 0x6e7   : > { %v3020_v40 = vpop.eup %3019  ;;  %v2265_v41 = vmul.f32 %v3018_v38, %v2248_v18 }
 0x6e8   : > { %v2264_v44 = vmul.f32 %v3020_v40, %v3656_v61  ;;  %v2028_v61 = vmul.f32 %v2024_v50, %v3627_v54  ;;  %v2032_v54 = vmul.f32 %v2024_v50, %v3636_v15 }
 0x6e9   : > { %v2274_v32 = vmul.f32 %v2573_v45, %v2265_v41 }
 0x6ea   : > { %v2273_v22 = vmul.f32 %v2573_v45, %v2264_v44 }
 0x6ec   : > { %v2275_v48 = vpack.c.bf16 %v2274_v32, %v2273_v22 }
 0x6fa   : > { %v2049_v21 = vpop.trf.xlu1 }
 0x6fb   : > { %2773 = vmatprep.mubr.msk.f32.mxu1 %vm1236_vm14, %v2049_v21 }
 0x6fe   : > { %v2050_v27 = vpop.trf.xlu1 }
 0x6ff   : > { %2774 = vmatmul.mubr.msk.f32.vlgmr.msra.gmra.mxu1 %vm1236_vm14, %v2050_v27 }
 0x700   : > { %2786 = vmatpush3.bf16.msra.mxu1 %v2941_v26 }
 0x701   : > { %2787 = vmatprep.subr.bf16.mxu1 %v3207_v2 }
 0x702   : > { %v2051_v30 = vpop.trf.xlu1 }
 0x703   : > { %2776 = vmatprep.mubr.msk.f32.mxu1 %vm1236_vm14, %v2051_v30 }
 0x704   : > { %2788 = vmatpush3.bf16.msra.mxu1 %v2942_v23 }
 0x705   : > { %2789 = vmatprep.subr.bf16.mxu1 %v3207_v2 }
 0x706   : > { %v2052_v31 = vpop.trf.xlu1 }
 0x707   : > { %2777 = vmatmul.mubr.msk.f32.gmra.mxu1 %vm1236_vm14, %v2052_v31 }
 0x708   : > { %2790 = vmatpush3.bf16.msra.mxu1 %v2943_v35 }
 0x709   : > { %2791 = vmatprep.subr.bf16.mxu1 %v3207_v2 }
 0x70a   : > { %v2053_v37 = vpop.trf.xlu1 }
 0x70b   : > { %2779 = vmatprep.mubr.msk.f32.mxu1 %vm1236_vm14, %v2053_v37 }
 0x70c   : > { %2792 = vmatpush3.bf16.msra.mxu1 %v2944_v33 }
 0x70e   : > { %v2054_v39 = vpop.trf.xlu1 }
 0x70f   : > { %2780 = vmatmul.mubr.msk.f32.gmra.mxu1 %vm1236_vm14, %v2054_v39 }
 0x712   : > { %v2055_v43 = vpop.trf.xlu1 }
 0x713   : > { %2782 = vmatprep.mubr.msk.f32.mxu1 %vm1236_vm14, %v2055_v43 }
 0x716   : > { %v2056_v47 = vpop.trf.xlu1 }
 0x717   : > { %2783 = vmatmul.mubr.msk.f32.gmra.mxu1 %vm1236_vm14, %v2056_v47 }
 0x718   : > { %2793 = vmatprep.mubr.msk.bf16.mxu1 %vm3208_vm1, %v3207_v2  ;;  %vm2360_vm1 = vcmask 257024  }
 0x71b   : > { %2794 = vmatmul.mubr.msk.bf16.vlgmr.msra.gmra.mxu1 %vm650_vm3, %v2275_v48 }
 0x7bf   : > { %v2775_v34 = vpop.f32.mrf.mxu1 }
 0x7c0   : > { %v2195_v53 = vadd.f32 %v2775_v34, %v2026_v52 }
 0x7c1   : > { %v2155_v58 = vpop.f32.mrf.mxu1 }
 0x7c2   : > { %2203 = vst [vmem:[#allocation2] sm:$0xff] %v2195_v53  ;;  %v2194_v60 = vadd.f32 %v2155_v58, %v2025_v55 }
 0x7c4   : > { %2202 = vst [vmem:[#allocation2 + $0x30] sm:$0xff] %v2194_v60 }
 0x7c7   : > { %v2778_v63 = vpop.f32.mrf.mxu1 }
 0x7c8   : > { %v2197_v2 = vadd.f32 %v2778_v63, %v2028_v61 }
 0x7c9   : > { %v2165_v3 = vpop.f32.mrf.mxu1 }
 0x7ca   : > { %2205 = vst [vmem:[#allocation2 + $0x10] sm:$0xff] %v2197_v2  ;;  %v2196_v51 = vadd.f32 %v2165_v3, %v2027_v0 }
 0x7cc   : > { %2204 = vst [vmem:[#allocation2 + $0x18] sm:$0xff] %v2196_v51 }
 0x7cf   : > { %v2781_v11 = vpop.f32.mrf.mxu1 }
 0x7d0   : > { %v2199_v49 = vadd.f32 %v2781_v11, %v2030_v46 }
 0x7d1   : > { %v2175_v7 = vpop.f32.mrf.mxu1 }
 0x7d2   : > { %2207 = vst [vmem:[#allocation2 + $0x20] sm:$0xff] %v2199_v49  ;;  %v2198_v25 = vadd.f32 %v2175_v7, %v2029_v4 }
 0x7d4   : > { %2206 = vst [vmem:[#allocation2 + $0x8] sm:$0xff] %v2198_v25 }
 0x7d7   : > { %v2784_v62 = vpop.f32.mrf.mxu1 }
 0x7d8   : > { %v2201_v56 = vadd.f32 %v2784_v62, %v2032_v54 }
 0x7d9   : > { %v2185_v59 = vpop.f32.mrf.mxu1 }
 0x7da   : > { %2209 = vst [vmem:[#allocation2 + $0x38] sm:$0xff] %v2201_v56  ;;  %v2200_v6 = vadd.f32 %v2185_v59, %v2031_v1 }
 0x7db   : > { %v2345_v24 = vpop.f32.mrf.mxu1 }
 0x7dc   : > { %2208 = vst [vmem:[#allocation2 + $0x28] sm:$0xff] %v2200_v6  ;;  %v2587_v8 = vpack.c.bf16 %v2345_v24, %v2345_v24 }
 0x7dd   : > { %v2795_v15 = vpop.f32.mrf.mxu1 }
 0x7de   : > { %2361 = vst.msk [vmem:[%s3419_s27] sm:$0xf] %vm2360_vm1, %v2587_v8 }
 0x7df   : > { %v2348_v9 = vpop.f32.mrf.mxu1 }
 0x7e0   : > { %v2588_v12 = vpack.c.bf16 %v2348_v9, %v2348_v9 }
 0x7e1   : > { %v2796_v10 = vpop.f32.mrf.mxu1 }
 0x7e2   : > { %2362 = vst.msk [vmem:[%s3419_s27 + $0x4] sm:$0xf] %vm2360_vm1, %v2588_v12 }
 0x7e3   : > { %3112 = shalt.err (!%p3109_p13)
}
 0x7e4   : > { %s3113_s25 = scalar_lea.hbm %s3733_s17, 128  ;;  %s3117_s19 = scalar_lea.hbm %s3836_s23, 512 }
 0x7e5   : > { %p3114_p2 = scmp.ne.s32.totalorder %s3733_s17, %s3113_s25  ;;  %p3118_p3 = scmp.lt.s32.totalorder %s3733_s17, %s3836_s23 }
 0x7e6   : > { %p3119_p8 = scmp.lt.s32.totalorder %s3117_s19, %s3113_s25 }
 0x7e7   : > { %p3115_p4 = pnand %p3114_p2, %p3837_p0 }
 0x7e8   : > { %p3120_p10 = por %p3119_p8, %p3118_p3 }
 0x7e9   : > { %p3116_p5 = pneg %p3115_p4 }
 0x7eb   : > { %p3121_p12 = pnand %p3120_p10, %p3116_p5 }
 0x7ed   : > { %3124 = shalt.err (!%p3121_p12)
}
 0x7ee   : > { %s3211_s29 = smov 64   ;;  %s3212_s28 = smov 4  }
 0x7ef   : > { %2809 = dma.vmem_to_hbm [thread:$0]  (%p3837_p0), %s3735_s24, 128, %s3733_s17, %s3740_s18, %s3211_s29, %s3211_s29, %s3212_s28  }
 0x7f0 PF: > { %s3838_s16 = sld [smem:[#allocation18_spill]] }
 0x7f1   : > { %s3839_s20 = sld [smem:[#allocation14_spill]] }
 0x7f2   : > { %s3840_s21 = sld [smem:[#allocation21_spill]] }
 0x7f6   : > { %p2831_p1 = scmp.ge.s32.totalorder %s3838_s16, 2 }
 0x7f7   : > { %s2394_s30 = sand.u32 1, %s3839_s20  }
 0x7f8   : > { %p3841_p6 = scmp.ne.s32.totalorder %s3840_s21, 0  ;;  %s2395_s25 = scalar_lea.sflag [#allocation6], %s2394_s30 }
 0x7fa   : > { %p2822_p7 = pnand %p2831_p1, %p3841_p6 }
 0x7fc   : > { %p2823_p9 = pneg %p2822_p7 }
 0x7fe   : > { %3166 = dma.done.wait (%p2823_p9), %s2395_s25, 128  }
 0x7ff   : > { %3168 = vsyncadd (%p2823_p9), %s2395_s25, 4294967168  ;;  %s28_s15 = sadd.s32 1, %s3838_s16   ;;  %s3842_s27 = sld [smem:[#allocation15_spill]] }
 0x800   : > { %p25_p11 = scmp.ge.s32.totalorder %s28_s15, 6   ;;  %s3843_s13 = sld [smem:[#allocation22_spill]] }
 0x801   : > { %s3844_s28 = sld [smem:[#allocation16_spill]]  ;;  %s3848_s25 = smov %s3175_s26 }
 0x802   : > { %s3845_s29 = sld [smem:[#allocation17_spill]]  ;;  %27 = sbr.rel (!%p25_p11) target bundleno = 9 (0x9), region = 124 }
 0x803   : > { %s3846_s30 = sld [smem:[#allocation19_spill]] }
 0x804   : > { %s3847_s14 = sld [smem:[#allocation20_spill]] }
 0x805   : > { %s3849_s26 = smov %s3842_s27 }
 0x806   : > { %s3850_s27 = smov %s3843_s13 }
 0x807   :  { %2400 = vsyncpa [#allocation5], 1 }
 0x808   :  { %2402 = vsyncpa [#allocation5 + $0x1], 1 }
 0x809   :  { %2403 = vsyncpa [#allocation8], 1 }
 0x80a   :  { %2404 = vsyncpa [#allocation6], 1 }
 0x80b   :  { %2406 = vsyncpa [#allocation6 + $0x1], 1 }

// kernel: tpu_custom_call.1
= control target key start
LH: loop header
LB: loop body
LE: loop exit
PB: predicated region body
PF: predicated region fallthrough
CT: control target
= control target key end

     0   :  { %s3791_s0 = inlined_call_operand.vmem [shape: bf16[2,32,32], index: 0, kind: input, shape index: {}]   ;;  %s3792_s1 = inlined_call_operand.vmem [shape: bf16[32,64], index: 1, kind: input, shape index: {}]   ;;  %s3793_s2 = inlined_call_operand.vmem [shape: bf16[32,64], index: 2, kind: input, shape index: {}]   ;;  %s3794_s3 = inlined_call_operand.vmem [shape: f32[4,64], index: 3, kind: input, shape index: {}]   ;;  %s3795_s4 = inlined_call_operand.hbm [shape: f32[1,64], index: 4, kind: input, shape index: {}]   ;;  %s3796_s5 = inlined_call_operand.hbm [shape: bf16[64,512], index: 5, kind: input, shape index: {}]   ;;  %s3797_s6 = inlined_call_operand.hbm [shape: f32[1,512], index: 6, kind: input, shape index: {}]   ;;  %s3798_s7 = inlined_call_operand.vmem [shape: bf16[64,16], index: 7, kind: input, shape index: {}]   ;;  %s3799_s8 = inlined_call_operand.vmem [shape: bf16[16,64], index: 8, kind: input, shape index: {}]   ;;  %s3800_s9 = inlined_call_operand.vmem [shape: f32[1,64], index: 9, kind: input, shape index: {}]   ;;  %s3801_s10 = inlined_call_operand.vmem [shape: f32[1,64], index: 10, kind: input, shape index: {}]   ;;  %s3802_s11 = inlined_call_operand.vmem [shape: f32[1,64], index: 11, kind: input, shape index: {}]   ;;  %s3803_s12 = inlined_call_operand.vmem [shape: bf16[64,32], index: 12, kind: input, shape index: {}]   ;;  %s3804_s13 = inlined_call_operand.hbm [shape: bf16[2,32,32], index: 13, kind: output, shape index: {}]  }
   0x1   :  { %3819 = sst [smem:[#allocation23_spill]] %s3804_s13 }
   0x2   :  { %18 = vsyncpa [#allocation5], 0 }
   0x3   :  { %19 = vsyncpa [#allocation8], 0 }
   0x4   :  { %20 = vsyncpa [#allocation6], 0 }
   0x5   :  { %22 = vsyncpa [#allocation6 + $0x1], 0  ;;  %s3283_s25 = smov 0   ;;  %s3285_s26 = smov 0  }
   0x6   :  { %s3287_s27 = smov 0   ;;  %s3289_s28 = smov 0  }
   0x7   :  { %s3291_s29 = smov 0   ;;  %s3293_s30 = smov 0  }
   0x8   :  { %s3295_s14 = smov 0   ;;  %s3297_s15 = smov 0  }
   0x9 LB: > { %3820 = sst [smem:[#allocation14_spill]] %s3171_s25  ;;  %s2492_s16 = sadd.s32 4294967295, %s3199_s15   ;;  %s3199_s15 = sphi %s3297_s15, %s28_s15   ;;  %s3195_s14 = sphi %s3295_s14, %s3847_s14   ;;  %s3191_s30 = sphi %s3293_s30, %s3846_s30   ;;  %s3187_s29 = sphi %s3291_s29, %s3845_s29   ;;  %s3183_s28 = sphi %s3289_s28, %s3844_s28   ;;  %s3179_s27 = sphi %s3287_s27, %s3850_s27   ;;  %s3175_s26 = sphi %s3285_s26, %s3849_s26   ;;  %s3171_s25 = sphi %s3283_s25, %s3848_s25  }
   0xa   : > { %3821 = sst [smem:[#allocation15_spill]] %s3179_s27  ;;  %s2493_s17 = sadd.s32 4294967294, %s3199_s15  }
   0xb   : > { %3822 = sst [smem:[#allocation16_spill]] %s3191_s30  ;;  %s37_s18 = sadd.s32 1, %s3191_s30 }
   0xc   : > { %3823 = sst [smem:[#allocation17_spill]] %s3195_s14  ;;  %s40_s19 = sadd.s32 1, %s3195_s14 }
   0xd   : > { %3824 = sst [smem:[#allocation18_spill]] %s3199_s15  ;;  %p38_p0 = scmp.ge.s32.totalorder %s37_s18, 2 }
   0xe   : > { %s329_s20 = sadd.s32 1, %s3179_s27  ;;  %p339_p1 = scmp.ne.s32.totalorder %s3179_s27, %s3175_s26 }
   0xf   : > { %p340_p2 = scmp.eq.s32.totalorder %s2492_s16, 3  ;;  %s3852_s18 = smov (%p38_p0, %s37_s18), 0 }
  0x10   : > { %3825 = sst [smem:[#allocation19_spill]] %s3852_s18  ;;  %s3854_s19 = smov (!%p38_p0, %s40_s19), %s3195_s14 }
  0x11   : > { %s325_s21 = ssub.s32 %s3191_s30, %s3852_s18  ;;  %p3335_p3 = por %p340_p2, %p339_p1 }
  0x12   : > { %p42_p4 = scmp.ge.s32.totalorder %s3854_s19, 2  ;;  %p345_p5 = scmp.ne.s32.totalorder %s3175_s26, %s3171_s25 }
  0x13   : > { %s3826_s22 = scalar_select %p3335_p3, 1, 0 }
  0x14   : > { %p346_p6 = scmp.eq.s32.totalorder %s2493_s17, 3  ;;  %p2494_p7 = scmp.ge.s32.totalorder %s3199_s15, 1 }
  0x15   : > { %s3856_s19 = smov (%p42_p4, %s3854_s19), 0  ;;  %p353_p9 = scmp.lt.s32.totalorder %s3199_s15, 5 }
  0x16   : > { %3827 = sst [smem:[#allocation20_spill]] %s3856_s19  ;;  %p3344_p8 = por %p346_p6, %p345_p5 }
  0x17   : > { %s324_s24 = ssub.s32 %s3195_s14, %s3856_s19  ;;  %p3351_p10 = pnand %p2494_p7, %p353_p9 }
  0x18   : > { %s3828_s23 = scalar_select %p3344_p8, 1, 0 }
  0x19   : > { %s326_s13 = sor.u32 %s325_s21, %s324_s24  ;;  %p3355_p12 = scmp.eq.s32.totalorder %s2492_s16, 0 }
  0x1a   : > { %3829 = sst [smem:[#allocation21_spill]] %s3828_s23  ;;  %p327_p11 = scmp.eq.s32.totalorder %s326_s13, 0 }
  0x1b   : > { %s3830_s18 = scalar_select %p3351_p10, 1, 0 }
  0x1c   : > { %s3831_s30 = scalar_select %p3355_p12, 1, 0 }
  0x1d   : > { %p2811_p13 = pneg %p3351_p10  ;;  %s3201_s21 = smov [#allocation7]  }
  0x1e   : > { %s3362_s17 = scalar_select %p327_p11, %s3179_s27, %s329_s20  }
  0x1f   : > { %p3366_p0 = pnand %p3355_p12, %p2811_p13  ;;  %s385_s24 = sshll.u32 %s3201_s21, 4  ;;  %s386_s24 = int_to_ptr.vmem [resolvable:$true] %s385_s24 }
  0x20   : > { %3832 = sst [smem:[#allocation22_spill]] %s3362_s17  ;;  %s3032_s13 = scalar_lea.vmem %s386_s24, 2048 }
  0x21   : > { %p3023_p1 = pneg %p3366_p0  ;;  %p3033_p2 = scmp.ne.s32.totalorder %s386_s24, %s3032_s13 }
  0x22   : > { %p3040_p6 = scmp.lt.s32.totalorder %s386_s24, %s386_s24  ;;  %p3041_p7 = scmp.lt.s32.totalorder %s3032_s13, %s3032_s13 }
  0x23   : > { %p3035_p4 = pnand %p3033_p2, %p3023_p1 }
  0x24   : > { %p3042_p9 = por %p3041_p7, %p3040_p6 }
  0x25   : > { %p3036_p5 = pneg %p3035_p4 }
  0x27   : > { %p3043_p11 = pnand %p3042_p9, %p3036_p5 }
  0x29   : > { %3046 = shalt.err (!%p3043_p11)
}
  0x2a   : > { %s3202_s16 = smov 256   ;;  %s3203_s20 = smov 16  }
  0x2b   : > { %2817 = dma.hbm_to_vmem [thread:$0]  (!%p3366_p0), %s3796_s5, 2048, %s386_s24, [#allocation8], %s3202_s16, %s3202_s16, %s3203_s20  }
  0x2c   : > { %s3204_s14 = smov [#allocation4]   ;;  %s3205_s27 = smov [#allocation9]  }
  0x2d   : > { %s375_s17 = sshll.u32 %s3204_s14, 4  ;;  %s399_s25 = sshll.u32 %s3205_s27, 4  ;;  %s376_s17 = int_to_ptr.vmem [resolvable:$true] %s375_s17  ;;  %s400_s25 = int_to_ptr.vmem [resolvable:$true] %s399_s25 }
  0x2e   : > { %s3058_s15 = scalar_lea.vmem %s376_s17, 16  ;;  %s3065_s13 = scalar_lea.vmem %s376_s17, 32 }
  0x2f   : > { %p3059_p13 = scmp.ne.s32.totalorder %s376_s17, %s3058_s15  ;;  %p3066_p5 = scmp.lt.s32.totalorder %s376_s17, %s376_s17 }
  0x30   : > { %p3067_p6 = scmp.lt.s32.totalorder %s3065_s13, %s3058_s15 }
  0x31   : > { %p3061_p2 = pnand %p3059_p13, %p3023_p1 }
  0x32   : > { %p3068_p7 = por %p3067_p6, %p3066_p5 }
  0x33   : > { %p3062_p4 = pneg %p3061_p2 }
  0x35   : > { %p3069_p9 = pnand %p3068_p7, %p3062_p4 }
  0x37   : > { %3072 = shalt.err (!%p3069_p9)
}
  0x38   : > { %2814 = dma.hbm_to_vmem [thread:$0]  (!%p3366_p0), %s3795_s4, 16, %s376_s17, [#allocation5]  }
  0x39   : > { %s3084_s27 = scalar_lea.vmem %s400_s25, 64  ;;  %p3092_p2 = scmp.lt.s32.totalorder %s400_s25, %s400_s25 }
  0x3a   : > { %p3085_p11 = scmp.ne.s32.totalorder %s400_s25, %s3084_s27  ;;  %p3093_p3 = scmp.lt.s32.totalorder %s3084_s27, %s3084_s27 }
  0x3c   : > { %p3087_p8 = pnand %p3085_p11, %p3023_p1  ;;  %p3094_p12 = por %p3093_p3, %p3092_p2 }
  0x3e   : > { %p3088_p13 = pneg %p3087_p8 }
  0x40   : > { %p3095_p10 = pnand %p3094_p12, %p3088_p13 }
  0x42   : > { %3098 = shalt.err (!%p3095_p10)
}
  0x43   : > { %2820 = dma.hbm_to_vmem [thread:$0]  (!%p3366_p0), %s3797_s6, 64, %s400_s25, [#allocation8]  }
  0x44   : > { %p3834_p4 = scmp.ne.s32.totalorder %s3830_s18, 0 }
  0x45   : > { %p3835_p5 = scmp.ne.s32.totalorder (!%p3834_p4), %s3831_s30, 0 }
  0x46   : > { %443 = sbr.rel (%p3834_p4) target bundleno = 2032 (0x7f0), region = 72 }
  0x4b   : > { %3158 = dma.done.wait (%p3835_p5), [#allocation5], 16  }
  0x4c   : > { %3160 = vsyncadd (%p3835_p5), [#allocation5], 4294967280 }
  0x4d   : > { %3162 = dma.done.wait (%p3835_p5), [#allocation8], 2112  }
  0x4e   : > { %3164 = vsyncadd (%p3835_p5), [#allocation8], 4294965184  ;;  %s496_s25 = sand.u32 1, %s3175_s26   ;;  %s3408_s18 = sshll.u32 %s3183_s28, 1 }
  0x4f   : > { %s2503_s23 = sshll.u32 %s496_s25, 3  ;;  %p500_p3 = scmp.lt.s32.totalorder %s3187_s29, 1 }
  0x50   : > { %p502_p8 = scmp.lt.s32.totalorder %s3408_s18, 3  ;;  %s3419_s27 = scalar_lea.vmem [#allocation10], %s2503_s23 }
  0x51   : > { %s501_s17 = scalar_select %p500_p3, %s3187_s29, 1 }
  0x52   : > { %s503_s16 = scalar_select %p502_p8, %s3408_s18, 3 }
  0x53   : > { %s2505_s20 = sshll.u32 %s501_s17, 2  ;;  %p2507_p10 = scmp.ne.s32.totalorder %s3183_s28, 0 }
  0x54   : > { %s505_s21 = sadd.s32 %s2505_s20, %s503_s16 }
  0x55   : > { %s2506_s30 = sshll.u32 %s505_s21, 2  ;;  %514 = sbr.rel (%p2507_p10) target bundleno = 96 (0x60), region = 88 }
  0x56   : > { %s507_s14 = scalar_lea.vmem %s3791_s0, %s2506_s30 }
  0x5a   : > { %vm523_vm0 = vcmask 523264   ;;  %v3206_v0 = vmov 0.0  }
  0x5b   : > { %515 = vst [vmem:[#allocation2 + $0x30] sm:$0xff] %v3206_v0  ;;  %516 = vst [vmem:[#allocation2] sm:$0xff] %v3206_v0 }
  0x5c   : > { %517 = vst [vmem:[#allocation2 + $0x18] sm:$0xff] %v3206_v0  ;;  %518 = vst [vmem:[#allocation2 + $0x10] sm:$0xff] %v3206_v0 }
  0x5d   : > { %519 = vst [vmem:[#allocation2 + $0x8] sm:$0xff] %v3206_v0  ;;  %520 = vst [vmem:[#allocation2 + $0x20] sm:$0xff] %v3206_v0 }
  0x5e   : > { %521 = vst [vmem:[#allocation2 + $0x28] sm:$0xff] %v3206_v0  ;;  %522 = vst [vmem:[#allocation2 + $0x38] sm:$0xff] %v3206_v0 }
  0x5f   : > { %524 = vst.msk [vmem:[#allocation3] sm:$0xff] %vm523_vm0, %v3206_v0 }
  0x60 PF: > { %v2907_v1 = vld [vmem:[%s3792_s1 + $0x8] sm:$0xff]   ;;  %v3207_v2 = vmov 0.0   ;;  %v2908_v3 = vld [vmem:[%s3792_s1] sm:$0xff]   ;;  %vm3208_vm1 = vmmov 0   ;;  %vm548_vm2 = vcmask 261120   ;;  %v3209_v8 = vmov 0  }
  0x61   : > { %2655 = vmatprep.subr.bf16.mxu0 %v3207_v2  ;;  %2663 = vmatprep.subr.bf16.mxu1 %v3207_v2  ;;  %v2909_v4 = vld [vmem:[%s507_s14] sm:$0xff]   ;;  %v2910_v5 = vld [vmem:[%s3793_s2 + $0x8] sm:$0xff]   ;;  %v657_v24 = vlaneseq  ;;  %vm650_vm3 = vcmask 523264   ;;  %vm674_vm4 = vcmask 1046528   ;;  %vm696_vm5 = vcmask 1045504   ;;  %s2583_s19 = sshll.u32 %s3187_s29, 2 }
  0x62   : > { %2656 = vmatpush3.bf16.msra.mxu0 %v2907_v1  ;;  %2659 = vmatprep.mubr.msk.bf16.mxu0 %vm3208_vm1, %v3207_v2  ;;  %v2912_v6 = vld [vmem:[#allocation7 + $0x60] ss:$16 sps:$4 sm:$0xff]   ;;  %v2914_v7 = vld [vmem:[#allocation7 + $0x64] ss:$16 sps:$4 sm:$0xff]   ;;  %v2917_v11 = vld [vmem:[#allocation7 + $0x6c] ss:$16 sps:$4 sm:$0xff]   ;;  %s2376_s14 = sadd.s32 %s2583_s19, %s3408_s18 }
  0x63   : > { %2657 = vmatprep.subr.bf16.mxu0 %v3207_v2  ;;  %2667 = vmatprep.mubr.msk.bf16.mxu1 %vm3208_vm1, %v3207_v2  ;;  %v2911_v9 = vld [vmem:[%s3793_s2] sm:$0xff]   ;;  %v2918_v12 = vld [vmem:[#allocation7 + $0x40] ss:$16 sps:$4 sm:$0xff]   ;;  %v3447_v25 = vshrl.u32 %v657_v24, 7  ;;  %vm716_vm6 = vcmask 1044480   ;;  %vm2223_vm7 = vcmask 1042432  }
  0x64   : > { %2664 = vmatpush3.bf16.msra.mxu1 %v2910_v5  ;;  %v2920_v10 = vld [vmem:[#allocation7 + $0x44] ss:$16 sps:$4 sm:$0xff]   ;;  %v2915_v14 = vld [vmem:[#allocation7 + $0x68] ss:$16 sps:$4 sm:$0xff]   ;;  %v2923_v15 = vld [vmem:[#allocation7 + $0x4c] ss:$16 sps:$4 sm:$0xff]  }
  0x65   : > { %2665 = vmatprep.subr.bf16.mxu1 %v3207_v2  ;;  %v2926_v13 = vld [vmem:[#allocation7 + $0x24] ss:$16 sps:$4 sm:$0xff]   ;;  %v2924_v16 = vld [vmem:[#allocation7 + $0x20] ss:$16 sps:$4 sm:$0xff]   ;;  %v2921_v18 = vld [vmem:[#allocation7 + $0x48] ss:$16 sps:$4 sm:$0xff]  }
  0x66   : > { %2658 = vmatpush3.bf16.msra.mxu0 %v2908_v3  ;;  %v2932_v17 = vld [vmem:[#allocation7 + $0x4] ss:$16 sps:$4 sm:$0xff]   ;;  %v2929_v19 = vld [vmem:[#allocation7 + $0x2c] ss:$16 sps:$4 sm:$0xff]   ;;  %v2930_v20 = vld [vmem:[#allocation7] ss:$16 sps:$4 sm:$0xff]  }
  0x67   : > { %907 = vmatprep.subr.bf16.mxu0 %v2914_v7  ;;  %v2927_v21 = vld [vmem:[#allocation7 + $0x28] ss:$16 sps:$4 sm:$0xff]   ;;  %v2935_v22 = vld [vmem:[#allocation7 + $0xc] ss:$16 sps:$4 sm:$0xff]   ;;  %v666_v26 = vsub.s32 1, %v3447_v25  ;;  %v688_v28 = vsub.s32 2, %v3447_v25 }
  0x68   : > { %2666 = vmatpush3.bf16.msra.mxu1 %v2911_v9  ;;  %v2933_v23 = vld [vmem:[#allocation7 + $0x8] ss:$16 sps:$4 sm:$0xff]   ;;  %v659_v35 = vsub.s32 0, %v3447_v25  ;;  %v710_v36 = vsub.s32 3, %v3447_v25  ;;  %vm798_vm8 = vsmask.f32 5376 }
  0x69   : > { %2660 = vmatmul.mubr.msk.bf16.vlgmr.msra.gmra.mxu0 %vm548_vm2, %v2909_v4  ;;  %950 = vmatprep.subr.bf16.mxu1 %v2917_v11  ;;  %v656_v27 = vld [vmem:[%s3794_s3] sm:$0xf]  ;;  %vm1078_vm9 = vcmask 130048   ;;  %vm1236_vm14 = vcmask 64512   ;;  %s2584_s15 = sshll.u32 %s2376_s14, 6  ;;  %s2379_s24 = sshll.u32 %s3419_s27, 4  ;;  %s3735_s24 = int_to_ptr.vmem [resolvable:$true] %s2379_s24 }
  0x6a   : > { %931 = vmatprep.mubr.bf16.mxu0 %v3209_v8  ;;  %908 = vmatpush1.bf16.msra.mxu0 %v2912_v6  ;;  %v667_v30 = vrot.slane %v656_v27, %v666_v26  ;;  %v653_v32 = vld [vmem:[#allocation3] sm:$0xff]  ;;  %v689_v33 = vrot.slane %v656_v27, %v688_v28  ;;  %v660_v41 = vrot.slane %v656_v27, %v659_v35  ;;  %s3836_s23 = sld [smem:[#allocation23_spill]]  ;;  %s3740_s18 = scalar_lea.sflag [#allocation6], %s496_s25 }
  0x6b   : > { %909 = vmatprep.subr.bf16.mxu0 %v2920_v10  ;;  %2668 = vmatmul.mubr.msk.bf16.vlgmr.msra.gmra.mxu1 %vm548_vm2, %v2909_v4  ;;  %v711_v42 = vrot.slane %v656_v27, %v710_v36  ;;  %v2515_v4 = vld [vmem:[#allocation4] ss:$0 sm:$0xff]  ;;  %s3099_s16 = scalar_lea.vmem %s3735_s24, 128  ;;  %p3837_p0 = scmp.ne.s32.totalorder %s3826_s22, 0 }
  0x6c   : > { %951 = vmatpush1.bf16.msra.mxu1 %v2915_v14  ;;  %974 = vmatprep.mubr.bf16.mxu1 %v3209_v8  ;;  %v668_v37 = vmul.f32 %v667_v30, %v653_v32  ;;  %v690_v39 = vmul.f32 %v689_v33, %v653_v32  ;;  %v661_v46 = vmul.f32 %v660_v41, %v653_v32  ;;  %v2570_v32 = vld [vmem:[%s3801_s10] ss:$0 sm:$0xff]  ;;  %p3100_p12 = scmp.ne.s32.totalorder %s3735_s24, %s3099_s16  ;;  %s3210_s20 = smov [#allocation10]  }
  0x6d   : > { %952 = vmatprep.subr.bf16.mxu1 %v2923_v15  ;;  %s3103_s21 = sshll.u32 %s3210_s20, 4  ;;  %s3104_s21 = int_to_ptr.vmem [resolvable:$false] %s3103_s21 }
  0x6e   : > { %910 = vmatpush1.bf16.msra.mxu0 %v2918_v12  ;;  %v675_v44 = vrot.slane %v668_v37, 1  ;;  %v697_v48 = vrot.slane %v690_v39, 2  ;;  %p3101_p1 = pnand %p3100_p12, %p3837_p0  ;;  %s3105_s30 = scalar_lea.vmem %s3104_s21, 256 }
  0x6f   : > { %911 = vmatprep.subr.bf16.mxu0 %v2926_v13  ;;  %p3106_p7 = scmp.lt.s32.totalorder %s3735_s24, %s3104_s21  ;;  %p3107_p9 = scmp.lt.s32.totalorder %s3105_s30, %s3099_s16 }
  0x70   : > { %953 = vmatpush1.bf16.msra.mxu1 %v2921_v18  ;;  %s3733_s17 = scalar_lea.hbm %s3836_s23, %s2584_s15  ;;  %p3102_p6 = pneg %p3101_p1 }
  0x71   : > { %954 = vmatprep.subr.bf16.mxu1 %v2929_v19  ;;  %p3108_p11 = por %p3107_p9, %p3106_p7 }
  0x72   : > { %912 = vmatpush1.bf16.msra.mxu0 %v2924_v16 }
  0x73   : > { %913 = vmatprep.subr.bf16.mxu0 %v2932_v17  ;;  %p3109_p13 = pnand %p3108_p11, %p3102_p6 }
  0x74   : > { %955 = vmatpush1.bf16.msra.mxu1 %v2927_v21 }
  0x75   : > { %956 = vmatprep.subr.bf16.mxu1 %v2935_v22 }
  0x76   : > { %914 = vmatpush1.bf16.msra.mxu0 %v2930_v20 }
  0x77   : > { %2671 = vmatprep.subr.bf16.mxu0 %v3207_v2 }
  0x78   : > { %957 = vmatpush1.bf16.msra.mxu1 %v2933_v23 }
  0x79   : > { %2683 = vmatprep.subr.bf16.mxu1 %v3207_v2 }
 0x129   : > { %v3454_v29 = vpop.f32.mrf.mxu0 }
 0x12a   : > { %651 = vst.msk [vmem:[#allocation3 + $0x8] sm:$0xff] %vm650_vm3, %v3454_v29 }
 0x12b   : > { %v2661_v31 = vpop.f32.mrf.mxu0 }
 0x12d   : > { %v3462_v34 = vpop.f32.mrf.mxu0 }
 0x12e   : > { %652 = vst.msk [vmem:[#allocation3 + $0x10] sm:$0xff] %vm650_vm3, %v3462_v34 }
 0x12f   : > { %v2662_v38 = vpop.f32.mrf.mxu0 }
 0x131   : > { %v654_v40 = vld [vmem:[#allocation3 + $0x8] sm:$0xff] }
 0x132   : > { %v669_v43 = vmul.f32 %v667_v30, %v654_v40  ;;  %v691_v45 = vmul.f32 %v689_v33, %v654_v40  ;;  %v712_v51 = vmul.f32 %v711_v42, %v654_v40  ;;  %v662_v61 = vmul.f32 %v660_v41, %v654_v40 }
 0x134   : > { %v676_v47 = vrot.slane %v669_v43, 1  ;;  %v698_v49 = vrot.slane %v691_v45, 2  ;;  %v717_v63 = vrot.slane %v712_v51, 3 }
 0x135   : > { %v655_v50 = vld [vmem:[#allocation3 + $0x10] sm:$0xff] }
 0x136   : > { %v670_v52 = vmul.f32 %v667_v30, %v655_v50  ;;  %v677_v53 = vsel %vm674_vm4, %v675_v44, %v676_v47  ;;  %v692_v54 = vmul.f32 %v689_v33, %v655_v50  ;;  %757 = vst.msk [vmem:[#allocation3] sm:$0xff] %vm650_vm3, %v655_v50  ;;  %v713_v56 = vmul.f32 %v711_v42, %v655_v50 }
 0x137   : > { %v683_v55 = vadd.f32 %v677_v53, %v661_v46  ;;  %v663_v57 = vmul.f32 %v660_v41, %v655_v50  ;;  %v699_v59 = vsel %vm696_vm5, %v697_v48, %v698_v49 }
 0x138   : > { %v678_v58 = vrot.slane %v670_v52, 1  ;;  %v700_v60 = vrot.slane %v692_v54, 2  ;;  %v718_v3 = vrot.slane %v713_v56, 3 }
 0x139   : > { %v705_v62 = vadd.f32 %v699_v59, %v683_v55 }
 0x13a   : > { %v679_v0 = vsel %vm674_vm4, %v676_v47, %v678_v58  ;;  %v685_v1 = vadd.f32 %v678_v58, %v663_v57  ;;  %v701_v7 = vsel %vm696_vm5, %v698_v49, %v700_v60  ;;  %v719_v11 = vsel %vm716_vm6, %v717_v63, %v718_v3 }
 0x13b   : > { %v684_v5 = vadd.f32 %v679_v0, %v662_v61  ;;  %v723_v6 = vadd.f32 %v717_v63, %v705_v62  ;;  %v2937_v62 = vld [vmem:[%s3798_s7 + $0x10] sm:$0xff]   ;;  %v2938_v63 = vld [vmem:[%s3798_s7 + $0x8] sm:$0xff]   ;;  %v2939_v0 = vld [vmem:[%s3798_s7] sm:$0xff]  }
 0x13c   : > { %v707_v8 = vadd.f32 %v700_v60, %v685_v1  ;;  %v2936_v60 = vld [vmem:[%s3798_s7 + $0x18] sm:$0xff]   ;;  %v3505_v1 = vpop.f32.mrf.mxu1 }
 0x13d   : > { %v706_v9 = vadd.f32 %v701_v7, %v684_v5  ;;  %v733_v10 = vadd.f32 %v2515_v4, %v723_v6  ;;  %v2940_v7 = vld [vmem:[%s3799_s8] sm:$0xff]  }
 0x13e   : > { %v725_v12 = vadd.f32 %v718_v3, %v707_v8  ;;  %v2669_v3 = vpop.f32.mrf.mxu1  ;;  %v776_v8 = vld [vmem:[#allocation9] sm:$0xf] }
 0x13f   : > { %v724_v13 = vadd.f32 %v719_v11, %v706_v9  ;;  %v2516_v14 = vmul.f32 -1.442695, %v733_v10  ;;  %v789_v9 = vrot.slane %v776_v8, %v688_v28  ;;  %v793_v11 = vrot.slane %v776_v8, %v710_v36 }
 0x140   : > { %v735_v15 = vadd.f32 %v2515_v4, %v725_v12  ;;  %v3509_v5 = vpop.f32.mrf.mxu1 }
 0x141   : > { %v734_v16 = vadd.f32 %v2515_v4, %v724_v13  ;;  %2945 = vpow2.f32 %v2516_v14  ;;  %v985_v4 = vpack.c.bf16 %v3462_v34, %v3454_v29 }
 0x142   : > { %v2518_v17 = vmul.f32 -1.442695, %v735_v15  ;;  %v2670_v6 = vpop.f32.mrf.mxu1 }
 0x143   : > { %v2517_v18 = vmul.f32 -1.442695, %v734_v16 }
 0x144   : > { %2947 = vpow2.f32 %v2518_v17  ;;  %v3528_v17 = vrot.slane %v776_v8, %v659_v35 }
 0x145   : > { %2949 = vpow2.f32 %v2517_v18 }
 0x14e   : > { %v2946_v19 = vpop.eup %2945 }
 0x14f   : > { %v745_v20 = vadd.f32 1.0, %v2946_v19 }
 0x151   : > { %v2948_v21 = vpop.eup %2947  ;;  %2951 = vrcp.f32 %v745_v20 }
 0x152   : > { %v2950_v22 = vpop.eup %2949  ;;  %v747_v23 = vadd.f32 1.0, %v2948_v21 }
 0x153   : > { %v746_v27 = vadd.f32 1.0, %v2950_v22 }
 0x154   : > { %2953 = vrcp.f32 %v747_v23 }
 0x155   : > { %2955 = vrcp.f32 %v746_v27 }
 0x15e   : > { %v2952_v30 = vpop.eup %2951 }
 0x15f   : > { %v754_v31 = vmul.f32 %v2952_v30, %v733_v10  ;;  %v785_v10 = vrot.slane %v776_v8, %v666_v26 }
 0x161   : > { %v2954_v33 = vpop.eup %2953  ;;  %v2217_v40 = vmul.f32 %v2570_v32, %v754_v31 }
 0x162   : > { %v2956_v37 = vpop.eup %2955  ;;  %v756_v38 = vmul.f32 %v2954_v33, %v735_v15 }
 0x163   : > { %v755_v39 = vmul.f32 %v2956_v37, %v734_v16  ;;  %v2224_v50 = vrot.slane %v2217_v40, 5 }
 0x164   : > { %v759_v41 = vpack.c.bf16 %v756_v38, %v756_v38  ;;  %v2219_v42 = vmul.f32 %v2570_v32, %v756_v38 }
 0x165   : > { %v758_v43 = vpack.c.bf16 %v755_v39, %v754_v31  ;;  %v2218_v44 = vmul.f32 %v2570_v32, %v755_v39 }
 0x166   : > { %v808_v45 = vshrl.u32 %v759_v41, 16  ;;  %v811_v46 = vshll.u32 %v759_v41, 16  ;;  %v2227_v47 = vrot.slane %v2219_v42, 5 }
 0x167   : > { %v800_v48 = vshrl.u32 %v758_v43, 16  ;;  %v803_v49 = vshll.u32 %v758_v43, 16  ;;  %v2225_v51 = vrot.slane %v2218_v44, 5 }
 0x168   : > { %v810_v52 = vrot.slane %v808_v45, 2  ;;  %v813_v53 = vrot.slane %v811_v46, 3 }
 0x169   : > { %v802_v54 = vrot.slane %v800_v48, 2  ;;  %v805_v55 = vrot.slane %v803_v49, 3  ;;  %v3480_v56 = vsel %vm2223_vm7, %v2224_v50, %v2225_v51  ;;  %v3482_v57 = vsel %vm2223_vm7, %v2225_v51, %v2227_v47 }
 0x16a   : > { %v814_v58 = vor.u32 %v813_v53, %v810_v52 }
 0x16b   : > { %v806_v59 = vor.u32 %v805_v55, %v802_v54 }
 0x16d   : > { %v815_v61 = vsel %vm798_vm8, %v806_v59, %v814_v58  ;;  %v3548_v59 = vand.u32 127, %v657_v24 }
 0x16e   : > { %2535 = vmatmul.mubr.msk.bf16.vlgmr.msra.gmra.mxu0 %vm650_vm3, %v815_v61  ;;  %2536 = vmatmul.mubr.msk.bf16.vlgmr.msra.gmra.mxu1 %vm650_vm3, %v815_v61 }
 0x16f   : > { %2672 = vmatpush3.bf16.msra.mxu0 %v2936_v60  ;;  %2679 = vmatprep.mubr.msk.bf16.mxu0 %vm3208_vm1, %v3207_v2  ;;  %vm1225_vm12 = vcmp.ge.s32.totalorder %v3447_v25, %v3548_v59 }
 0x170   : > { %2673 = vmatprep.subr.bf16.mxu0 %v3207_v2  ;;  %2685 = vmatprep.mubr.msk.bf16.mxu1 %vm3208_vm1, %v3207_v2 }
 0x171   : > { %2684 = vmatpush3.bf16.msra.mxu1 %v2940_v7 }
 0x172   : > { %2689 = vmatprep.subr.mxu1 %v3207_v2 }
 0x173   : > { %2674 = vmatpush3.bf16.msra.mxu0 %v2937_v62 }
 0x174   : > { %2675 = vmatprep.subr.bf16.mxu0 %v3207_v2 }
 0x177   : > { %2676 = vmatpush3.bf16.msra.mxu0 %v2938_v63 }
 0x178   : > { %2677 = vmatprep.subr.bf16.mxu0 %v3207_v2 }
 0x17b   : > { %2678 = vmatpush3.bf16.msra.mxu0 %v2939_v0 }
 0x17e   : > { %2680 = vmatmul.mubr.msk.bf16.vlgmr.msra.gmra.mxu0 %vm650_vm3, %v985_v4 }
 0x22e   : > { %v3522_v12 = vpop.f32.mrf.mxu0  ;;  %v976_v13 = vpop.f32.mrf.mxu1 }
 0x22f   : > { %v3524_v14 = vadd.f32 %v976_v13, %v789_v9 }
 0x230   : > { %v935_v15 = vpop.f32.mrf.mxu0  ;;  %v978_v16 = vpop.f32.mrf.mxu1 }
 0x231   : > { %v1139_v18 = vmin.f32 %v3524_v14, 20.0  ;;  %v3531_v28 = vadd.f32 %v935_v15, %v785_v10  ;;  %v979_v19 = vadd.f32 %v978_v16, %v793_v11  ;;  %vm1137_vm11 = vcmp.gt.f32.partialorder %v3524_v14, 20.0 }
 0x232   : > { %v937_v26 = vpop.f32.mrf.mxu0  ;;  %v980_v20 = vpop.f32.mrf.mxu1 }
 0x233   : > { %v1141_v21 = vmul.f32 1.442695, %v1139_v18  ;;  %v2547_v36 = vmul.f32 -1.442695, %v979_v19  ;;  %v3534_v22 = vadd.f32 %v937_v26, %v3528_v17  ;;  %v3536_v23 = vadd.f32 %v980_v20, %v789_v9 }
 0x234   : > { %v939_v27 = vpop.f32.mrf.mxu0  ;;  %v982_v30 = vpop.f32.mrf.mxu1  ;;  %v1193_v35 = vmul.f32 %v3531_v28, %v3531_v28 }
 0x235   : > { %2957 = vpow2.f32 %v1141_v21  ;;  %v1140_v31 = vmin.f32 %v3536_v23, 20.0  ;;  %v3541_v32 = vadd.f32 %v939_v27, %v785_v10  ;;  %v983_v33 = vadd.f32 %v982_v30, %v793_v11 }
 0x236   : > { %1195 = vadd.xlane.f32.xlu0 %v1193_v35  ;;  %2959 = vpow2.f32 %v2547_v36  ;;  %v3558_v11 = vsel %vm1225_vm12, 1.0, %v3207_v2  ;;  %vm1138_vm15 = vcmp.gt.f32.partialorder %v3536_v23, 20.0 }
 0x237   : > { %v1143_v37 = vmul.f32 1.442695, %v1140_v31  ;;  %v1194_v38 = vmul.f32 %v3541_v32, %v3541_v32  ;;  %v2548_v39 = vmul.f32 -1.442695, %v983_v33  ;;  %v2542_v31 = vld [vmem:[%s3800_s9] ss:$0 sm:$0xff] }
 0x239   : > { %2961 = vpow2.f32 %v1143_v37  ;;  %1197 = vadd.xlane.f32.xlu1 %v1194_v38 }
 0x23a   : > { %2963 = vpow2.f32 %v2548_v39 }
 0x23e   : > { %v1055_v40 = vpop.f32.mrf.mxu0 }
 0x240   : > { %v2681_v41 = vpop.f32.mrf.mxu0 }
 0x242   : > { %v2958_v42 = vpop.eup %2957  ;;  %v1058_v43 = vpop.f32.mrf.mxu0 }
 0x243   : > { %v1145_v44 = vadd.f32 1.0, %v2958_v42  ;;  %v1062_v45 = vpack.c.bf16 %v1058_v43, %v1055_v40  ;;  %v2960_v46 = vpop.eup %2959  ;;  %v1148_v52 = vmul.f32 -0.5, %v2958_v42  ;;  %v1151_v58 = vand.u32 2147483647, %v2958_v42 }
 0x244   : > { %v2682_v47 = vpop.f32.mrf.mxu0  ;;  %v1171_v49 = vadd.f32 1.0, %v2960_v46 }
 0x245   : > { %2965 = vlog2.f32 %v1145_v44  ;;  %2686 = vmatmul.mubr.msk.bf16.vlgmr.msra.gmra.mxu1 %vm1078_vm9, %v1062_v45  ;;  %v1149_v54 = vadd.f32 1.0, %v1148_v52  ;;  %vm1152_vm10 = vcmp.lt.f32.partialorder %v1151_v58, 0.0004427343 }
 0x246   : > { %v2962_v48 = vpop.eup %2961  ;;  %2691 = vmatprep.mubr.msk.f32.mxu1 %vm3208_vm1, %v3207_v2 }
 0x247   : > { %v1154_v50 = vadd.f32 1.0, %v2962_v48  ;;  %v2964_v51 = vpop.eup %2963  ;;  %v1157_v55 = vmul.f32 -0.5, %v2962_v48  ;;  %v1150_v62 = vmul.f32 %v2958_v42, %v1149_v54  ;;  %v1160_v0 = vand.u32 2147483647, %v2962_v48 }
 0x248   : > { %v1172_v53 = vadd.f32 1.0, %v2964_v51  ;;  %v3577_v51 = vsub.s32 7, %v3447_v25  ;;  %v2572_v25 = vmul.f32 -1.442695, %v3509_v5 }
 0x249   : > { %2967 = vlog2.f32 %v1154_v50  ;;  %v1158_v63 = vadd.f32 1.0, %v1157_v55  ;;  %vm1161_vm13 = vcmp.lt.f32.partialorder %v1160_v0, 0.0004427343 }
 0x24a   : > { %2969 = vrcp.f32 %v1171_v49 }
 0x24b   : > { %2971 = vrcp.f32 %v1172_v53  ;;  %v1159_v24 = vmul.f32 %v2962_v48, %v1158_v63 }
 0x252   : > { %v2966_v60 = vpop.eup %2965 }
 0x253   : > { %v1147_v61 = vmul.f32 0.6931472, %v2966_v60 }
 0x255   : > { %v1153_v3 = vsel %vm1152_vm10, %v1150_v62, %v1147_v61 }
 0x256   : > { %v2968_v4 = vpop.eup %2967  ;;  %v1163_v6 = vsel %vm1137_vm11, %v3524_v14, %v1153_v3 }
 0x257   : > { %v1177_v7 = vmax.f32 %v1163_v6, 1e-24  ;;  %v1189_v8 = vsub.f32 0.0, %v1163_v6  ;;  %v1156_v9 = vmul.f32 0.6931472, %v2968_v4  ;;  %v2970_v10 = vpop.eup %2969 }
 0x258   : > { %v2972_v19 = vpop.eup %2971 }
 0x259   : > { %2973 = vlog2.f32 %v1177_v7  ;;  %v1162_v13 = vsel %vm1161_vm13, %v1159_v24, %v1156_v9  ;;  %v1191_v15 = vmul.f32 %v2970_v10, %v1189_v8 }
 0x25a   : > { %v1164_v14 = vsel %vm1138_vm15, %v3536_v23, %v1162_v13 }
 0x25b   : > { %v1178_v16 = vmax.f32 %v1164_v14, 1e-24  ;;  %v1190_v18 = vsub.f32 0.0, %v1164_v14  ;;  %2690 = vmatpush3.msra.mxu1 %v1191_v15  ;;  %v934_v14 = vadd.f32 %v3522_v12, %v3528_v17 }
 0x25c   : > { %2692 = vmatmul.mubr.msk.f32.vlgmr.msra.gmra.mxu1 %vm1236_vm14, %v3558_v11  ;;  %2694 = vmatprep.subr.mxu1 %v3207_v2 }
 0x25d   : > { %2975 = vlog2.f32 %v1178_v16  ;;  %2696 = vmatprep.mubr.msk.f32.mxu1 %vm3208_vm1, %v3207_v2  ;;  %v3567_v26 = vmul.f32 %v2972_v19, %v1190_v18 }
 0x266   : > { %v2974_v20 = vpop.eup %2973 }
 0x267   : > { %v1180_v21 = vmul.f32 0.6931472, %v2974_v20 }
 0x269   : > { %v1183_v36 = vmul.f32 %v2970_v10, %v1180_v21 }
 0x26a   : > { %v2976_v27 = vpop.eup %2975 }
 0x26b   : > { %v1182_v23 = vmul.f32 0.6931472, %v2976_v27  ;;  %v1185_v52 = vmul.f32 1.442695, %v1183_v36 }
 0x26d   : > { %v3569_v30 = vmul.f32 %v2972_v19, %v1182_v23 }
 0x2bf   : > { %v1196_v35 = vpop.xlane.xlu0 %1195 }
 0x2c0   : > { %2977 = vrsqrt.f32 %v1196_v35  ;;  %vm1201_vm0 = vcmp.eq.f32.partialorder %v1196_v35, inf  ;;  %v1204_v46 = vand.u32 2147483648, %v1196_v35  ;;  %vm1203_vm2 = vcmp.eq.f32.partialorder %v1196_v35, 0.0 }
 0x2cd   : > { %v2978_v39 = vpop.eup %2977 }
 0x2ce   : > { %v1200_v43 = vmul.f32 %v2978_v39, %v1196_v35  ;;  %v1229_v39 = vld [vmem:[#allocation2] sm:$0xff] }
 0x2d0   : > { %v1202_v45 = vsel %vm1201_vm0, %v1196_v35, %v1200_v43  ;;  %v1235_v35 = vld [vmem:[#allocation2 + $0x38] sm:$0xff] }
 0x2d1   : > { %v1205_v47 = vsel %vm1203_vm2, %v1204_v46, %v1202_v45 }
 0x2d2   : > { %v1213_v48 = vmax.f32 %v1205_v47, 1e-12 }
 0x305   : > { %v1116_v33 = vpop.f32.mrf.mxu1 }
 0x306   : > { %v1117_v37 = vadd.f32 %v2542_v31, %v1116_v33  ;;  %v1232_v33 = vld [vmem:[#allocation2 + $0x8] sm:$0xff] }
 0x307   : > { %v2687_v38 = vpop.f32.mrf.mxu1 }
 0x308   : > { %v2545_v40 = vmul.f32 -1.442695, %v1117_v37  ;;  %v1231_v37 = vld [vmem:[#allocation2 + $0x10] sm:$0xff]  ;;  %v1230_v38 = vld [vmem:[#allocation2 + $0x18] sm:$0xff] }
 0x309   : > { %v1119_v41 = vpop.f32.mrf.mxu1 }
 0x30a   : > { %2979 = vpow2.f32 %v2545_v40  ;;  %v3574_v42 = vadd.f32 %v2542_v31, %v1119_v41  ;;  %v1234_v31 = vld [vmem:[#allocation2 + $0x28] sm:$0xff]  ;;  %v1228_v40 = vld [vmem:[#allocation2 + $0x30] sm:$0xff]  ;;  %v1198_v41 = vpop.xlane.xlu1 %1197 }
 0x30b   : > { %v2688_v44 = vpop.f32.mrf.mxu1  ;;  %2981 = vrcp.f32 %v1213_v48  ;;  %vm1208_vm4 = vcmp.eq.f32.partialorder %v1198_v41, inf  ;;  %vm1210_vm5 = vcmp.eq.f32.partialorder %v1198_v41, 0.0 }
 0x317   : > { %v2980_v49 = vpop.eup %2979 }
 0x318   : > { %v1129_v50 = vadd.f32 1.0, %v2980_v49  ;;  %v2982_v0 = vpop.eup %2981 }
 0x319   : > { %v1216_v6 = vmul.f32 %v2982_v0, %v3531_v28 }
 0x31a   : > { %2983 = vrcp.f32 %v1129_v50 }
 0x31b   : > { %2985 = vpow2.f32 %v1185_v52 }
 0x31c   : > { %v1306_v53 = vpop.f32.mrf.mxu1 }
 0x31d   : > { %v1310_v54 = vmul.f32 1.442695, %v1306_v53  ;;  %v1314_v55 = vsub.f32 0.0, %v1306_v53  ;;  %v1535_v58 = vrot.slane %v1306_v53, %v3577_v51 }
 0x31e   : > { %v2693_v60 = vpop.f32.mrf.mxu1 }
 0x31f   : > { %2987 = vpow2.f32 %v1310_v54  ;;  %v1315_v61 = vmul.f32 1.442695, %v1314_v55  ;;  %v1536_v62 = vsub.f32 %v1535_v58, %v1306_v53  ;;  %v2546_v58 = vmul.f32 -1.442695, %v3574_v42 }
 0x321   : > { %2989 = vpow2.f32 %v1315_v61  ;;  %v1537_v63 = vmul.f32 1.442695, %v1536_v62 }
 0x323   : > { %2991 = vpow2.f32 %v1537_v63 }
 0x324   : > { %2993 = vrsqrt.f32 %v1198_v41 }
 0x325   : > { %2995 = vpow2.f32 %v2546_v58 }
 0x327   : > { %v2984_v3 = vpop.eup %2983 }
 0x328   : > { %v1135_v4 = vmul.f32 %v2984_v3, %v3454_v29  ;;  %v2986_v7 = vpop.eup %2985  ;;  %v1211_v3 = vand.u32 2147483648, %v1198_v41 }
 0x329   : > { %v1219_v9 = vmul.f32 %v2986_v7, %v1216_v6 }
 0x32a   : > { %1552 = vxpose.xlu0.b32.start.end [1/1] (short) (narrow) %v1135_v4, 64 }
 0x32c   : > { %v3582_v8 = vpop.eup %2987 }
 0x32d   : > { %v1312_v10 = vmul.f32 0.25, %v3582_v8  ;;  %v1543_v43 = vrot.slane %v3582_v8, %v3577_v51 }
 0x32e   : > { %v2990_v24 = vpop.eup %2989 }
 0x32f   : > { %v1317_v13 = vmul.f32 %v2990_v24, %v1219_v9  ;;  %v1313_v18 = vmul.f32 %v1312_v10, %v934_v14  ;;  %v1545_v44 = vmul.f32 %v1543_v43, %v1229_v39  ;;  %v1544_v47 = vmul.f32 %v1543_v43, %v1228_v40 }
 0x330   : > { %v2992_v15 = vpop.eup %2991  ;;  %v1547_v50 = vmul.f32 %v1543_v43, %v1231_v37  ;;  %v1546_v55 = vmul.f32 %v1543_v43, %v1230_v38  ;;  %v1548_v7 = vmul.f32 %v1543_v43, %v1232_v33  ;;  %v1551_v42 = vmul.f32 %v1543_v43, %v1235_v35 }
 0x331   : > { %2695 = vmatpush3.xpose.msra.mxu1 %v1317_v13  ;;  %v1539_v16 = vmul.f32 %v2992_v15, %v1219_v9  ;;  %v2994_v52 = vpop.eup %2993  ;;  %v1550_v14 = vmul.f32 %v1543_v43, %v1234_v31 }
 0x332   : > { %2699 = vmatprep.subr.mxu1 %v3207_v2  ;;  %v1207_v61 = vmul.f32 %v2994_v52, %v1198_v41 }
 0x333   : > { %2723 = vmatprep.subr.mxu0 %v1539_v16 }
 0x334   : > { %2697 = vmatmul.mubr.f32.vlgmr.msra.gmra.mxu1 %v1313_v18  ;;  %2724 = vmatpush3.msra.mxu0 %v1539_v16  ;;  %v1209_v63 = vsel %vm1208_vm4, %v1198_v41, %v1207_v61  ;;  %v1187_v16 = vmul.f32 1.442695, %v3569_v30 }
 0x335   : > { %2700 = vmatpush3.msra.mxu1 %v1135_v4  ;;  %2737 = vmatprep.subr.mxu0 %v3207_v2  ;;  %v1212_v8 = vsel %vm1210_vm5, %v1211_v3, %v1209_v63 }
 0x336   : > { %2701 = vmatprep.mubr.msk.f32.mxu1 %vm3208_vm1, %v3207_v2  ;;  %2704 = vmatprep.subr.mxu1 %v3207_v2  ;;  %v1214_v10 = vmax.f32 %v1212_v8, 1e-12 }
 0x338   : > { %2997 = vrcp.f32 %v1214_v10 }
 0x339   : > { %2999 = vpow2.f32 %v1187_v16 }
 0x3a6   : > { %v1568_v29 = vpop.trf.xlu0 }
 0x3a7   : > { %2725 = vmatprep.mubr.msk.f32.mxu0 %vm1236_vm14, %v1568_v29  ;;  %v2996_v29 = vpop.eup %2995 }
 0x3a8   : > { %v2998_v30 = vpop.eup %2997 }
 0x3aa   : > { %v1569_v12 = vpop.trf.xlu0 }
 0x3ab   : > { %2726 = vmatmul.mubr.msk.f32.vlgmr.msra.gmra.mxu0 %vm1236_vm14, %v1569_v12 }
 0x3ac   : > { %2738 = vmatpush3.msra.mxu0 %v3567_v26 }
 0x3ad   : > { %2742 = vmatprep.subr.mxu0 %v3207_v2 }
 0x3ae   : > { %v1570_v17 = vpop.trf.xlu0 }
 0x3af   : > { %2728 = vmatprep.mubr.msk.f32.mxu0 %vm1236_vm14, %v1570_v17 }
 0x3b2   : > { %v1571_v28 = vpop.trf.xlu0 }
 0x3b3   : > { %2729 = vmatmul.mubr.msk.f32.gmra.mxu0 %vm1236_vm14, %v1571_v28 }
 0x3b6   : > { %v1572_v19 = vpop.trf.xlu0 }
 0x3b7   : > { %2731 = vmatprep.mubr.msk.f32.mxu0 %vm1236_vm14, %v1572_v19 }
 0x3ba   : > { %v1573_v20 = vpop.trf.xlu0 }
 0x3bb   : > { %2732 = vmatmul.mubr.msk.f32.gmra.mxu0 %vm1236_vm14, %v1573_v20 }
 0x3be   : > { %v1574_v21 = vpop.trf.xlu0 }
 0x3bf   : > { %2734 = vmatprep.mubr.msk.f32.mxu0 %vm1236_vm14, %v1574_v21  ;;  %v1130_v21 = vadd.f32 1.0, %v2996_v29 }
 0x3c2   : > { %v1575_v36 = vpop.trf.xlu0 }
 0x3c3   : > { %2735 = vmatmul.mubr.msk.f32.gmra.mxu0 %vm1236_vm14, %v1575_v36 }
 0x3c4   : > { %2739 = vmatprep.mubr.msk.f32.mxu0 %vm3208_vm1, %v3207_v2 }
 0x3c7   : > { %2740 = vmatmul.mubr.msk.f32.vlgmr.msra.gmra.mxu0 %vm1236_vm14, %v3558_v11  ;;  %v1233_v11 = vld [vmem:[#allocation2 + $0x20] sm:$0xff] }
 0x3c8   : > { %2744 = vmatprep.mubr.msk.f32.mxu0 %vm3208_vm1, %v3207_v2  ;;  %v1549_v0 = vmul.f32 %v1543_v43, %v1233_v11 }
 0x3f4   : > { %v1384_v26 = vpop.f32.mrf.mxu1 }
 0x3f5   : > { %v1388_v27 = vsel %vm1225_vm12, %v1384_v26, 0.0 }
 0x3f6   : > { %v2698_v23 = vpop.f32.mrf.mxu1  ;;  %2702 = vmatmul.mubr.msk.f32.vlgmr.msra.gmra.mxu1 %vm1236_vm14, %v1388_v27 }
 0x3f7   : > { %2705 = vmatpush3.xpose.msra.mxu1 %v1235_v35  ;;  %2720 = vmatprep.mubr.msk.f32.mxu1 %vm3208_vm1, %v3207_v2  ;;  %v1218_v35 = vmul.f32 %v2998_v30, %v3541_v32  ;;  %v2571_v32 = vmul.f32 -1.442695, %v3505_v1 }
 0x3f8   : > { %2706 = vmatprep.subr.mxu1 %v3207_v2 }
 0x3fb   : > { %2707 = vmatpush3.xpose.msra.mxu1 %v1234_v31  ;;  %v3000_v31 = vpop.eup %2999 }
 0x3fc   : > { %2708 = vmatprep.subr.mxu1 %v3207_v2 }
 0x3ff   : > { %2709 = vmatpush3.xpose.msra.mxu1 %v1233_v11 }
 0x400   : > { %2710 = vmatprep.subr.mxu1 %v3207_v2 }
 0x403   : > { %2711 = vmatpush3.xpose.msra.mxu1 %v1232_v33  ;;  %v1220_v33 = vmul.f32 %v3000_v31, %v1218_v35  ;;  %v2943_v35 = vld [vmem:[%s3803_s12 + $0x8] sm:$0xff]  }
 0x404   : > { %2712 = vmatprep.subr.mxu1 %v3207_v2 }
 0x407   : > { %2713 = vmatpush3.xpose.msra.mxu1 %v1231_v37 }
 0x408   : > { %2714 = vmatprep.subr.mxu1 %v3207_v2 }
 0x40b   : > { %2715 = vmatpush3.xpose.msra.mxu1 %v1230_v38 }
 0x40c   : > { %2716 = vmatprep.subr.mxu1 %v3207_v2 }
 0x40f   : > { %2717 = vmatpush3.xpose.msra.mxu1 %v1229_v39 }
 0x410   : > { %2718 = vmatprep.subr.mxu1 %v3207_v2 }
 0x413   : > { %2719 = vmatpush3.xpose.msra.mxu1 %v1228_v40 }
 0x416   : > { %2721 = vmatmul.mubr.f32.vlgmr.msra.gmra.mxu1 %v1313_v18 }
 0x46b   : > { %v2727_v45 = vpop.f32.mrf.mxu0 }
 0x46c   : > { %v3623_v46 = vadd.f32 %v2727_v45, %v1545_v44 }
 0x46d   : > { %v1674_v48 = vpop.f32.mrf.mxu0 }
 0x46e   : > { %v3625_v49 = vadd.f32 %v1674_v48, %v1544_v47 }
 0x473   : > { %v2730_v53 = vpop.f32.mrf.mxu0 }
 0x474   : > { %v3627_v54 = vadd.f32 %v2730_v53, %v1547_v50 }
 0x475   : > { %v1684_v60 = vpop.f32.mrf.mxu0 }
 0x476   : > { %v3630_v62 = vadd.f32 %v1684_v60, %v1546_v55 }
 0x47b   : > { %v2733_v4 = vpop.f32.mrf.mxu0 }
 0x47c   : > { %v3632_v6 = vadd.f32 %v2733_v4, %v1549_v0 }
 0x47d   : > { %v1694_v9 = vpop.f32.mrf.mxu0 }
 0x47e   : > { %v3634_v24 = vadd.f32 %v1694_v9, %v1548_v7 }
 0x483   : > { %v2736_v13 = vpop.f32.mrf.mxu0 }
 0x484   : > { %v3636_v15 = vadd.f32 %v2736_v13, %v1551_v42 }
 0x485   : > { %v1704_v18 = vpop.f32.mrf.mxu0 }
 0x486   : > { %v3639_v12 = vadd.f32 %v1704_v18, %v1550_v14 }
 0x487   : > { %v1787_v17 = vpop.f32.mrf.mxu0 }
 0x488   : > { %v1791_v28 = vmul.f32 1.442695, %v1787_v17  ;;  %v1795_v19 = vsub.f32 0.0, %v1787_v17  ;;  %v2016_v20 = vrot.slane %v1787_v17, %v3577_v51 }
 0x489   : > { %v2741_v36 = vpop.f32.mrf.mxu0 }
 0x48a   : > { %3001 = vpow2.f32 %v1791_v28  ;;  %v1796_v26 = vmul.f32 1.442695, %v1795_v19  ;;  %v2017_v27 = vsub.f32 %v2016_v20, %v1787_v17 }
 0x48c   : > { %3003 = vpow2.f32 %v1796_v26  ;;  %v2018_v23 = vmul.f32 1.442695, %v2017_v27  ;;  %v2941_v26 = vld [vmem:[%s3803_s12 + $0x18] sm:$0xff]  }
 0x48d   : > { %3005 = vrcp.f32 %v1130_v21 }
 0x48e   : > { %3007 = vpow2.f32 %v2018_v23  ;;  %v2942_v23 = vld [vmem:[%s3803_s12 + $0x10] sm:$0xff]  }
 0x48f   : > { %3009 = vpow2.f32 %v2571_v32 }
 0x497   : > { %v3643_v11 = vpop.eup %3001 }
 0x498   : > { %v1793_v38 = vmul.f32 0.25, %v3643_v11 }
 0x499   : > { %v3004_v37 = vpop.eup %3003 }
 0x49a   : > { %v3006_v39 = vpop.eup %3005  ;;  %v1798_v40 = vmul.f32 %v3004_v37, %v1220_v33  ;;  %v1794_v44 = vmul.f32 %v1793_v38, %v3534_v22 }
 0x49b   : > { %v3008_v41 = vpop.eup %3007  ;;  %v1136_v45 = vmul.f32 %v3006_v39, %v3462_v34 }
 0x49c   : > { %2743 = vmatpush3.xpose.msra.mxu0 %v1798_v40  ;;  %v2020_v43 = vmul.f32 %v3008_v41, %v1220_v33  ;;  %v3010_v48 = vpop.eup %3009  ;;  %v2944_v33 = vld [vmem:[%s3803_s12] sm:$0xff]  }
 0x49d   : > { %2747 = vmatprep.subr.mxu0 %v3207_v2  ;;  %v2239_v50 = vadd.f32 1.0, %v3010_v48 }
 0x49e   : > { %2771 = vmatprep.subr.mxu1 %v2020_v43 }
 0x49f   : > { %2745 = vmatmul.mubr.f32.vlgmr.msra.gmra.mxu0 %v1794_v44  ;;  %2772 = vmatpush3.msra.mxu1 %v2020_v43  ;;  %3011 = vrcp.f32 %v2239_v50  ;;  %v2024_v50 = vrot.slane %v3643_v11, %v3577_v51 }
 0x4a0   : > { %2748 = vmatpush3.msra.mxu0 %v1136_v45  ;;  %2749 = vmatprep.mubr.msk.f32.mxu0 %vm3208_vm1, %v3207_v2  ;;  %3013 = vpow2.f32 %v2572_v25 }
 0x4a1   : > { %2752 = vmatprep.subr.mxu0 %v3207_v2  ;;  %2785 = vmatprep.subr.bf16.mxu1 %v3207_v2 }
 0x4ac   : > { %v3012_v52 = vpop.eup %3011 }
 0x4ad   : > { %v2245_v58 = vmul.f32 %v3012_v52, %v3505_v1  ;;  %v3014_v59 = vpop.eup %3013  ;;  %v2026_v52 = vmul.f32 %v2024_v50, %v3623_v46 }
 0x4ae   : > { %v2240_v8 = vadd.f32 1.0, %v3014_v59 }
 0x4b0   : > { %3015 = vrcp.f32 %v2240_v8 }
 0x4b6   : > { %v1458_v47 = vpop.f32.mrf.mxu1 }
 0x4b8   : > { %v2703_v22 = vpop.f32.mrf.mxu1 }
 0x4bd   : > { %v3016_v9 = vpop.eup %3015 }
 0x4be   : > { %v2246_v14 = vmul.f32 %v3016_v9, %v3509_v5 }
 0x4d6   : > { %v1528_v34 = vpop.f32.mrf.mxu1 }
 0x4d7   : > { %v1529_v53 = vadd.f32 %v1528_v34, %v1458_v47 }
 0x4d8   : > { %v2722_v55 = vpop.f32.mrf.mxu1 }
 0x4d9   : > { %v2231_v60 = vadd.f32 %v3480_v56, %v1529_v53  ;;  %v2025_v55 = vmul.f32 %v2024_v50, %v3625_v49 }
 0x4db   : > { %v3656_v61 = vmul.f32 %v2245_v58, %v2231_v60 }
 0x4dd   : > { %v2249_v63 = vmul.f32 %v3656_v61, %v3656_v61 }
 0x4df   : > { %v2251_v0 = vsel %vm650_vm3, %v2249_v63, 0.0 }
 0x4e0   : > { %2252 = vadd.xlane.f32.xlu1 %v2251_v0  ;;  %v2027_v0 = vmul.f32 %v2024_v50, %v3630_v62 }
 0x55f   : > { %v1865_v3 = vpop.f32.mrf.mxu0 }
 0x560   : > { %v1869_v4 = vsel %vm1225_vm12, %v1865_v3, 0.0 }
 0x561   : > { %v2746_v7 = vpop.f32.mrf.mxu0  ;;  %2750 = vmatmul.mubr.msk.f32.vlgmr.msra.gmra.mxu0 %vm1236_vm14, %v1869_v4  ;;  %v2029_v4 = vmul.f32 %v2024_v50, %v3634_v24 }
 0x562   : > { %2753 = vmatpush3.xpose.msra.mxu0 %v3636_v15  ;;  %2768 = vmatprep.mubr.msk.f32.mxu0 %vm3208_vm1, %v3207_v2 }
 0x563   : > { %2754 = vmatprep.subr.mxu0 %v3207_v2 }
 0x566   : > { %2755 = vmatpush3.xpose.msra.mxu0 %v3639_v12 }
 0x567   : > { %2756 = vmatprep.subr.mxu0 %v3207_v2 }
 0x569   : > { %v2253_v28 = vpop.xlane.xlu1 %2252 }
 0x56a   : > { %2757 = vmatpush3.xpose.msra.mxu0 %v3632_v6  ;;  %v2258_v36 = vmul.f32 0.015625, %v2253_v28 }
 0x56b   : > { %2758 = vmatprep.subr.mxu0 %v3207_v2 }
 0x56e   : > { %2759 = vmatpush3.xpose.msra.mxu0 %v3634_v24 }
 0x56f   : > { %2760 = vmatprep.subr.mxu0 %v3207_v2 }
 0x572   : > { %2761 = vmatpush3.xpose.msra.mxu0 %v3627_v54 }
 0x573   : > { %2762 = vmatprep.subr.mxu0 %v3207_v2 }
 0x576   : > { %2763 = vmatpush3.xpose.msra.mxu0 %v3630_v62 }
 0x577   : > { %2764 = vmatprep.subr.mxu0 %v3207_v2 }
 0x57a   : > { %2765 = vmatpush3.xpose.msra.mxu0 %v3623_v46  ;;  %v2030_v46 = vmul.f32 %v2024_v50, %v3632_v6 }
 0x57b   : > { %2766 = vmatprep.subr.mxu0 %v3207_v2 }
 0x57e   : > { %2767 = vmatpush3.xpose.msra.mxu0 %v3625_v49 }
 0x581   : > { %2769 = vmatmul.mubr.f32.vlgmr.msra.gmra.mxu0 %v1794_v44 }
 0x621   : > { %v1939_v56 = vpop.f32.mrf.mxu0 }
 0x623   : > { %v2751_v1 = vpop.f32.mrf.mxu0 }
 0x624   : > { %v2031_v1 = vmul.f32 %v2024_v50, %v3639_v12 }
 0x641   : > { %v2009_v10 = vpop.f32.mrf.mxu0 }
 0x642   : > { %v2010_v42 = vadd.f32 %v2009_v10, %v1939_v56 }
 0x643   : > { %v2770_v13 = vpop.f32.mrf.mxu0 }
 0x644   : > { %v2232_v16 = vadd.f32 %v3482_v57, %v2010_v42  ;;  %v2260_v57 = vadd.f32 1e-05, %v2258_v36 }
 0x646   : > { %v2248_v18 = vmul.f32 %v2246_v14, %v2232_v16 }
 0x648   : > { %v2250_v29 = vmul.f32 %v2248_v18, %v2248_v18 }
 0x64a   : > { %v2254_v17 = vsel %vm650_vm3, %v2250_v29, 0.0 }
 0x64b   : > { %2255 = vadd.xlane.f32.xlu1 %v2254_v17 }
 0x67e   : > { %2033 = vxpose.xlu1.b32.start.end [1/1] (short) (narrow) %v1136_v45, 64  ;;  %v2573_v45 = vld [vmem:[%s3802_s11] ss:$0 sm:$0xff] }
 0x6d4   : > { %v2256_v19 = vpop.xlane.xlu1 %2255 }
 0x6d5   : > { %v2259_v20 = vmul.f32 0.015625, %v2256_v19 }
 0x6d7   : > { %v2261_v5 = vadd.f32 1e-05, %v2259_v20 }
 0x6d9   : > { %3017 = vrsqrt.f32 %v2261_v5 }
 0x6da   : > { %3019 = vrsqrt.f32 %v2260_v57 }
 0x6e6   : > { %v3018_v38 = vpop.eup %3017 }
 0x6e7   : > { %v3020_v40 = vpop.eup %3019  ;;  %v2265_v41 = vmul.f32 %v3018_v38, %v2248_v18 }
 0x6e8   : > { %v2264_v44 = vmul.f32 %v3020_v40, %v3656_v61  ;;  %v2028_v61 = vmul.f32 %v2024_v50, %v3627_v54  ;;  %v2032_v54 = vmul.f32 %v2024_v50, %v3636_v15 }
 0x6e9   : > { %v2274_v32 = vmul.f32 %v2573_v45, %v2265_v41 }
 0x6ea   : > { %v2273_v22 = vmul.f32 %v2573_v45, %v2264_v44 }
 0x6ec   : > { %v2275_v48 = vpack.c.bf16 %v2274_v32, %v2273_v22 }
 0x6fa   : > { %v2049_v21 = vpop.trf.xlu1 }
 0x6fb   : > { %2773 = vmatprep.mubr.msk.f32.mxu1 %vm1236_vm14, %v2049_v21 }
 0x6fe   : > { %v2050_v27 = vpop.trf.xlu1 }
 0x6ff   : > { %2774 = vmatmul.mubr.msk.f32.vlgmr.msra.gmra.mxu1 %vm1236_vm14, %v2050_v27 }
 0x700   : > { %2786 = vmatpush3.bf16.msra.mxu1 %v2941_v26 }
 0x701   : > { %2787 = vmatprep.subr.bf16.mxu1 %v3207_v2 }
 0x702   : > { %v2051_v30 = vpop.trf.xlu1 }
 0x703   : > { %2776 = vmatprep.mubr.msk.f32.mxu1 %vm1236_vm14, %v2051_v30 }
 0x704   : > { %2788 = vmatpush3.bf16.msra.mxu1 %v2942_v23 }
 0x705   : > { %2789 = vmatprep.subr.bf16.mxu1 %v3207_v2 }
 0x706   : > { %v2052_v31 = vpop.trf.xlu1 }
 0x707   : > { %2777 = vmatmul.mubr.msk.f32.gmra.mxu1 %vm1236_vm14, %v2052_v31 }
 0x708   : > { %2790 = vmatpush3.bf16.msra.mxu1 %v2943_v35 }
 0x709   : > { %2791 = vmatprep.subr.bf16.mxu1 %v3207_v2 }
 0x70a   : > { %v2053_v37 = vpop.trf.xlu1 }
 0x70b   : > { %2779 = vmatprep.mubr.msk.f32.mxu1 %vm1236_vm14, %v2053_v37 }
 0x70c   : > { %2792 = vmatpush3.bf16.msra.mxu1 %v2944_v33 }
 0x70e   : > { %v2054_v39 = vpop.trf.xlu1 }
 0x70f   : > { %2780 = vmatmul.mubr.msk.f32.gmra.mxu1 %vm1236_vm14, %v2054_v39 }
 0x712   : > { %v2055_v43 = vpop.trf.xlu1 }
 0x713   : > { %2782 = vmatprep.mubr.msk.f32.mxu1 %vm1236_vm14, %v2055_v43 }
 0x716   : > { %v2056_v47 = vpop.trf.xlu1 }
 0x717   : > { %2783 = vmatmul.mubr.msk.f32.gmra.mxu1 %vm1236_vm14, %v2056_v47 }
 0x718   : > { %2793 = vmatprep.mubr.msk.bf16.mxu1 %vm3208_vm1, %v3207_v2  ;;  %vm2360_vm1 = vcmask 257024  }
 0x71b   : > { %2794 = vmatmul.mubr.msk.bf16.vlgmr.msra.gmra.mxu1 %vm650_vm3, %v2275_v48 }
 0x7bf   : > { %v2775_v34 = vpop.f32.mrf.mxu1 }
 0x7c0   : > { %v2195_v53 = vadd.f32 %v2775_v34, %v2026_v52 }
 0x7c1   : > { %v2155_v58 = vpop.f32.mrf.mxu1 }
 0x7c2   : > { %2203 = vst [vmem:[#allocation2] sm:$0xff] %v2195_v53  ;;  %v2194_v60 = vadd.f32 %v2155_v58, %v2025_v55 }
 0x7c4   : > { %2202 = vst [vmem:[#allocation2 + $0x30] sm:$0xff] %v2194_v60 }
 0x7c7   : > { %v2778_v63 = vpop.f32.mrf.mxu1 }
 0x7c8   : > { %v2197_v2 = vadd.f32 %v2778_v63, %v2028_v61 }
 0x7c9   : > { %v2165_v3 = vpop.f32.mrf.mxu1 }
 0x7ca   : > { %2205 = vst [vmem:[#allocation2 + $0x10] sm:$0xff] %v2197_v2  ;;  %v2196_v51 = vadd.f32 %v2165_v3, %v2027_v0 }
 0x7cc   : > { %2204 = vst [vmem:[#allocation2 + $0x18] sm:$0xff] %v2196_v51 }
 0x7cf   : > { %v2781_v11 = vpop.f32.mrf.mxu1 }
 0x7d0   : > { %v2199_v49 = vadd.f32 %v2781_v11, %v2030_v46 }
 0x7d1   : > { %v2175_v7 = vpop.f32.mrf.mxu1 }
 0x7d2   : > { %2207 = vst [vmem:[#allocation2 + $0x20] sm:$0xff] %v2199_v49  ;;  %v2198_v25 = vadd.f32 %v2175_v7, %v2029_v4 }
 0x7d4   : > { %2206 = vst [vmem:[#allocation2 + $0x8] sm:$0xff] %v2198_v25 }
 0x7d7   : > { %v2784_v62 = vpop.f32.mrf.mxu1 }
 0x7d8   : > { %v2201_v56 = vadd.f32 %v2784_v62, %v2032_v54 }
 0x7d9   : > { %v2185_v59 = vpop.f32.mrf.mxu1 }
 0x7da   : > { %2209 = vst [vmem:[#allocation2 + $0x38] sm:$0xff] %v2201_v56  ;;  %v2200_v6 = vadd.f32 %v2185_v59, %v2031_v1 }
 0x7db   : > { %v2345_v24 = vpop.f32.mrf.mxu1 }
 0x7dc   : > { %2208 = vst [vmem:[#allocation2 + $0x28] sm:$0xff] %v2200_v6  ;;  %v2587_v8 = vpack.c.bf16 %v2345_v24, %v2345_v24 }
 0x7dd   : > { %v2795_v15 = vpop.f32.mrf.mxu1 }
 0x7de   : > { %2361 = vst.msk [vmem:[%s3419_s27] sm:$0xf] %vm2360_vm1, %v2587_v8 }
 0x7df   : > { %v2348_v9 = vpop.f32.mrf.mxu1 }
 0x7e0   : > { %v2588_v12 = vpack.c.bf16 %v2348_v9, %v2348_v9 }
 0x7e1   : > { %v2796_v10 = vpop.f32.mrf.mxu1 }
 0x7e2   : > { %2362 = vst.msk [vmem:[%s3419_s27 + $0x4] sm:$0xf] %vm2360_vm1, %v2588_v12 }
 0x7e3   : > { %3112 = shalt.err (!%p3109_p13)
}
 0x7e4   : > { %s3113_s25 = scalar_lea.hbm %s3733_s17, 128  ;;  %s3117_s19 = scalar_lea.hbm %s3836_s23, 512 }
 0x7e5   : > { %p3114_p2 = scmp.ne.s32.totalorder %s3733_s17, %s3113_s25  ;;  %p3118_p3 = scmp.lt.s32.totalorder %s3733_s17, %s3836_s23 }
 0x7e6   : > { %p3119_p8 = scmp.lt.s32.totalorder %s3117_s19, %s3113_s25 }
 0x7e7   : > { %p3115_p4 = pnand %p3114_p2, %p3837_p0 }
 0x7e8   : > { %p3120_p10 = por %p3119_p8, %p3118_p3 }
 0x7e9   : > { %p3116_p5 = pneg %p3115_p4 }
 0x7eb   : > { %p3121_p12 = pnand %p3120_p10, %p3116_p5 }
 0x7ed   : > { %3124 = shalt.err (!%p3121_p12)
}
 0x7ee   : > { %s3211_s29 = smov 64   ;;  %s3212_s28 = smov 4  }
 0x7ef   : > { %2809 = dma.vmem_to_hbm [thread:$0]  (%p3837_p0), %s3735_s24, 128, %s3733_s17, %s3740_s18, %s3211_s29, %s3211_s29, %s3212_s28  }
 0x7f0 PF: > { %s3838_s16 = sld [smem:[#allocation18_spill]] }
 0x7f1   : > { %s3839_s20 = sld [smem:[#allocation14_spill]] }
 0x7f2   : > { %s3840_s21 = sld [smem:[#allocation21_spill]] }
 0x7f6   : > { %p2831_p1 = scmp.ge.s32.totalorder %s3838_s16, 2 }
 0x7f7   : > { %s2394_s30 = sand.u32 1, %s3839_s20  }
 0x7f8   : > { %p3841_p6 = scmp.ne.s32.totalorder %s3840_s21, 0  ;;  %s2395_s25 = scalar_lea.sflag [#allocation6], %s2394_s30 }
 0x7fa   : > { %p2822_p7 = pnand %p2831_p1, %p3841_p6 }
 0x7fc   : > { %p2823_p9 = pneg %p2822_p7 }
 0x7fe   : > { %3166 = dma.done.wait (%p2823_p9), %s2395_s25, 128  }
 0x7ff   : > { %3168 = vsyncadd (%p2823_p9), %s2395_s25, 4294967168  ;;  %s28_s15 = sadd.s32 1, %s3838_s16   ;;  %s3842_s27 = sld [smem:[#allocation15_spill]] }
 0x800   : > { %p25_p11 = scmp.ge.s32.totalorder %s28_s15, 6   ;;  %s3843_s13 = sld [smem:[#allocation22_spill]] }
 0x801   : > { %s3844_s28 = sld [smem:[#allocation16_spill]]  ;;  %s3848_s25 = smov %s3175_s26 }
 0x802   : > { %s3845_s29 = sld [smem:[#allocation17_spill]]  ;;  %27 = sbr.rel (!%p25_p11) target bundleno = 9 (0x9), region = 124 }
 0x803   : > { %s3846_s30 = sld [smem:[#allocation19_spill]] }
 0x804   : > { %s3847_s14 = sld [smem:[#allocation20_spill]] }
 0x805   : > { %s3849_s26 = smov %s3842_s27 }
 0x806   : > { %s3850_s27 = smov %s3843_s13 }
 0x807   :  { %2400 = vsyncpa [#allocation5], 1 }
 0x808   :  { %2402 = vsyncpa [#allocation5 + $0x1], 1 }
 0x809   :  { %2403 = vsyncpa [#allocation8], 1 }
 0x80a   :  { %2404 = vsyncpa [#allocation6], 1 }
 0x80b   :  { %2406 = vsyncpa [#allocation6 + $0x1], 1 }

</bundles_post_ra>
